<compile_context>
chip_gen: v7x
topology: tpu7x:2x2x1
jax: 0.10.0
libtpu: 0.0.40
codegen_flags: <defaults>
</compile_context>

<pallas_src>
import functools

import jax
import jax.numpy as jnp
from jax.experimental import pallas as pl
from jax.experimental.pallas import tpu as pltpu

HIDDEN_SIZE = 1536       # model dim (asserted == 1536 in the torch module)
HIDDEN_FEATURES = 4096   # SwiGLU inner dim


def _default_tiles():
    """(tile_m, tile_f, vmem_limit_bytes) tuned per TPU generation.

    With the m-outer / f-inner grid, each token tile re-streams all of W12+Wout
    (~38 MB bf16), so arithmetic intensity ~= tile_m flops/byte.  tile_m must
    exceed the MXU/HBM balance point (~650 on v6e, ~620 per-TC on v7x, ~240 on
    v5e) while the working set stays inside VMEM (only 64 MiB on v7x).
    """
    kind = ""
    try:
        kind = jax.devices()[0].device_kind.lower()
    except Exception:
        pass
    if "v7" in kind:
        return 768, 512, 56 * 1024 * 1024     # 64 MiB VMEM budget on v7x
    if "v5 lite" in kind or "v5e" in kind or "v5litepod" in kind:
        return 512, 512, 96 * 1024 * 1024     # near the v5e balance point
    return 1024, 512, 96 * 1024 * 1024        # v6e and default (128 MiB VMEM)


def _swiglu_kernel_f32_out(x_ref, w12_ref, b12_ref, wo_ref, bo_ref, o_ref, *,
                           tile_f):
    """f32 output: accumulate directly into the resident o_ref (no scratch)."""
    f = pl.program_id(1)

    x = x_ref[...]                                              # (tm, D) bf16
    # One fused up-projection yields both SwiGLU halves in f32.
    h = jnp.dot(x, w12_ref[...], preferred_element_type=jnp.float32) + b12_ref[...]
    h1 = h[:, :tile_f]
    h2 = h[:, tile_f:]
    # silu(h1) * h2 — exp and the approx reciprocal both ride the EUP slot,
    # essentially free next to the MXU work; elementwise math stays f32.
    sig = pl.reciprocal(1.0 + jnp.exp(-h1), approx=True)
    g = (h1 * sig) * h2                                         # (tm, tile_f) f32
    part = jnp.dot(g.astype(wo_ref.dtype), wo_ref[...],
                   preferred_element_type=jnp.float32)          # (tm, D) f32

    @pl.when(f == 0)
    def _init():
        o_ref[...] = part + bo_ref[...]

    @pl.when(f > 0)
    def _accum():
        o_ref[...] += part


def _swiglu_kernel_cast_out(x_ref, w12_ref, b12_ref, wo_ref, bo_ref, o_ref,
                            acc_ref, *, tile_f):
    """Non-f32 output: f32 scratch accumulator, cast on the last reduction step."""
    f = pl.program_id(1)

    @pl.when(f == 0)
    def _init():
        acc_ref[...] = jnp.zeros_like(acc_ref)

    x = x_ref[...]
    h = jnp.dot(x, w12_ref[...], preferred_element_type=jnp.float32) + b12_ref[...]
    h1 = h[:, :tile_f]
    h2 = h[:, tile_f:]
    sig = pl.reciprocal(1.0 + jnp.exp(-h1), approx=True)
    g = (h1 * sig) * h2
    acc_ref[...] += jnp.dot(g.astype(wo_ref.dtype), wo_ref[...],
                            preferred_element_type=jnp.float32)

    @pl.when(f == pl.num_programs(1) - 1)
    def _finalize():
        o_ref[...] = (acc_ref[...] + bo_ref[...]).astype(o_ref.dtype)


def prepare_swiglu_params(w1, b1, w2, b2, wo, bo, *, tile_f):
    """One-time weight preprocessing, hoisted out of the jitted forward path.

    Casts MXU operands to bf16 and interleaves W1/W2 per tile_f so a single
    contiguous (D, 2*tile_f) block holds matching slices of both SwiGLU halves.
    """
    D, F = w1.shape
    assert F % tile_f == 0
    nf = F // tile_f
    w12 = jnp.concatenate(
        [w1.astype(jnp.bfloat16).reshape(D, nf, tile_f),
         w2.astype(jnp.bfloat16).reshape(D, nf, tile_f)],
        axis=-1).reshape(D, 2 * F)
    b12 = jnp.concatenate(
        [b1.reshape(nf, tile_f), b2.reshape(nf, tile_f)],
        axis=-1).reshape(1, 2 * F).astype(jnp.float32)
    wo_b = wo.astype(jnp.bfloat16)
    bo_2d = bo.reshape(1, D).astype(jnp.float32)
    return w12, b12, wo_b, bo_2d


@functools.partial(jax.jit,
                   static_argnames=("tile_m", "tile_f", "vmem_limit_bytes"))
def swiglu_ffn_pallas(x, w12, b12, wo_b, bo_2d, *, tile_m, tile_f,
                      vmem_limit_bytes):
    """x: (..., 1536) -> (..., 1536), matching Dinov2SwiGLUFFN.forward."""
    orig_shape = x.shape
    D = orig_shape[-1]
    assert D == HIDDEN_SIZE
    F = w12.shape[1] // 2
    assert F == HIDDEN_FEATURES and F % tile_f == 0
    nf = F // tile_f

    xt = x.reshape(-1, D)                      # (T, D)
    T = xt.shape[0]

    # Token-tile rows:
    #   * cap at the roofline-sized tile_m,
    #   * if one tile would cover everything but T >= 16 rows, split into two
    #     tiles so the "parallel" m axis feeds both v7x TensorCores,
    #   * always a multiple of 8 sublanes.
    if T > tile_m:
        tm = tile_m
    elif T >= 16:
        tm = -(-((T + 1) // 2) // 8) * 8
    else:
        tm = max(8, -(-T // 8) * 8)
    T_pad = -(-T // tm) * tm
    if T_pad != T:
        xt = jnp.pad(xt, ((0, T_pad - T), (0, 0)))

    # bf16 MXU operands; all accumulation stays f32 inside the kernel.
    xt_b = xt.astype(jnp.bfloat16)

    out_dtype = x.dtype
    if out_dtype == jnp.float32:
        kernel = functools.partial(_swiglu_kernel_f32_out, tile_f=tile_f)
        scratch_shapes = []                    # accumulate straight into o_ref
    else:
        kernel = functools.partial(_swiglu_kernel_cast_out, tile_f=tile_f)
        scratch_shapes = [pltpu.VMEM((tm, D), jnp.float32)]

    grid = (T_pad // tm, nf)   # (token tiles: parallel, feature tiles: reduction)

    out = pl.pallas_call(
        kernel,
        out_shape=jax.ShapeDtypeStruct((T_pad, D), out_dtype),
        grid_spec=pltpu.PrefetchScalarGridSpec(
            num_scalar_prefetch=0,
            grid=grid,
            in_specs=[
                pl.BlockSpec((tm, D), lambda m, f: (m, 0)),           # x tile (resident over f)
                pl.BlockSpec((D, 2 * tile_f), lambda m, f: (0, f)),   # fused W1|W2 tile
                pl.BlockSpec((1, 2 * tile_f), lambda m, f: (0, f)),   # fused b1|b2 tile
                pl.BlockSpec((tile_f, D), lambda m, f: (f, 0)),       # Wout tile
                pl.BlockSpec((1, D), lambda m, f: (0, 0)),            # b_out
            ],
            out_specs=pl.BlockSpec((tm, D), lambda m, f: (m, 0)),     # resident over f
            scratch_shapes=scratch_shapes,
        ),
        compiler_params=pltpu.CompilerParams(
            dimension_semantics=("parallel", "arbitrary"),
            vmem_limit_bytes=vmem_limit_bytes,
        ),
    )(xt_b, w12, b12, wo_b, bo_2d)

    return out[:T].reshape(orig_shape)


def dinov2_swiglu_ffn(x, w1, b1, w2, b2, wo, bo, *, tile_m=None, tile_f=None,
                      vmem_limit_bytes=None):
    """Convenience wrapper: preprocess weights once + run the fused kernel."""
    d_tm, d_tf, d_vmem = _default_tiles()
    tile_m = d_tm if tile_m is None else tile_m
    tile_f = d_tf if tile_f is None else tile_f
    vmem_limit_bytes = d_vmem if vmem_limit_bytes is None else vmem_limit_bytes
    params = prepare_swiglu_params(w1, b1, w2, b2, wo, bo, tile_f=tile_f)
    return swiglu_ffn_pallas(x, *params, tile_m=tile_m, tile_f=tile_f,
                             vmem_limit_bytes=vmem_limit_bytes)


def swiglu_ffn_reference_f32(x, w1, b1, w2, b2, wo, bo):
    h1 = x @ w1 + b1
    h2 = x @ w2 + b2
    g = jax.nn.silu(h1) * h2
    return g @ wo + bo


def swiglu_ffn_reference_bf16(x, w1, b1, w2, b2, wo, bo):
    """Reference with the same bf16-operand / f32-accumulate numerics as the kernel."""
    xb = x.astype(jnp.bfloat16)
    h1 = jnp.dot(xb, w1.astype(jnp.bfloat16),
                 preferred_element_type=jnp.float32) + b1
    h2 = jnp.dot(xb, w2.astype(jnp.bfloat16),
                 preferred_element_type=jnp.float32) + b2
    g = jax.nn.silu(h1) * h2
    return jnp.dot(g.astype(jnp.bfloat16), wo.astype(jnp.bfloat16),
                   preferred_element_type=jnp.float32) + bo


if __name__ == "__main__":
    key = jax.random.PRNGKey(0)
    k_x, k_win, k_bin, k_wout, k_bout = jax.random.split(key, 5)

    batch, seq = 2, 8
    # Input: (batch, seq, hidden_size) — hidden_size fixed at 1536 by the module.
    x = jax.random.normal(k_x, (batch, seq, HIDDEN_SIZE), dtype=jnp.float32) * 0.5

    # Deterministic synthetic parameters (PyTorch Linear stores (out, in); we
    # build them that way and transpose to the kernel's (in, out) layout).
    w_in = jax.random.normal(
        k_win, (2 * HIDDEN_FEATURES, HIDDEN_SIZE), dtype=jnp.float32) * 0.02
    b_in = jax.random.normal(
        k_bin, (2 * HIDDEN_FEATURES,), dtype=jnp.float32) * 0.02
    w_out = jax.random.normal(
        k_wout, (HIDDEN_SIZE, HIDDEN_FEATURES), dtype=jnp.float32) * 0.02
    b_out = jax.random.normal(
        k_bout, (HIDDEN_SIZE,), dtype=jnp.float32) * 0.02

    # chunk(2, dim=-1) of (x @ W_in^T + b_in)  ==  split of W_in rows / b_in.
    w1 = w_in[:HIDDEN_FEATURES].T        # (1536, 4096)
    w2 = w_in[HIDDEN_FEATURES:].T        # (1536, 4096)
    b1 = b_in[:HIDDEN_FEATURES]          # (4096,)
    b2 = b_in[HIDDEN_FEATURES:]          # (4096,)
    wo = w_out.T                         # (4096, 1536)
    bo = b_out                           # (1536,)

    y = dinov2_swiglu_ffn(x, w1, b1, w2, b2, wo, bo)
    y = jax.block_until_ready(y)
    assert y.shape == x.shape and y.dtype == x.dtype

    x2 = x.reshape(-1, HIDDEN_SIZE)
    y_bf16 = swiglu_ffn_reference_bf16(x2, w1, b1, w2, b2, wo, bo).reshape(x.shape)
    y_f32 = swiglu_ffn_reference_f32(x2, w1, b1, w2, b2, wo, bo).reshape(x.shape)

    # Match the bf16-matmul reference tightly; f32 reference loosely (bf16 rounding).
    assert jnp.allclose(y, y_bf16, atol=1e-2, rtol=1e-2), (
        float(jnp.max(jnp.abs(y - y_bf16))))
    assert jnp.allclose(y, y_f32, atol=5e-2, rtol=5e-2), (
        float(jnp.max(jnp.abs(y - y_f32))))

    print("KERNEL_OK")
</pallas_src>

<mosaic_0001>
module attributes {stable_mosaic.version = 11 : i64} {
  func.func @_swiglu_kernel_f32_out(%arg0: i32, %arg1: i32, %arg2: memref<8x1536xbf16, #tpu.memory_space<vmem>>, %arg3: memref<1536x1024xbf16, #tpu.memory_space<vmem>>, %arg4: memref<1x1024xf32, #tpu.memory_space<vmem>>, %arg5: memref<512x1536xbf16, #tpu.memory_space<vmem>>, %arg6: memref<1x1536xf32, #tpu.memory_space<vmem>>, %arg7: memref<8x1536xf32, #tpu.memory_space<vmem>>) attributes {dimension_semantics = [#tpu.dimension_semantics<parallel>, #tpu.dimension_semantics<arbitrary>], iteration_bounds = array<i64: 2, 8>, scalar_prefetch = 0 : i64, scratch_operands = 0 : i64, tpu.core_type = #tpu.core_type<tc>, window_params = [{transform_indices = @transform_0, window_bounds = array<i64: 8, 1536>}, {transform_indices = @transform_1, window_bounds = array<i64: 1536, 1024>}, {transform_indices = @transform_2, window_bounds = array<i64: 1, 1024>}, {transform_indices = @transform_3, window_bounds = array<i64: 512, 1536>}, {pipeline_mode = #tpu.pipeline_mode<synchronous>, transform_indices = @transform_4, window_bounds = array<i64: 1, 1536>}, {transform_indices = @transform_5, window_bounds = array<i64: 8, 1536>}]} {
    %c0 = arith.constant 0 : index
    %c0_0 = arith.constant 0 : index
    %0 = vector.load %arg2[%c0, %c0_0] : memref<8x1536xbf16, #tpu.memory_space<vmem>>, vector<8x1536xbf16>
    %c0_1 = arith.constant 0 : index
    %c0_2 = arith.constant 0 : index
    %1 = vector.load %arg3[%c0_1, %c0_2] : memref<1536x1024xbf16, #tpu.memory_space<vmem>>, vector<1536x1024xbf16>
    %cst = arith.constant dense<0.000000e+00> : vector<8x1024xf32>
    %2 = tpu.matmul %0, %1, %cst {dimension_numbers = #tpu.dot_dimension_numbers<[1], [0], [0], [1], [0, 0, 1, 1], [], []>} : vector<8x1536xbf16>, vector<1536x1024xbf16>, vector<8x1024xf32> -> vector<8x1024xf32>
    %c0_3 = arith.constant 0 : index
    %c0_4 = arith.constant 0 : index
    %3 = vector.load %arg4[%c0_3, %c0_4] : memref<1x1024xf32, #tpu.memory_space<vmem>>, vector<1x1024xf32>
    %4 = vector.broadcast %3 : vector<1x1024xf32> to vector<8x1024xf32>
    %5 = arith.addf %2, %4 : vector<8x1024xf32>
    %6 = vector.extract_strided_slice %5 {offsets = [0, 0], sizes = [8, 512], strides = [1, 1]} : vector<8x1024xf32> to vector<8x512xf32>
    %7 = vector.extract_strided_slice %5 {offsets = [0, 512], sizes = [8, 512], strides = [1, 1]} : vector<8x1024xf32> to vector<8x512xf32>
    %cst_5 = arith.constant 0.000000e+00 : f32
    %8 = vector.broadcast %cst_5 : f32 to vector<8x512xf32>
    %9 = arith.subf %8, %6 : vector<8x512xf32>
    %10 = math.exp %9 : vector<8x512xf32>
    %cst_6 = arith.constant 1.000000e+00 : f32
    %11 = vector.broadcast %cst_6 : f32 to vector<8x512xf32>
    %12 = arith.addf %11, %10 : vector<8x512xf32>
    %13 = tpu.reciprocal %12 {approx = true} : vector<8x512xf32> -> vector<8x512xf32>
    %14 = arith.mulf %6, %13 : vector<8x512xf32>
    %15 = arith.mulf %14, %7 : vector<8x512xf32>
    %16 = arith.truncf %15 : vector<8x512xf32> to vector<8x512xbf16>
    %c0_7 = arith.constant 0 : index
    %c0_8 = arith.constant 0 : index
    %17 = vector.load %arg5[%c0_7, %c0_8] : memref<512x1536xbf16, #tpu.memory_space<vmem>>, vector<512x1536xbf16>
    %cst_9 = arith.constant dense<0.000000e+00> : vector<8x1536xf32>
    %18 = tpu.matmul %16, %17, %cst_9 {dimension_numbers = #tpu.dot_dimension_numbers<[1], [0], [0], [1], [0, 0, 1, 1], [], []>} : vector<8x512xbf16>, vector<512x1536xbf16>, vector<8x1536xf32> -> vector<8x1536xf32>
    %c0_i32 = arith.constant 0 : i32
    %19 = arith.cmpi eq, %arg1, %c0_i32 : i32
    %20 = arith.extui %19 : i1 to i32
    %c0_i32_10 = arith.constant 0 : i32
    %21 = arith.cmpi ne, %20, %c0_i32_10 : i32
    scf.if %21 {
      %c0_13 = arith.constant 0 : index
      %c0_14 = arith.constant 0 : index
      %25 = vector.load %arg6[%c0_13, %c0_14] : memref<1x1536xf32, #tpu.memory_space<vmem>>, vector<1x1536xf32>
      %26 = vector.broadcast %25 : vector<1x1536xf32> to vector<8x1536xf32>
      %27 = arith.addf %18, %26 : vector<8x1536xf32>
      %c0_15 = arith.constant 0 : index
      %c0_16 = arith.constant 0 : index
      %28 = vector.load %arg7[%c0_15, %c0_16] : memref<8x1536xf32, #tpu.memory_space<vmem>>, vector<8x1536xf32>
      tpu.vector_store %arg7[%c0_15, %c0_16], %27 {strides = array<i32>} : memref<8x1536xf32, #tpu.memory_space<vmem>>, vector<8x1536xf32>,
    } else {
    }
    %c0_i32_11 = arith.constant 0 : i32
    %22 = arith.cmpi sgt, %arg1, %c0_i32_11 : i32
    %23 = arith.extui %22 : i1 to i32
    %c0_i32_12 = arith.constant 0 : i32
    %24 = arith.cmpi ne, %23, %c0_i32_12 : i32
    scf.if %24 {
      %c0_13 = arith.constant 0 : index
      %c0_14 = arith.constant 0 : index
      %25 = vector.load %arg7[%c0_13, %c0_14] : memref<8x1536xf32, #tpu.memory_space<vmem>>, vector<8x1536xf32>
      %26 = arith.addf %25, %18 : vector<8x1536xf32>
      %c0_15 = arith.constant 0 : index
      %c0_16 = arith.constant 0 : index
      %27 = vector.load %arg7[%c0_15, %c0_16] : memref<8x1536xf32, #tpu.memory_space<vmem>>, vector<8x1536xf32>
      tpu.vector_store %arg7[%c0_15, %c0_16], %26 {strides = array<i32>} : memref<8x1536xf32, #tpu.memory_space<vmem>>, vector<8x1536xf32>,
    } else {
    }
    return
  }
  func.func @transform_0(%arg0: i32, %arg1: i32) -> (i32, i32) {
    %c0_i32 = arith.constant 0 : i32
    %c0_i32_0 = arith.constant 0 : i32
    return %arg0, %c0_i32 : i32, i32
  }
  func.func @transform_1(%arg0: i32, %arg1: i32) -> (i32, i32) {
    %c0_i32 = arith.constant 0 : i32
    %c0_i32_0 = arith.constant 0 : i32
    return %c0_i32, %arg1 : i32, i32
  }
  func.func @transform_2(%arg0: i32, %arg1: i32) -> (i32, i32) {
    %c0_i32 = arith.constant 0 : i32
    %c0_i32_0 = arith.constant 0 : i32
    return %c0_i32, %arg1 : i32, i32
  }
  func.func @transform_3(%arg0: i32, %arg1: i32) -> (i32, i32) {
    %c0_i32 = arith.constant 0 : i32
    %c0_i32_0 = arith.constant 0 : i32
    return %arg1, %c0_i32 : i32, i32
  }
  func.func @transform_4(%arg0: i32, %arg1: i32) -> (i32, i32) {
    %c0_i32 = arith.constant 0 : i32
    %c0_i32_0 = arith.constant 0 : i32
    %c0_i32_1 = arith.constant 0 : i32
    return %c0_i32, %c0_i32_0 : i32, i32
  }
  func.func @transform_5(%arg0: i32, %arg1: i32) -> (i32, i32) {
    %c0_i32 = arith.constant 0 : i32
    %c0_i32_0 = arith.constant 0 : i32
    return %arg0, %c0_i32 : i32, i32
  }
}

</mosaic_0001>

<bundles_post_ra>
// kernel: swiglu_ffn_pallas.1
= control target key start
LH: loop header
LB: loop body
LE: loop exit
PB: predicated region body
PF: predicated region fallthrough
CT: control target
= control target key end

     0   :  { %s13418_s0 = inlined_call_operand.hbm [shape: bf16[16,1536], index: 0, kind: input, shape index: {}]   ;;  %s13419_s1 = inlined_call_operand.hbm [shape: bf16[1536,8192], index: 1, kind: input, shape index: {}]   ;;  %s13420_s2 = inlined_call_operand.hbm [shape: f32[1,8192], index: 2, kind: input, shape index: {}]   ;;  %s13421_s3 = inlined_call_operand.hbm [shape: bf16[4096,1536], index: 3, kind: input, shape index: {}]   ;;  %s13422_s4 = inlined_call_operand.hbm [shape: f32[1,1536], index: 4, kind: input, shape index: {}]   ;;  %s13423_s5 = inlined_call_operand.hbm [shape: f32[16,1536], index: 5, kind: output, shape index: {}]  }
   0x1   :  { %13441 = sst [smem:[#allocation26_spill]] %s13419_s1 }
   0x2   :  { %13442 = sst [smem:[#allocation27_spill]] %s13422_s4 }
   0x3   :  { %13443 = sst [smem:[#allocation28_spill]] %s13423_s5 }
   0x4   :  { %10 = vsyncpa [#allocation3], 0 }
   0x5   :  { %12 = vsyncpa [#allocation3 + $0x1], 0 }
   0x6   :  { %13 = vsyncpa [#allocation6], 0 }
   0x7   :  { %15 = vsyncpa [#allocation6 + $0x1], 0 }
   0x8   :  { %16 = vsyncpa [#allocation9], 0 }
   0x9   :  { %18 = vsyncpa [#allocation9 + $0x1], 0 }
   0xa   :  { %19 = vsyncpa [#allocation4], 0 }
   0xb   :  { %21 = vsyncpa [#allocation4 + $0x1], 0  ;;  %s11569_s18 = smov 0   ;;  %s11571_s19 = smov 0  }
   0xc   :  { %s11573_s20 = smov 0   ;;  %s11575_s21 = smov 0  }
   0xd   :  { %s11577_s22 = smov 0   ;;  %s11579_s23 = smov 0  }
   0xe   :  { %s11581_s24 = smov 0   ;;  %s11583_s25 = smov 0  }
   0xf   :  { %s11585_s26 = smov 0   ;;  %s11587_s27 = smov 0  }
  0x10   :  { %s11589_s28 = smov 0  }
  0x11 LB: > { %13444 = sst [smem:[#allocation17_spill]] %s11498_s21  ;;  %s11623_s29 = sadd.s32 4294967295, %s11526_s28   ;;  %s11526_s28 = sphi %s11589_s28, %s27_s28   ;;  %s11522_s27 = sphi %s11587_s27, %s13499_s27   ;;  %s11518_s26 = sphi %s11585_s26, %s13498_s26   ;;  %s11514_s25 = sphi %s11583_s25, %s13488_s25   ;;  %s11510_s24 = sphi %s11581_s24, %s13497_s24   ;;  %s11506_s23 = sphi %s11579_s23, %s13496_s23   ;;  %s11502_s22 = sphi %s11577_s22, %s13495_s22   ;;  %s11498_s21 = sphi %s11575_s21, %s13494_s21   ;;  %s11494_s20 = sphi %s11573_s20, %s13493_s20   ;;  %s11490_s19 = sphi %s11571_s19, %s13492_s19   ;;  %s11486_s18 = sphi %s11569_s18, %s13491_s18  }
  0x12   : > { %13445 = sst [smem:[#allocation18_spill]] %s11510_s24  ;;  %s9198_s30 = sadd.s32 4294967294, %s11526_s28  }
  0x13   : > { %13446 = sst [smem:[#allocation19_spill]] %s11514_s25  ;;  %p13427_p0 = scmp.eq.s32.totalorder %s11526_s28, 0 }
  0x14   : > { %13447 = sst [smem:[#allocation20_spill]] %s11522_s27  ;;  %p59_p1 = scmp.ne.s32.totalorder %s11502_s22, %s11498_s21 }
  0x15   : > { %p13424_p2 = scmp.eq.s32.totalorder %s11623_s29, 0  ;;  %p79_p3 = scmp.ne.s32.totalorder %s11494_s20, %s11490_s19 }
  0x16   : > { %p85_p4 = scmp.ne.s32.totalorder %s11490_s19, %s11486_s18  ;;  %p188_p9 = scmp.eq.s32.totalorder %s9198_s30, 15 }
  0x17   : > { %p11636_p5 = por %p13424_p2, %p59_p1  ;;  %p11643_p7 = por %p79_p3, %p13427_p0 }
  0x18   : > { %p11649_p8 = por %p85_p4, %p13424_p2  ;;  %p9199_p10 = scmp.ge.s32.totalorder %s11526_s28, 1 }
  0x19   : > { %s13448_s7 = scalar_select %p11636_p5, 1, 0 }
  0x1a   : > { %s13450_s9 = scalar_select %p11649_p8, 1, 0 }
  0x1b   : > { %p195_p11 = scmp.lt.s32.totalorder %s11526_s28, 17  ;;  %p11655_p12 = por %p188_p9, %p59_p1 }
  0x1c   : > { %s11528_s12 = smov [#allocation10]   ;;  %p13426_p4 = scmp.lt.s32.totalorder %s11526_s28, 16 }
  0x1d   : > { %s13451_s10 = scalar_select %p11655_p12, 1, 0 }
  0x1e   : > { %p11659_p13 = pnand %p9199_p10, %p195_p11  ;;  %s208_s13 = sshll.u32 %s11528_s12, 4  ;;  %s209_s13 = int_to_ptr.vmem [resolvable:$true] %s208_s13 }
  0x1f   : > { %13452 = sst [smem:[#allocation21_spill]] %s13451_s10  ;;  %p11677_p1 = pnand %p13426_p4, %p11643_p7 }
  0x20   : > { %s13453_s11 = scalar_select %p11659_p13, 1, 0 }
  0x21   : > { %p10521_p3 = pneg %p11659_p13  ;;  %s13456_s4 = sld [smem:[#allocation27_spill]] }
  0x22   : > { %s13455_s16 = scalar_select %p11677_p1, 1, 0 }
  0x23   : > { %p11669_p6 = pnand %p10521_p3, %p13424_p2 }
  0x25   : > { %p11246_p10 = pneg %p11669_p6 }
  0x27   : > { %s11244_s30 = scalar_lea.hbm %s13456_s4, 192 }
  0x28   : > { %p11245_p9 = scmp.ne.s32.totalorder %s13456_s4, %s11244_s30  ;;  %p11251_p2 = scmp.lt.u32.totalorder %s11244_s30, %s13456_s4 }
  0x2a   : > { %p11247_p11 = pnand %p11246_p10, %p11245_p9 }
  0x2c   : > { %p11248_p3 = pneg %p11247_p11 }
  0x2e   : > { %p11253_p7 = pnand %p11251_p2, %p11248_p3 }
  0x30   : > { %11256 = shalt.err (!%p11253_p7)
}
  0x31   : > { %s11257_s10 = scalar_lea.vmem %s209_s13, 192  ;;  %p11265_p8 = scmp.lt.s32.totalorder %s209_s13, %s209_s13 }
  0x32   : > { %p11258_p4 = scmp.ne.s32.totalorder %s209_s13, %s11257_s10  ;;  %p11266_p5 = scmp.lt.s32.totalorder %s11257_s10, %s11257_s10 }
  0x34   : > { %p11260_p0 = pnand %p11258_p4, %p11246_p10  ;;  %p11267_p13 = por %p11266_p5, %p11265_p8 }
  0x36   : > { %p11261_p12 = pneg %p11260_p0 }
  0x38   : > { %p11268_p1 = pnand %p11267_p13, %p11261_p12 }
  0x3a   : > { %11271 = shalt.err (!%p11268_p1)
}
  0x3b   : > { %10524 = dma.hbm_to_vmem [thread:$0]  (!%p11669_p6), %s13456_s4, 192, %s209_s13, [#allocation9]  }
  0x3c   : > { %s11698_s14 = sand.u32 1, %s11494_s20   ;;  %s10383_s18 = sshll.u32 %s11518_s26, 9 }
  0x3d   : > { %s10499_s30 = smul.u32 6144, %s11698_s14  ;;  %s13457_s1 = sld [smem:[#allocation26_spill]] }
  0x3e   : > { %s13458_s17 = sand.u32 1, %s11526_s28   ;;  %p13459_p2 = scmp.ne.s32.totalorder %s13455_s16, 0 }
  0x3f   : > { %s242_s15 = scalar_lea.vmem [#allocation5], %s10499_s30  ;;  %s11711_s13 = scalar_lea.sflag [#allocation6], %s13458_s17 }
  0x40   : > { %s249_s6 = sshll.u32 %s242_s15, 4  ;;  %p11717_p5 = pneg %p13459_p2  ;;  %s11707_s6 = int_to_ptr.vmem [resolvable:$true] %s249_s6 }
  0x43   : > { %s11705_s8 = scalar_lea.hbm %s13457_s1, %s10383_s18  ;;  %s11277_s30 = scalar_lea.hbm %s13457_s1, 786432 }
  0x44   : > { %s11272_s4 = scalar_lea.hbm %s11705_s8, 98304  ;;  %p11278_p12 = scmp.lt.u32.totalorder %s11705_s8, %s13457_s1 }
  0x45   : > { %p11273_p0 = scmp.ne.s32.totalorder %s11705_s8, %s11272_s4  ;;  %p11279_p13 = scmp.lt.u32.totalorder %s11277_s30, %s11272_s4 }
  0x46   : > { %p11281_p1 = scmp.lt.u32.totalorder %s11272_s4, %s11705_s8 }
  0x47   : > { %p11275_p6 = pnand %p11717_p5, %p11273_p0  ;;  %p11280_p4 = por %p11279_p13, %p11278_p12 }
  0x49   : > { %p11276_p8 = pneg %p11275_p6  ;;  %p11282_p9 = por %p11281_p1, %p11280_p4 }
  0x4b   : > { %p11283_p10 = pnand %p11282_p9, %p11276_p8 }
  0x4d   : > { %11286 = shalt.err (!%p11283_p10)
}
  0x4e   : > { %s11287_s17 = scalar_lea.vmem %s11707_s6, 98304  ;;  %s11529_s18 = smov [#allocation5]  }
  0x4f   : > { %p11288_p11 = scmp.ne.s32.totalorder %s11707_s6, %s11287_s17  ;;  %s11292_s12 = sshll.u32 %s11529_s18, 4  ;;  %s11293_s12 = int_to_ptr.vmem [resolvable:$false] %s11292_s12 }
  0x50   : > { %s11294_s10 = scalar_lea.vmem %s11293_s12, 196608  ;;  %p11295_p0 = scmp.lt.s32.totalorder %s11707_s6, %s11293_s12 }
  0x51   : > { %p11290_p3 = pnand %p11288_p11, %p11717_p5  ;;  %p11296_p6 = scmp.lt.s32.totalorder %s11294_s10, %s11287_s17 }
  0x53   : > { %p11291_p7 = pneg %p11290_p3  ;;  %p11297_p12 = por %p11296_p6, %p11295_p0 }
  0x55   : > { %p11298_p13 = pnand %p11297_p12, %p11291_p7 }
  0x57   : > { %11301 = shalt.err (!%p11298_p13)
}
  0x58   : > { %s11530_s4 = smov 4096   ;;  %s11531_s30 = smov 512  }
  0x59   : > { %s11532_s15 = smov 32   ;;  %s36_s17 = sadd.s32 1, %s11518_s26 }
  0x5a   : > { %10531 = dma.hbm_to_vmem [thread:$0]  (!%p13459_p2), %s11705_s8, 98304, %s11707_s6, %s11711_s13, %s11530_s4, %s11531_s30, %s11532_s15  }
  0x5b   : > { %s39_s18 = sadd.s32 1, %s11522_s27  ;;  %p37_p8 = scmp.ge.s32.totalorder %s36_s17, 8 }
  0x5c   : > { %s46_s12 = sadd.s32 1, %s11506_s23  ;;  %p53_p4 = scmp.ne.s32.totalorder %s11506_s23, %s11502_s22 }
  0x5d   : > { %s219_s10 = sand.u32 1, %s11506_s23   ;;  %s13501_s17 = smov (%p37_p8, %s36_s17), 0 }
  0x5e   : > { %13461 = sst [smem:[#allocation22_spill]] %s13501_s17  ;;  %s13503_s18 = smov (!%p37_p8, %s39_s18), %s11522_s27 }
  0x5f   : > { %p13462_p1 = scmp.eq.s32.totalorder %s11526_s28, 0  ;;  %s69_s1 = ssub.s32 %s11518_s26, %s13501_s17 }
  0x60   : > { %p41_p10 = scmp.ge.s32.totalorder %s13503_s18, 2  ;;  %p70_p11 = scmp.eq.s32.totalorder %s69_s1, 0 }
  0x61   : > { %p55_p9 = por %p13462_p1, %p53_p4  ;;  %p13463_p3 = scmp.eq.s32.totalorder %s11623_s29, 15 }
  0x62   : > { %s13505_s18 = smov (%p41_p10, %s13503_s18), 0  ;;  %s13467_s6 = sadd.s32 1, %s11494_s20 }
  0x63   : > { %p11756_p7 = por %p13463_p3, %p53_p4  ;;  %13466 = sst [smem:[#allocation24_spill]] %s13505_s18 }
  0x64   : > { %s11765_s4 = scalar_select %p70_p11, %s11494_s20, %s13467_s6  }
  0x65   : > { %s13464_s8 = scalar_select %p11756_p7, 1, 0 }
  0x66   : > { %s43_s30 = ssub.s32 %s11522_s27, %s13505_s18  ;;  %s10497_s15 = smul.u32 48, %s219_s10 }
  0x67   : > { %13465 = sst [smem:[#allocation23_spill]] %s13464_s8  ;;  %p44_p0 = scmp.eq.s32.totalorder %s43_s30, 0 }
  0x68   : > { %s10498_s5 = smul.u32 768, %s11522_s27  ;;  %p13468_p6 = scmp.lt.s32.totalorder %s11526_s28, 16 }
  0x69   : > { %s11777_s1 = scalar_select %p44_p0, %s11506_s23, %s46_s12  }
  0x6a   : > { %p11772_p12 = pnand %p13468_p6, %p55_p9  ;;  %s11782_s24 = scalar_lea.hbm %s13418_s0, %s10498_s5 }
  0x6b   : > { %13470 = sst [smem:[#allocation25_spill]] %s11777_s1  ;;  %s223_s6 = scalar_lea.vmem [#allocation2], %s10497_s15 }
  0x6c   : > { %s231_s30 = sshll.u32 %s223_s6, 4  ;;  %s220_s18 = scalar_lea.sflag [#allocation3], %s219_s10  ;;  %s11784_s30 = int_to_ptr.vmem [resolvable:$true] %s231_s30 }
  0x6d   : > { %s11302_s27 = scalar_lea.hbm %s11782_s24, 768  ;;  %p11304_p8 = pneg %p11772_p12 }
  0x6e   : > { %p11303_p13 = scmp.ne.s32.totalorder %s11782_s24, %s11302_s27  ;;  %s11307_s12 = scalar_lea.hbm %s13418_s0, 1536 }
  0x6f   : > { %p11308_p9 = scmp.lt.u32.totalorder %s11782_s24, %s13418_s0  ;;  %p11309_p10 = scmp.lt.u32.totalorder %s11307_s12, %s11302_s27 }
  0x70   : > { %p11305_p4 = pnand %p11304_p8, %p11303_p13  ;;  %p11311_p3 = scmp.lt.u32.totalorder %s11302_s27, %s11782_s24 }
  0x71   : > { %p11310_p11 = por %p11309_p10, %p11308_p9 }
  0x72   : > { %p11306_p1 = pneg %p11305_p4 }
  0x73   : > { %p11312_p0 = por %p11311_p3, %p11310_p11 }
  0x75   : > { %p11313_p6 = pnand %p11312_p0, %p11306_p1 }
  0x77   : > { %11316 = shalt.err (!%p11313_p6)
}
  0x78   : > { %s11317_s10 = scalar_lea.vmem %s11784_s30, 768  ;;  %s11533_s15 = smov [#allocation2]  }
  0x79   : > { %p11318_p13 = scmp.ne.s32.totalorder %s11784_s30, %s11317_s10  ;;  %s11322_s6 = sshll.u32 %s11533_s15, 4  ;;  %s11323_s6 = int_to_ptr.vmem [resolvable:$false] %s11322_s6 }
  0x7a   : > { %s11324_s1 = scalar_lea.vmem %s11323_s6, 1536  ;;  %p11325_p2 = scmp.lt.s32.totalorder %s11784_s30, %s11323_s6 }
  0x7b   : > { %p11320_p4 = pnand %p11318_p13, %p11304_p8  ;;  %p11326_p9 = scmp.lt.s32.totalorder %s11324_s1, %s11317_s10 }
  0x7d   : > { %p11321_p7 = pneg %p11320_p4  ;;  %p11327_p10 = por %p11326_p9, %p11325_p2 }
  0x7f   : > { %p11328_p11 = pnand %p11327_p10, %p11321_p7 }
  0x81   : > { %11331 = shalt.err (!%p11328_p11)
}
  0x82   : > { %10528 = dma.hbm_to_vmem [thread:$0]  (!%p11772_p12), %s11782_s24, 768, %s11784_s30, %s220_s18  }
  0x83   : > { %s9205_s27 = sshll.u32 %s11698_s14, 3  ;;  %s10384_s25 = sshll.u32 %s11518_s26, 7 }
  0x84   : > { %s11816_s8 = scalar_lea.hbm %s13420_s2, %s10384_s25  ;;  %s263_s10 = scalar_lea.vmem [#allocation7], %s9205_s27 }
  0x85   : > { %s271_s17 = sshll.u32 %s263_s10, 4  ;;  %s10500_s15 = smul.u32 3072, %s11698_s14  ;;  %s272_s17 = int_to_ptr.vmem [resolvable:$true] %s271_s17 }
  0x86   : > { %s11332_s6 = scalar_lea.hbm %s11816_s8, 128  ;;  %s11337_s30 = scalar_lea.hbm %s13420_s2, 1024 }
  0x87   : > { %p11333_p2 = scmp.ne.s32.totalorder %s11816_s8, %s11332_s6  ;;  %p11338_p8 = scmp.lt.u32.totalorder %s11816_s8, %s13420_s2 }
  0x88   : > { %p11339_p1 = scmp.lt.u32.totalorder %s11337_s30, %s11332_s6  ;;  %p11341_p0 = scmp.lt.u32.totalorder %s11332_s6, %s11816_s8 }
  0x89   : > { %p11335_p7 = pnand %p11333_p2, %p11717_p5 }
  0x8a   : > { %p11340_p3 = por %p11339_p1, %p11338_p8 }
  0x8b   : > { %p11336_p12 = pneg %p11335_p7 }
  0x8c   : > { %p11342_p6 = por %p11341_p0, %p11340_p3 }
  0x8e   : > { %p11343_p13 = pnand %p11342_p6, %p11336_p12 }
  0x90   : > { %11346 = shalt.err (!%p11343_p13)
}
  0x91   : > { %s11347_s14 = scalar_lea.vmem %s272_s17, 128  ;;  %s11534_s27 = smov [#allocation7]  }
  0x92   : > { %p11348_p4 = scmp.ne.s32.totalorder %s272_s17, %s11347_s14  ;;  %s11352_s5 = sshll.u32 %s11534_s27, 4  ;;  %s11353_s5 = int_to_ptr.vmem [resolvable:$false] %s11352_s5 }
  0x93   : > { %s11354_s12 = scalar_lea.vmem %s11353_s5, 256  ;;  %p11355_p11 = scmp.lt.s32.totalorder %s272_s17, %s11353_s5 }
  0x94   : > { %p11350_p9 = pnand %p11348_p4, %p11717_p5  ;;  %p11356_p2 = scmp.lt.s32.totalorder %s11354_s12, %s11347_s14 }
  0x96   : > { %p11351_p10 = pneg %p11350_p9  ;;  %p11357_p7 = por %p11356_p2, %p11355_p11 }
  0x98   : > { %p11358_p1 = pnand %p11357_p7, %p11351_p10 }
  0x9a   : > { %11361 = shalt.err (!%p11358_p1)
}
  0x9b   : > { %p13471_p8 = scmp.ne.s32.totalorder %s13455_s16, 0  ;;  %s10501_s10 = smul.u32 49152, %s11518_s26 }
  0x9c   : > { %s282_s6 = scalar_lea.vmem [#allocation8], %s10500_s15  ;;  %s13472_s25 = sand.u32 1, %s11526_s28  }
  0x9d   : > { %10534 = dma.hbm_to_vmem [thread:$0]  (!%p13471_p8), %s11816_s8, 128, %s272_s17, %s11711_s13  }
  0x9e   : > { %s290_s24 = sshll.u32 %s282_s6, 4  ;;  %s11841_s1 = scalar_lea.hbm %s13421_s3, %s10501_s10  ;;  %s11843_s24 = int_to_ptr.vmem [resolvable:$true] %s290_s24 }
  0x9f   : > { %s11847_s14 = scalar_lea.sflag [#allocation9], %s13472_s25  ;;  %s11362_s27 = scalar_lea.hbm %s11841_s1, 49152 }
  0xa0   : > { %p11363_p12 = scmp.ne.s32.totalorder %s11841_s1, %s11362_s27  ;;  %s11367_s17 = scalar_lea.hbm %s13421_s3, 393216 }
  0xa1   : > { %p11368_p6 = scmp.lt.u32.totalorder %s11841_s1, %s13421_s3  ;;  %p11369_p13 = scmp.lt.u32.totalorder %s11367_s17, %s11362_s27 }
  0xa2   : > { %p11365_p3 = pnand %p11363_p12, %p11717_p5  ;;  %p11371_p9 = scmp.lt.u32.totalorder %s11362_s27, %s11841_s1 }
  0xa3   : > { %p11370_p4 = por %p11369_p13, %p11368_p6 }
  0xa4   : > { %p11366_p0 = pneg %p11365_p3 }
  0xa5   : > { %p11372_p10 = por %p11371_p9, %p11370_p4 }
  0xa7   : > { %p11373_p11 = pnand %p11372_p10, %p11366_p0 }
  0xa9   : > { %11376 = shalt.err (!%p11373_p11)
}
  0xaa   : > { %s11377_s12 = scalar_lea.vmem %s11843_s24, 49152  ;;  %s11535_s10 = smov [#allocation8]  }
  0xab   : > { %p11378_p2 = scmp.ne.s32.totalorder %s11843_s24, %s11377_s12  ;;  %s11382_s6 = sshll.u32 %s11535_s10, 4  ;;  %s11383_s6 = int_to_ptr.vmem [resolvable:$false] %s11382_s6 }
  0xac   : > { %s11384_s18 = scalar_lea.vmem %s11383_s6, 98304  ;;  %p11385_p12 = scmp.lt.s32.totalorder %s11843_s24, %s11383_s6 }
  0xad   : > { %p11380_p7 = pnand %p11378_p2, %p11717_p5  ;;  %p11386_p3 = scmp.lt.s32.totalorder %s11384_s18, %s11377_s12 }
  0xaf   : > { %p11381_p1 = pneg %p11380_p7  ;;  %p11387_p6 = por %p11386_p3, %p11385_p12 }
  0xb1   : > { %p11388_p13 = pnand %p11387_p6, %p11381_p1 }
  0xb3   : > { %11391 = shalt.err (!%p11388_p13)
}
  0xb4   : > { %s11536_s30 = smov 768   ;;  %s11537_s25 = smov 48  }
  0xb5   : > { %10537 = dma.hbm_to_vmem [thread:$0]  (!%p13471_p8), %s11841_s1, 49152, %s11843_s24, %s11847_s14, %s11536_s30, %s11536_s30, %s11537_s25  }
  0xb6   : > { %p13473_p5 = scmp.ne.s32.totalorder %s13453_s11, 0 }
  0xb7   : > { %s11874_s21 = sand.u32 (!%p13473_p5), 1, %s11502_s22   ;;  %p13474_p0 = scmp.ne.s32.totalorder (!%p13473_p5), %s13448_s7, 0 }
  0xb8   : > { %302 = sbr.rel (%p13473_p5) target bundleno = 1776 (0x6f0), region = 40  ;;  %s305_s13 = scalar_lea.sflag (!%p13473_p5), [#allocation3], %s11874_s21 }
  0xb9   : > { %s10502_s27 = smul.u32 (!%p13473_p5), 48, %s11874_s21 }
  0xbb   : > { %s11878_s8 = scalar_lea.vmem (!%p13473_p5), [#allocation2], %s10502_s27 }
  0xbf   : > { %11465 = dma.done.wait (%p13474_p0), %s305_s13, 768  }
  0xc0   : > { %11467 = vsyncadd (%p13474_p0), %s305_s13, 4294966528  ;;  %s313_s11 = sand.u32 1, %s11623_s29   ;;  %s315_s16 = sand.u32 1, %s11490_s19  }
  0xc1   : > { %s10503_s24 = smul.u32 6144, %s315_s16  ;;  %s314_s1 = scalar_lea.sflag [#allocation6], %s313_s11 }
  0xc2   : > { %p13475_p8 = scmp.ne.s32.totalorder %s13450_s9, 0 }
  0xc3   : > { %s11886_s14 = scalar_lea.vmem [#allocation5], %s10503_s24 }
  0xc4   : > { %11469 = dma.done.wait (%p13475_p8), %s314_s1, 98432  }
  0xc5   : > { %11471 = vsyncadd (%p13475_p8), %s314_s1, 4294868864  ;;  %s9212_s17 = sshll.u32 %s315_s16, 3  ;;  %s10504_s15 = smul.u32 3072, %s315_s16 }
  0xc6   : > { %s11892_s5 = scalar_lea.vmem [#allocation7], %s9212_s17  ;;  %s332_s7 = scalar_lea.sflag [#allocation9], %s313_s11 }
  0xc7   : > { %s11894_s12 = scalar_lea.vmem [#allocation8], %s10504_s15 }
  0xc8   : > { %11473 = dma.done.wait (%p13475_p8), %s332_s7, 49152  }
  0xc9   : > { %11475 = vsyncadd (%p13475_p8), %s332_s7, 4294918144  ;;  %p13476_p4 = scmp.eq.s32.totalorder %s11623_s29, 0 }
  0xcb   : > { %11477 = dma.done.wait (%p13476_p4), [#allocation9], 192   ;;  %p13477_p9 = pmov %p13476_p4 }
  0xcc   : > { %s10505_s10 = smul.u32 96, %s11874_s21  ;;  %v390_v0 = vld [vmem:[%s11886_s14] sm:$0xff]  ;;  %v391_v2 = vld [vmem:[%s11886_s14 + $0x8] sm:$0xff]  ;;  %s13478_s9 = sld [smem:[#allocation18_spill]] }
  0xcd   : > { %11479 = vsyncadd (%p13477_p9), [#allocation9], 4294967104  ;;  %v394_v1 = vld [vmem:[%s11886_s14 + $0x20] sm:$0xff]  ;;  %v395_v4 = vld [vmem:[%s11886_s14 + $0x28] sm:$0xff] }
  0xce   : > { %v9227_v3 = vcombine.high %v390_v0, %v394_v1  ;;  %v9226_v5 = vcombine.low %v390_v0, %v394_v1  ;;  %v398_v6 = vld [vmem:[%s11886_s14 + $0x40] sm:$0xff]  ;;  %v9229_v8 = vcombine.high %v391_v2, %v395_v4  ;;  %v9228_v9 = vcombine.low %v391_v2, %v395_v4  ;;  %v399_v11 = vld [vmem:[%s11886_s14 + $0x48] sm:$0xff]  ;;  %s13276_s29 = scalar_lea.vmem [#allocation11], %s10505_s10 }
  0xcf   : > { %v402_v7 = vld [vmem:[%s11886_s14 + $0x60] sm:$0xff]  ;;  %v403_v12 = vld [vmem:[%s11886_s14 + $0x68] sm:$0xff] }
  0xd0   : > { %v9235_v10 = vcombine.high %v398_v6, %v402_v7  ;;  %v406_v13 = vld [vmem:[%s11886_s14 + $0x80] sm:$0xff]  ;;  %5082 = vmatprep.subr.bf16.mxu0 %v9227_v3  ;;  %v9237_v14 = vcombine.high %v399_v11, %v403_v12  ;;  %v407_v16 = vld [vmem:[%s11886_s14 + $0x88] sm:$0xff]  ;;  %5328 = vmatprep.subr.bf16.mxu1 %v9229_v8  ;;  %v9234_v18 = vcombine.low %v398_v6, %v402_v7 }
  0xd1   : > { %v410_v15 = vld [vmem:[%s11886_s14 + $0xa0] sm:$0xff]  ;;  %v411_v17 = vld [vmem:[%s11886_s14 + $0xa8] sm:$0xff]  ;;  %5083 = vmatpush1.bf16.msra.mxu0 %v9226_v5  ;;  %5329 = vmatpush1.bf16.msra.mxu1 %v9228_v9  ;;  %v9236_v19 = vcombine.low %v399_v11, %v403_v12 }
  0xd2   : > { %5084 = vmatprep.subr.bf16.mxu0 %v9235_v10  ;;  %v9243_v20 = vcombine.high %v406_v13, %v410_v15  ;;  %5330 = vmatprep.subr.bf16.mxu1 %v9237_v14  ;;  %v9245_v21 = vcombine.high %v407_v16, %v411_v17  ;;  %v414_v22 = vld [vmem:[%s11886_s14 + $0xc0] sm:$0xff]  ;;  %v415_v24 = vld [vmem:[%s11886_s14 + $0xc8] sm:$0xff]  ;;  %v9242_v26 = vcombine.low %v406_v13, %v410_v15  ;;  %p10378_p10 = scmp.ne.s32.totalorder %s13478_s9, 0 }
  0xd3   : > { %v418_v23 = vld [vmem:[%s11886_s14 + $0xe0] sm:$0xff]  ;;  %v419_v25 = vld [vmem:[%s11886_s14 + $0xe8] sm:$0xff]  ;;  %v9244_v27 = vcombine.low %v407_v16, %v411_v17 }
  0xd4   : > { %v9251_v28 = vcombine.high %v414_v22, %v418_v23  ;;  %v9253_v29 = vcombine.high %v415_v24, %v419_v25  ;;  %v422_v30 = vld [vmem:[%s11886_s14 + $0x100] sm:$0xff]  ;;  %v423_v32 = vld [vmem:[%s11886_s14 + $0x108] sm:$0xff]  ;;  %v9250_v34 = vcombine.low %v414_v22, %v418_v23  ;;  %v9252_v35 = vcombine.low %v415_v24, %v419_v25 }
  0xd5   : > { %5085 = vmatpush1.bf16.msra.mxu0 %v9234_v18  ;;  %5331 = vmatpush1.bf16.msra.mxu1 %v9236_v19  ;;  %v426_v31 = vld [vmem:[%s11886_s14 + $0x120] sm:$0xff]  ;;  %v427_v33 = vld [vmem:[%s11886_s14 + $0x128] sm:$0xff] }
  0xd6   : > { %5086 = vmatprep.subr.bf16.mxu0 %v9243_v20  ;;  %5332 = vmatprep.subr.bf16.mxu1 %v9245_v21  ;;  %v9259_v36 = vcombine.high %v422_v30, %v426_v31  ;;  %v9261_v37 = vcombine.high %v423_v32, %v427_v33  ;;  %v430_v38 = vld [vmem:[%s11886_s14 + $0x140] sm:$0xff]  ;;  %v431_v40 = vld [vmem:[%s11886_s14 + $0x148] sm:$0xff]  ;;  %v9258_v42 = vcombine.low %v422_v30, %v426_v31 }
  0xd7   : > { %v434_v39 = vld [vmem:[%s11886_s14 + $0x160] sm:$0xff]  ;;  %v435_v41 = vld [vmem:[%s11886_s14 + $0x168] sm:$0xff]  ;;  %v9260_v43 = vcombine.low %v423_v32, %v427_v33 }
  0xd8   : > { %v9267_v44 = vcombine.high %v430_v38, %v434_v39  ;;  %v9269_v45 = vcombine.high %v431_v40, %v435_v41  ;;  %v438_v46 = vld [vmem:[%s11886_s14 + $0x180] sm:$0xff]  ;;  %v439_v48 = vld [vmem:[%s11886_s14 + $0x188] sm:$0xff]  ;;  %v9266_v50 = vcombine.low %v430_v38, %v434_v39  ;;  %v9268_v51 = vcombine.low %v431_v40, %v435_v41 }
  0xd9   : > { %5087 = vmatpush1.bf16.msra.mxu0 %v9242_v26  ;;  %5333 = vmatpush1.bf16.msra.mxu1 %v9244_v27  ;;  %v442_v47 = vld [vmem:[%s11886_s14 + $0x1a0] sm:$0xff]  ;;  %v443_v49 = vld [vmem:[%s11886_s14 + $0x1a8] sm:$0xff] }
  0xda   : > { %5088 = vmatprep.subr.bf16.mxu0 %v9251_v28  ;;  %5334 = vmatprep.subr.bf16.mxu1 %v9253_v29  ;;  %v9275_v52 = vcombine.high %v438_v46, %v442_v47  ;;  %v11934_v53 = vld [vmem:[%s11878_s8] sm:$0xff]  ;;  %v9277_v54 = vcombine.high %v439_v48, %v443_v49  ;;  %v447_v58 = vld [vmem:[%s11886_s14 + $0x1c8] sm:$0xff]  ;;  %v9274_v60 = vcombine.low %v438_v46, %v442_v47 }
  0xdb   : > { %v446_v55 = vld [vmem:[%s11886_s14 + $0x1c0] sm:$0xff]  ;;  %v11940_v57 = vcombine.high %v11934_v53, %v11934_v53  ;;  %v451_v59 = vld [vmem:[%s11886_s14 + $0x1e8] sm:$0xff]  ;;  %v9276_v61 = vcombine.low %v439_v48, %v443_v49 }
  0xdc   : > { %v450_v56 = vld [vmem:[%s11886_s14 + $0x1e0] sm:$0xff]  ;;  %v9285_v63 = vcombine.high %v447_v58, %v451_v59  ;;  %v455_v2 = vld [vmem:[%s11886_s14 + $0x208] sm:$0xff]  ;;  %v9284_v5 = vcombine.low %v447_v58, %v451_v59 }
  0xdd   : > { %5089 = vmatpush1.bf16.msra.mxu0 %v9250_v34  ;;  %5335 = vmatpush1.bf16.msra.mxu1 %v9252_v35  ;;  %v9283_v62 = vcombine.high %v446_v55, %v450_v56  ;;  %v454_v0 = vld [vmem:[%s11886_s14 + $0x200] sm:$0xff]  ;;  %v459_v3 = vld [vmem:[%s11886_s14 + $0x228] sm:$0xff]  ;;  %v9282_v4 = vcombine.low %v446_v55, %v450_v56 }
  0xde   : > { %5090 = vmatprep.subr.bf16.mxu0 %v9259_v36  ;;  %5336 = vmatprep.subr.bf16.mxu1 %v9261_v37  ;;  %v458_v1 = vld [vmem:[%s11886_s14 + $0x220] sm:$0xff]  ;;  %v9293_v7 = vcombine.high %v455_v2, %v459_v3  ;;  %v463_v10 = vld [vmem:[%s11886_s14 + $0x248] sm:$0xff]  ;;  %v9292_v13 = vcombine.low %v455_v2, %v459_v3 }
  0xdf   : > { %5114 = vmatprep.mubr.bf16.mxu0 %v11940_v57  ;;  %5360 = vmatprep.mubr.bf16.mxu1 %v11940_v57  ;;  %v9291_v6 = vcombine.high %v454_v0, %v458_v1  ;;  %v462_v8 = vld [vmem:[%s11886_s14 + $0x240] sm:$0xff]  ;;  %v467_v11 = vld [vmem:[%s11886_s14 + $0x268] sm:$0xff]  ;;  %v9290_v12 = vcombine.low %v454_v0, %v458_v1 }
  0xe0   : > { %v466_v9 = vld [vmem:[%s11886_s14 + $0x260] sm:$0xff]  ;;  %v9301_v15 = vcombine.high %v463_v10, %v467_v11  ;;  %v471_v18 = vld [vmem:[%s11886_s14 + $0x288] sm:$0xff]  ;;  %v9300_v21 = vcombine.low %v463_v10, %v467_v11 }
  0xe1   : > { %5091 = vmatpush1.bf16.msra.mxu0 %v9258_v42  ;;  %5337 = vmatpush1.bf16.msra.mxu1 %v9260_v43  ;;  %v9299_v14 = vcombine.high %v462_v8, %v466_v9  ;;  %v470_v16 = vld [vmem:[%s11886_s14 + $0x280] sm:$0xff]  ;;  %v475_v19 = vld [vmem:[%s11886_s14 + $0x2a8] sm:$0xff]  ;;  %v9298_v20 = vcombine.low %v462_v8, %v466_v9 }
  0xe2   : > { %5092 = vmatprep.subr.bf16.mxu0 %v9267_v44  ;;  %5338 = vmatprep.subr.bf16.mxu1 %v9269_v45  ;;  %v474_v17 = vld [vmem:[%s11886_s14 + $0x2a0] sm:$0xff]  ;;  %v9309_v23 = vcombine.high %v471_v18, %v475_v19  ;;  %v479_v26 = vld [vmem:[%s11886_s14 + $0x2c8] sm:$0xff]  ;;  %v9308_v29 = vcombine.low %v471_v18, %v475_v19 }
  0xe3   : > { %v9307_v22 = vcombine.high %v470_v16, %v474_v17  ;;  %v478_v24 = vld [vmem:[%s11886_s14 + $0x2c0] sm:$0xff]  ;;  %v483_v27 = vld [vmem:[%s11886_s14 + $0x2e8] sm:$0xff]  ;;  %v9306_v28 = vcombine.low %v470_v16, %v474_v17 }
  0xe4   : > { %v482_v25 = vld [vmem:[%s11886_s14 + $0x2e0] sm:$0xff]  ;;  %v9317_v31 = vcombine.high %v479_v26, %v483_v27  ;;  %v487_v34 = vld [vmem:[%s11886_s14 + $0x308] sm:$0xff]  ;;  %v9316_v37 = vcombine.low %v479_v26, %v483_v27 }
  0xe5   : > { %5093 = vmatpush1.bf16.msra.mxu0 %v9266_v50  ;;  %5339 = vmatpush1.bf16.msra.mxu1 %v9268_v51  ;;  %v9315_v30 = vcombine.high %v478_v24, %v482_v25  ;;  %v486_v32 = vld [vmem:[%s11886_s14 + $0x300] sm:$0xff]  ;;  %v491_v35 = vld [vmem:[%s11886_s14 + $0x328] sm:$0xff]  ;;  %v9314_v36 = vcombine.low %v478_v24, %v482_v25 }
  0xe6   : > { %5094 = vmatprep.subr.bf16.mxu0 %v9275_v52  ;;  %5340 = vmatprep.subr.bf16.mxu1 %v9277_v54  ;;  %v490_v33 = vld [vmem:[%s11886_s14 + $0x320] sm:$0xff]  ;;  %v9325_v39 = vcombine.high %v487_v34, %v491_v35  ;;  %v495_v42 = vld [vmem:[%s11886_s14 + $0x348] sm:$0xff]  ;;  %v9324_v45 = vcombine.low %v487_v34, %v491_v35 }
  0xe7   : > { %v9323_v38 = vcombine.high %v486_v32, %v490_v33  ;;  %v494_v40 = vld [vmem:[%s11886_s14 + $0x340] sm:$0xff]  ;;  %v499_v43 = vld [vmem:[%s11886_s14 + $0x368] sm:$0xff]  ;;  %v9322_v44 = vcombine.low %v486_v32, %v490_v33 }
  0xe8   : > { %v498_v41 = vld [vmem:[%s11886_s14 + $0x360] sm:$0xff]  ;;  %v9333_v47 = vcombine.high %v495_v42, %v499_v43  ;;  %v503_v50 = vld [vmem:[%s11886_s14 + $0x388] sm:$0xff]  ;;  %v9332_v54 = vcombine.low %v495_v42, %v499_v43 }
  0xe9   : > { %5095 = vmatpush1.bf16.msra.mxu0 %v9274_v60  ;;  %5341 = vmatpush1.bf16.msra.mxu1 %v9276_v61  ;;  %v9331_v46 = vcombine.high %v494_v40, %v498_v41  ;;  %v502_v48 = vld [vmem:[%s11886_s14 + $0x380] sm:$0xff]  ;;  %v507_v51 = vld [vmem:[%s11886_s14 + $0x3a8] sm:$0xff]  ;;  %v9330_v52 = vcombine.low %v494_v40, %v498_v41 }
  0xea   : > { %5096 = vmatprep.subr.bf16.mxu0 %v9283_v62  ;;  %5342 = vmatprep.subr.bf16.mxu1 %v9285_v63  ;;  %v506_v49 = vld [vmem:[%s11886_s14 + $0x3a0] sm:$0xff]  ;;  %v9341_v56 = vcombine.high %v503_v50, %v507_v51  ;;  %v511_v60 = vld [vmem:[%s11886_s14 + $0x3c8] sm:$0xff]  ;;  %v9340_v63 = vcombine.low %v503_v50, %v507_v51 }
  0xeb   : > { %v9339_v55 = vcombine.high %v502_v48, %v506_v49  ;;  %v510_v58 = vld [vmem:[%s11886_s14 + $0x3c0] sm:$0xff]  ;;  %v515_v61 = vld [vmem:[%s11886_s14 + $0x3e8] sm:$0xff]  ;;  %v9338_v62 = vcombine.low %v502_v48, %v506_v49 }
  0xec   : > { %v514_v59 = vld [vmem:[%s11886_s14 + $0x3e0] sm:$0xff]  ;;  %v9349_v1 = vcombine.high %v511_v60, %v515_v61 }
  0xed   : > { %5097 = vmatpush1.bf16.msra.mxu0 %v9282_v4  ;;  %5343 = vmatpush1.bf16.msra.mxu1 %v9284_v5  ;;  %v9347_v0 = vcombine.high %v510_v58, %v514_v59  ;;  %v518_v2 = vld [vmem:[%s11886_s14 + $0x400] sm:$0xff]  ;;  %v519_v4 = vld [vmem:[%s11886_s14 + $0x408] sm:$0xff] }
  0xee   : > { %5098 = vmatprep.subr.bf16.mxu0 %v9291_v6  ;;  %5344 = vmatprep.subr.bf16.mxu1 %v9293_v7  ;;  %v522_v3 = vld [vmem:[%s11886_s14 + $0x420] sm:$0xff]  ;;  %v523_v5 = vld [vmem:[%s11886_s14 + $0x428] sm:$0xff]  ;;  %v9346_v6 = vcombine.low %v510_v58, %v514_v59  ;;  %v9348_v7 = vcombine.low %v511_v60, %v515_v61 }
  0xef   : > { %v9355_v8 = vcombine.high %v518_v2, %v522_v3  ;;  %v9357_v9 = vcombine.high %v519_v4, %v523_v5  ;;  %v526_v10 = vld [vmem:[%s11886_s14 + $0x440] sm:$0xff]  ;;  %v9354_v16 = vcombine.low %v518_v2, %v522_v3  ;;  %v9356_v17 = vcombine.low %v519_v4, %v523_v5 }
  0xf0   : > { %v530_v11 = vld [vmem:[%s11886_s14 + $0x460] sm:$0xff] }
  0xf1   : > { %5099 = vmatpush1.bf16.msra.mxu0 %v9290_v12  ;;  %5345 = vmatpush1.bf16.msra.mxu1 %v9292_v13  ;;  %v11986_v12 = vcombine.low %v11934_v53, %v11934_v53  ;;  %v527_v13 = vld [vmem:[%s11886_s14 + $0x448] sm:$0xff]  ;;  %v9363_v18 = vcombine.high %v526_v10, %v530_v11  ;;  %v534_v19 = vld [vmem:[%s11886_s14 + $0x480] sm:$0xff]  ;;  %v9362_v24 = vcombine.low %v526_v10, %v530_v11 }
  0xf2   : > { %5100 = vmatprep.subr.bf16.mxu0 %v9299_v14  ;;  %5346 = vmatprep.subr.bf16.mxu1 %v9301_v15  ;;  %v531_v14 = vld [vmem:[%s11886_s14 + $0x468] sm:$0xff]  ;;  %v542_v27 = vld [vmem:[%s11886_s14 + $0x4c0] sm:$0xff] }
  0xf3   : > { %v11991_v15 = vld [vmem:[%s11878_s8 + $0x8] sm:$0xff]  ;;  %v9364_v25 = vcombine.low %v527_v13, %v531_v14  ;;  %v550_v35 = vld [vmem:[%s11886_s14 + $0x500] sm:$0xff] }
  0xf4   : > { %v539_v53 = vld [vmem:[%s11886_s14 + $0x4a8] sm:$0xff]  ;;  %v558_v43 = vld [vmem:[%s11886_s14 + $0x540] sm:$0xff] }
  0xf5   : > { %5101 = vmatpush1.bf16.msra.mxu0 %v9298_v20  ;;  %5347 = vmatpush1.bf16.msra.mxu1 %v9300_v21  ;;  %v538_v20 = vld [vmem:[%s11886_s14 + $0x4a0] sm:$0xff]  ;;  %v9365_v21 = vcombine.high %v527_v13, %v531_v14 }
  0xf6   : > { %5102 = vmatprep.subr.bf16.mxu0 %v9307_v22  ;;  %5348 = vmatprep.subr.bf16.mxu1 %v9309_v23  ;;  %v535_v22 = vld [vmem:[%s11886_s14 + $0x488] sm:$0xff]  ;;  %v11999_v23 = vcombine.high %v11991_v15, %v11991_v15  ;;  %v9371_v26 = vcombine.high %v534_v19, %v538_v20  ;;  %v9370_v32 = vcombine.low %v534_v19, %v538_v20  ;;  %v566_v51 = vld [vmem:[%s11886_s14 + $0x580] sm:$0xff] }
  0xf7   : > { %v9372_v33 = vcombine.low %v535_v22, %v539_v53  ;;  %v574_v61 = vld [vmem:[%s11886_s14 + $0x5c0] sm:$0xff]  ;;  %v595_v19 = vld [vmem:[%s11886_s14 + $0x668] sm:$0xff] }
  0xf8   : > { %v582_v5 = vld [vmem:[%s11886_s14 + $0x600] sm:$0xff] }
  0xf9   : > { %5103 = vmatpush1.bf16.msra.mxu0 %v9306_v28  ;;  %5349 = vmatpush1.bf16.msra.mxu1 %v9308_v29  ;;  %v546_v28 = vld [vmem:[%s11886_s14 + $0x4e0] sm:$0xff]  ;;  %v543_v29 = vld [vmem:[%s11886_s14 + $0x4c8] sm:$0xff] }
  0xfa   : > { %5104 = vmatprep.subr.bf16.mxu0 %v9315_v30  ;;  %5350 = vmatprep.subr.bf16.mxu1 %v9317_v31  ;;  %v9373_v30 = vcombine.high %v535_v22, %v539_v53  ;;  %v547_v31 = vld [vmem:[%s11886_s14 + $0x4e8] sm:$0xff]  ;;  %v9379_v34 = vcombine.high %v542_v27, %v546_v28  ;;  %v9378_v40 = vcombine.low %v542_v27, %v546_v28  ;;  %v590_v14 = vld [vmem:[%s11886_s14 + $0x640] sm:$0xff] }
  0xfb   : > { %v9380_v41 = vcombine.low %v543_v29, %v547_v31  ;;  %v598_v53 = vld [vmem:[%s11886_s14 + $0x680] sm:$0xff]  ;;  %v603_v27 = vld [vmem:[%s11886_s14 + $0x6a8] sm:$0xff] }
  0xfd   : > { %5105 = vmatpush1.bf16.msra.mxu0 %v9314_v36  ;;  %5351 = vmatpush1.bf16.msra.mxu1 %v9316_v37  ;;  %v554_v36 = vld [vmem:[%s11886_s14 + $0x520] sm:$0xff]  ;;  %v551_v37 = vld [vmem:[%s11886_s14 + $0x508] sm:$0xff] }
  0xfe   : > { %5106 = vmatprep.subr.bf16.mxu0 %v9323_v38  ;;  %5352 = vmatprep.subr.bf16.mxu1 %v9325_v39  ;;  %v9381_v38 = vcombine.high %v543_v29, %v547_v31  ;;  %v555_v39 = vld [vmem:[%s11886_s14 + $0x528] sm:$0xff]  ;;  %v9387_v42 = vcombine.high %v550_v35, %v554_v36  ;;  %v9386_v48 = vcombine.low %v550_v35, %v554_v36  ;;  %v606_v31 = vld [vmem:[%s11886_s14 + $0x6c0] sm:$0xff] }
  0xff   : > { %v9388_v49 = vcombine.low %v551_v37, %v555_v39  ;;  %v611_v35 = vld [vmem:[%s11886_s14 + $0x6e8] sm:$0xff] }
 0x101   : > { %5107 = vmatpush1.bf16.msra.mxu0 %v9322_v44  ;;  %5353 = vmatpush1.bf16.msra.mxu1 %v9324_v45  ;;  %v562_v44 = vld [vmem:[%s11886_s14 + $0x560] sm:$0xff]  ;;  %v559_v45 = vld [vmem:[%s11886_s14 + $0x548] sm:$0xff] }
 0x102   : > { %5108 = vmatprep.subr.bf16.mxu0 %v9331_v46  ;;  %5354 = vmatprep.subr.bf16.mxu1 %v9333_v47  ;;  %v9389_v46 = vcombine.high %v551_v37, %v555_v39  ;;  %v563_v47 = vld [vmem:[%s11886_s14 + $0x568] sm:$0xff]  ;;  %v9395_v50 = vcombine.high %v558_v43, %v562_v44  ;;  %v9394_v58 = vcombine.low %v558_v43, %v562_v44  ;;  %v614_v39 = vld [vmem:[%s11886_s14 + $0x700] sm:$0xff] }
 0x103   : > { %v9396_v59 = vcombine.low %v559_v45, %v563_v47  ;;  %v619_v43 = vld [vmem:[%s11886_s14 + $0x728] sm:$0xff] }
 0x105   : > { %5109 = vmatpush1.bf16.msra.mxu0 %v9330_v52  ;;  %5355 = vmatpush1.bf16.msra.mxu1 %v9332_v54  ;;  %v570_v52 = vld [vmem:[%s11886_s14 + $0x5a0] sm:$0xff]  ;;  %v567_v54 = vld [vmem:[%s11886_s14 + $0x588] sm:$0xff] }
 0x106   : > { %5110 = vmatprep.subr.bf16.mxu0 %v9339_v55  ;;  %5356 = vmatprep.subr.bf16.mxu1 %v9341_v56  ;;  %v9397_v55 = vcombine.high %v559_v45, %v563_v47  ;;  %v571_v56 = vld [vmem:[%s11886_s14 + $0x5a8] sm:$0xff]  ;;  %v9403_v60 = vcombine.high %v566_v51, %v570_v52  ;;  %v9402_v2 = vcombine.low %v566_v51, %v570_v52  ;;  %v622_v47 = vld [vmem:[%s11886_s14 + $0x740] sm:$0xff] }
 0x107   : > { %v9404_v3 = vcombine.low %v567_v54, %v571_v56  ;;  %v627_v51 = vld [vmem:[%s11886_s14 + $0x768] sm:$0xff] }
 0x109   : > { %5111 = vmatpush1.bf16.msra.mxu0 %v9338_v62  ;;  %5357 = vmatpush1.bf16.msra.mxu1 %v9340_v63  ;;  %v578_v62 = vld [vmem:[%s11886_s14 + $0x5e0] sm:$0xff]  ;;  %v575_v63 = vld [vmem:[%s11886_s14 + $0x5c8] sm:$0xff] }
 0x10a   : > { %5112 = vmatprep.subr.bf16.mxu0 %v9347_v0  ;;  %5358 = vmatprep.subr.bf16.mxu1 %v9349_v1  ;;  %v9405_v0 = vcombine.high %v567_v54, %v571_v56  ;;  %v579_v1 = vld [vmem:[%s11886_s14 + $0x5e8] sm:$0xff]  ;;  %v9411_v4 = vcombine.high %v574_v61, %v578_v62  ;;  %v9410_v10 = vcombine.low %v574_v61, %v578_v62  ;;  %v630_v56 = vld [vmem:[%s11886_s14 + $0x780] sm:$0xff] }
 0x10b   : > { %v9412_v11 = vcombine.low %v575_v63, %v579_v1  ;;  %v635_v61 = vld [vmem:[%s11886_s14 + $0x7a8] sm:$0xff] }
 0x10d   : > { %5113 = vmatpush1.bf16.msra.mxu0 %v9346_v6  ;;  %5359 = vmatpush1.bf16.msra.mxu1 %v9348_v7  ;;  %v586_v6 = vld [vmem:[%s11886_s14 + $0x620] sm:$0xff]  ;;  %v583_v7 = vld [vmem:[%s11886_s14 + $0x608] sm:$0xff] }
 0x10e   : > { %5123 = vmatprep.subr.bf16.mxu0 %v9355_v8  ;;  %5369 = vmatprep.subr.bf16.mxu1 %v9357_v9  ;;  %v9413_v8 = vcombine.high %v575_v63, %v579_v1  ;;  %v587_v9 = vld [vmem:[%s11886_s14 + $0x628] sm:$0xff]  ;;  %v9419_v13 = vcombine.high %v582_v5, %v586_v6  ;;  %v9418_v20 = vcombine.low %v582_v5, %v586_v6  ;;  %v638_v1 = vld [vmem:[%s11886_s14 + $0x7c0] sm:$0xff] }
 0x10f   : > { %v643_v5 = vld [vmem:[%s11886_s14 + $0x7e8] sm:$0xff] }
 0x110   : > { %5115 = vmatmul.mubr.bf16.vlgmr.msra.gmra.mrb[0].mxu0 %v11986_v12  ;;  %5361 = vmatmul.mubr.bf16.vlgmr.msra.gmra.mrb[0].mxu1 %v11986_v12 }
 0x111   : > { %5124 = vmatpush1.bf16.msra.mxu0 %v9354_v16  ;;  %5370 = vmatpush1.bf16.msra.mxu1 %v9356_v17  ;;  %v594_v16 = vld [vmem:[%s11886_s14 + $0x660] sm:$0xff]  ;;  %v591_v17 = vld [vmem:[%s11886_s14 + $0x648] sm:$0xff] }
 0x112   : > { %5125 = vmatprep.subr.bf16.mxu0 %v9363_v18  ;;  %5371 = vmatprep.subr.bf16.mxu1 %v9365_v21  ;;  %v9421_v18 = vcombine.high %v583_v7, %v587_v9  ;;  %v9420_v21 = vcombine.low %v583_v7, %v587_v9  ;;  %v9427_v22 = vcombine.high %v590_v14, %v594_v16  ;;  %v646_v9 = vld [vmem:[%s11886_s14 + $0x800] sm:$0xff] }
 0x113   : > { %5155 = vmatprep.mubr.bf16.mxu0 %v11999_v23  ;;  %5401 = vmatprep.mubr.bf16.mxu1 %v11999_v23  ;;  %v9426_v28 = vcombine.low %v590_v14, %v594_v16  ;;  %v9428_v29 = vcombine.low %v591_v17, %v595_v19  ;;  %v651_v14 = vld [vmem:[%s11886_s14 + $0x828] sm:$0xff] }
 0x115   : > { %5126 = vmatpush1.bf16.msra.mxu0 %v9362_v24  ;;  %5372 = vmatpush1.bf16.msra.mxu1 %v9364_v25  ;;  %v602_v24 = vld [vmem:[%s11886_s14 + $0x6a0] sm:$0xff]  ;;  %v599_v25 = vld [vmem:[%s11886_s14 + $0x688] sm:$0xff] }
 0x116   : > { %5127 = vmatprep.subr.bf16.mxu0 %v9371_v26  ;;  %5373 = vmatprep.subr.bf16.mxu1 %v9373_v30  ;;  %v9429_v26 = vcombine.high %v591_v17, %v595_v19  ;;  %v9435_v30 = vcombine.high %v598_v53, %v602_v24  ;;  %v9434_v36 = vcombine.low %v598_v53, %v602_v24  ;;  %v654_v17 = vld [vmem:[%s11886_s14 + $0x840] sm:$0xff] }
 0x117   : > { %v9436_v37 = vcombine.low %v599_v25, %v603_v27  ;;  %v12066_v24 = vld [vmem:[%s11878_s8 + $0x10] sm:$0xff] }
 0x119   : > { %5128 = vmatpush1.bf16.msra.mxu0 %v9370_v32  ;;  %5374 = vmatpush1.bf16.msra.mxu1 %v9372_v33  ;;  %v610_v32 = vld [vmem:[%s11886_s14 + $0x6e0] sm:$0xff]  ;;  %v607_v33 = vld [vmem:[%s11886_s14 + $0x6c8] sm:$0xff] }
 0x11a   : > { %5129 = vmatprep.subr.bf16.mxu0 %v9379_v34  ;;  %5375 = vmatprep.subr.bf16.mxu1 %v9381_v38  ;;  %v9437_v34 = vcombine.high %v599_v25, %v603_v27  ;;  %v9443_v38 = vcombine.high %v606_v31, %v610_v32  ;;  %v9442_v44 = vcombine.low %v606_v31, %v610_v32  ;;  %v663_v32 = vld [vmem:[%s11886_s14 + $0x888] sm:$0xff] }
 0x11b   : > { %v9444_v45 = vcombine.low %v607_v33, %v611_v35  ;;  %v12070_v25 = vcombine.low %v11991_v15, %v11991_v15  ;;  %v12078_v15 = vcombine.high %v12066_v24, %v12066_v24 }
 0x11d   : > { %5130 = vmatpush1.bf16.msra.mxu0 %v9378_v40  ;;  %5376 = vmatpush1.bf16.msra.mxu1 %v9380_v41  ;;  %v618_v40 = vld [vmem:[%s11886_s14 + $0x720] sm:$0xff]  ;;  %v615_v41 = vld [vmem:[%s11886_s14 + $0x708] sm:$0xff] }
 0x11e   : > { %5131 = vmatprep.subr.bf16.mxu0 %v9387_v42  ;;  %5377 = vmatprep.subr.bf16.mxu1 %v9389_v46  ;;  %v9445_v42 = vcombine.high %v607_v33, %v611_v35  ;;  %v9451_v46 = vcombine.high %v614_v39, %v618_v40  ;;  %v9450_v52 = vcombine.low %v614_v39, %v618_v40  ;;  %v667_v33 = vld [vmem:[%s11886_s14 + $0x8a8] sm:$0xff] }
 0x11f   : > { %v9452_v54 = vcombine.low %v615_v41, %v619_v43  ;;  %v671_v39 = vld [vmem:[%s11886_s14 + $0x8c8] sm:$0xff]  ;;  %v9501_v40 = vcombine.high %v663_v32, %v667_v33 }
 0x121   : > { %5132 = vmatpush1.bf16.msra.mxu0 %v9386_v48  ;;  %5378 = vmatpush1.bf16.msra.mxu1 %v9388_v49  ;;  %v626_v48 = vld [vmem:[%s11886_s14 + $0x760] sm:$0xff]  ;;  %v623_v49 = vld [vmem:[%s11886_s14 + $0x748] sm:$0xff] }
 0x122   : > { %5133 = vmatprep.subr.bf16.mxu0 %v9395_v50  ;;  %5379 = vmatprep.subr.bf16.mxu1 %v9397_v55  ;;  %v9453_v50 = vcombine.high %v615_v41, %v619_v43  ;;  %v9459_v55 = vcombine.high %v622_v47, %v626_v48  ;;  %v9458_v62 = vcombine.low %v622_v47, %v626_v48  ;;  %v675_v41 = vld [vmem:[%s11886_s14 + $0x8e8] sm:$0xff] }
 0x123   : > { %v9460_v63 = vcombine.low %v623_v49, %v627_v51  ;;  %v9500_v43 = vcombine.low %v663_v32, %v667_v33  ;;  %v679_v47 = vld [vmem:[%s11886_s14 + $0x908] sm:$0xff]  ;;  %v9509_v48 = vcombine.high %v671_v39, %v675_v41 }
 0x125   : > { %5134 = vmatpush1.bf16.msra.mxu0 %v9394_v58  ;;  %5380 = vmatpush1.bf16.msra.mxu1 %v9396_v59  ;;  %v634_v58 = vld [vmem:[%s11886_s14 + $0x7a0] sm:$0xff]  ;;  %v631_v59 = vld [vmem:[%s11886_s14 + $0x788] sm:$0xff] }
 0x126   : > { %5135 = vmatprep.subr.bf16.mxu0 %v9403_v60  ;;  %5381 = vmatprep.subr.bf16.mxu1 %v9405_v0  ;;  %v9461_v60 = vcombine.high %v623_v49, %v627_v51  ;;  %v9467_v0 = vcombine.high %v630_v56, %v634_v58  ;;  %v9466_v6 = vcombine.low %v630_v56, %v634_v58  ;;  %v683_v49 = vld [vmem:[%s11886_s14 + $0x928] sm:$0xff] }
 0x127   : > { %v9468_v7 = vcombine.low %v631_v59, %v635_v61  ;;  %v9508_v51 = vcombine.low %v671_v39, %v675_v41  ;;  %v687_v56 = vld [vmem:[%s11886_s14 + $0x948] sm:$0xff]  ;;  %v9517_v58 = vcombine.high %v679_v47, %v683_v49 }
 0x128   : > { %v731_v39 = vld [vmem:[%s11886_s14 + $0xaa8] sm:$0xff] }
 0x129   : > { %5136 = vmatpush1.bf16.msra.mxu0 %v9402_v2  ;;  %5382 = vmatpush1.bf16.msra.mxu1 %v9404_v3  ;;  %v642_v2 = vld [vmem:[%s11886_s14 + $0x7e0] sm:$0xff]  ;;  %v639_v3 = vld [vmem:[%s11886_s14 + $0x7c8] sm:$0xff] }
 0x12a   : > { %5137 = vmatprep.subr.bf16.mxu0 %v9411_v4  ;;  %5383 = vmatprep.subr.bf16.mxu1 %v9413_v8  ;;  %v9469_v4 = vcombine.high %v631_v59, %v635_v61  ;;  %v9475_v8 = vcombine.high %v638_v1, %v642_v2  ;;  %v9474_v16 = vcombine.low %v638_v1, %v642_v2  ;;  %v691_v59 = vld [vmem:[%s11886_s14 + $0x968] sm:$0xff] }
 0x12b   : > { %v9516_v61 = vcombine.low %v679_v47, %v683_v49  ;;  %v695_v1 = vld [vmem:[%s11886_s14 + $0x988] sm:$0xff]  ;;  %v9525_v2 = vcombine.high %v687_v56, %v691_v59 }
 0x12c   : > { %v739_v47 = vld [vmem:[%s11886_s14 + $0xae8] sm:$0xff] }
 0x12d   : > { %5138 = vmatpush1.bf16.msra.mxu0 %v9410_v10  ;;  %5384 = vmatpush1.bf16.msra.mxu1 %v9412_v11  ;;  %v650_v10 = vld [vmem:[%s11886_s14 + $0x820] sm:$0xff]  ;;  %v647_v11 = vld [vmem:[%s11886_s14 + $0x808] sm:$0xff] }
 0x12e   : > { %5139 = vmatprep.subr.bf16.mxu0 %v9419_v13  ;;  %5385 = vmatprep.subr.bf16.mxu1 %v9421_v18  ;;  %v9477_v13 = vcombine.high %v639_v3, %v643_v5  ;;  %v9476_v18 = vcombine.low %v639_v3, %v643_v5  ;;  %v9483_v19 = vcombine.high %v646_v9, %v650_v10  ;;  %v699_v3 = vld [vmem:[%s11886_s14 + $0x9a8] sm:$0xff] }
 0x12f   : > { %v9485_v53 = vcombine.high %v647_v11, %v651_v14  ;;  %v9484_v27 = vcombine.low %v647_v11, %v651_v14  ;;  %v9524_v5 = vcombine.low %v687_v56, %v691_v59  ;;  %v707_v11 = vld [vmem:[%s11886_s14 + $0x9e8] sm:$0xff]  ;;  %v9532_v14 = vcombine.low %v695_v1, %v699_v3 }
 0x130   : > { %v747_v56 = vld [vmem:[%s11886_s14 + $0xb28] sm:$0xff] }
 0x131   : > { %5140 = vmatpush1.bf16.msra.mxu0 %v9418_v20  ;;  %5386 = vmatpush1.bf16.msra.mxu1 %v9420_v21  ;;  %v658_v20 = vld [vmem:[%s11886_s14 + $0x860] sm:$0xff]  ;;  %v655_v21 = vld [vmem:[%s11886_s14 + $0x848] sm:$0xff] }
 0x132   : > { %5141 = vmatprep.subr.bf16.mxu0 %v9427_v22  ;;  %5387 = vmatprep.subr.bf16.mxu1 %v9429_v26  ;;  %v659_v22 = vld [vmem:[%s11886_s14 + $0x868] sm:$0xff]  ;;  %v9482_v26 = vcombine.low %v646_v9, %v650_v10  ;;  %v9533_v10 = vcombine.high %v695_v1, %v699_v3 }
 0x133   : > { %v9493_v31 = vcombine.high %v655_v21, %v659_v22  ;;  %v9492_v35 = vcombine.low %v655_v21, %v659_v22  ;;  %v703_v9 = vld [vmem:[%s11886_s14 + $0x9c8] sm:$0xff] }
 0x134   : > { %v715_v21 = vld [vmem:[%s11886_s14 + $0xa28] sm:$0xff] }
 0x135   : > { %5142 = vmatpush1.bf16.msra.mxu0 %v9426_v28  ;;  %5388 = vmatpush1.bf16.msra.mxu1 %v9428_v29  ;;  %v9491_v28 = vcombine.high %v654_v17, %v658_v20  ;;  %v662_v29 = vld [vmem:[%s11886_s14 + $0x880] sm:$0xff]  ;;  %v755_v1 = vld [vmem:[%s11886_s14 + $0xb68] sm:$0xff] }
 0x136   : > { %5143 = vmatprep.subr.bf16.mxu0 %v9435_v30  ;;  %5389 = vmatprep.subr.bf16.mxu1 %v9437_v34  ;;  %v666_v30 = vld [vmem:[%s11886_s14 + $0x8a0] sm:$0xff]  ;;  %v9490_v34 = vcombine.low %v654_v17, %v658_v20  ;;  %v9541_v20 = vcombine.high %v703_v9, %v707_v11 }
 0x137   : > { %v710_v17 = vld [vmem:[%s11886_s14 + $0xa00] sm:$0xff] }
 0x139   : > { %5144 = vmatpush1.bf16.msra.mxu0 %v9434_v36  ;;  %5390 = vmatpush1.bf16.msra.mxu1 %v9436_v37  ;;  %v9499_v36 = vcombine.high %v662_v29, %v666_v30  ;;  %v670_v37 = vld [vmem:[%s11886_s14 + $0x8c0] sm:$0xff] }
 0x13a   : > { %5145 = vmatprep.subr.bf16.mxu0 %v9443_v38  ;;  %5391 = vmatprep.subr.bf16.mxu1 %v9445_v42  ;;  %v674_v38 = vld [vmem:[%s11886_s14 + $0x8e0] sm:$0xff]  ;;  %v9498_v42 = vcombine.low %v662_v29, %v666_v30  ;;  %v719_v29 = vld [vmem:[%s11886_s14 + $0xa48] sm:$0xff] }
 0x13d   : > { %5146 = vmatpush1.bf16.msra.mxu0 %v9442_v44  ;;  %5392 = vmatpush1.bf16.msra.mxu1 %v9444_v45  ;;  %v9507_v44 = vcombine.high %v670_v37, %v674_v38  ;;  %v678_v45 = vld [vmem:[%s11886_s14 + $0x900] sm:$0xff] }
 0x13e   : > { %5147 = vmatprep.subr.bf16.mxu0 %v9451_v46  ;;  %5393 = vmatprep.subr.bf16.mxu1 %v9453_v50  ;;  %v682_v46 = vld [vmem:[%s11886_s14 + $0x920] sm:$0xff]  ;;  %v9506_v50 = vcombine.low %v670_v37, %v674_v38  ;;  %v727_v37 = vld [vmem:[%s11886_s14 + $0xa88] sm:$0xff] }
 0x13f   : > { %v9564_v49 = vcombine.low %v727_v37, %v731_v39 }
 0x141   : > { %5148 = vmatpush1.bf16.msra.mxu0 %v9450_v52  ;;  %5394 = vmatpush1.bf16.msra.mxu1 %v9452_v54  ;;  %v9515_v52 = vcombine.high %v678_v45, %v682_v46  ;;  %v686_v54 = vld [vmem:[%s11886_s14 + $0x940] sm:$0xff] }
 0x142   : > { %5149 = vmatprep.subr.bf16.mxu0 %v9459_v55  ;;  %5395 = vmatprep.subr.bf16.mxu1 %v9461_v60  ;;  %v690_v55 = vld [vmem:[%s11886_s14 + $0x960] sm:$0xff]  ;;  %v9514_v60 = vcombine.low %v678_v45, %v682_v46  ;;  %v735_v45 = vld [vmem:[%s11886_s14 + $0xac8] sm:$0xff]  ;;  %v9565_v46 = vcombine.high %v727_v37, %v731_v39  ;;  %v12149_v39 = vcombine.low %v12066_v24, %v12066_v24 }
 0x143   : > { %v9572_v59 = vcombine.low %v735_v45, %v739_v47 }
 0x145   : > { %5150 = vmatpush1.bf16.msra.mxu0 %v9458_v62  ;;  %5396 = vmatpush1.bf16.msra.mxu1 %v9460_v63  ;;  %v9523_v62 = vcombine.high %v686_v54, %v690_v55  ;;  %v694_v63 = vld [vmem:[%s11886_s14 + $0x980] sm:$0xff] }
 0x146   : > { %5151 = vmatprep.subr.bf16.mxu0 %v9467_v0  ;;  %5397 = vmatprep.subr.bf16.mxu1 %v9469_v4  ;;  %v698_v0 = vld [vmem:[%s11886_s14 + $0x9a0] sm:$0xff]  ;;  %v9522_v4 = vcombine.low %v686_v54, %v690_v55  ;;  %v743_v54 = vld [vmem:[%s11886_s14 + $0xb08] sm:$0xff]  ;;  %v9573_v55 = vcombine.high %v735_v45, %v739_v47 }
 0x147   : > { %v9580_v3 = vcombine.low %v743_v54, %v747_v56  ;;  %v795_v47 = vld [vmem:[%s11886_s14 + $0xca8] sm:$0xff] }
 0x149   : > { %5152 = vmatpush1.bf16.msra.mxu0 %v9466_v6  ;;  %5398 = vmatpush1.bf16.msra.mxu1 %v9468_v7  ;;  %v9531_v6 = vcombine.high %v694_v63, %v698_v0  ;;  %v702_v7 = vld [vmem:[%s11886_s14 + $0x9c0] sm:$0xff] }
 0x14a   : > { %5153 = vmatprep.subr.bf16.mxu0 %v9475_v8  ;;  %5399 = vmatprep.subr.bf16.mxu1 %v9477_v13  ;;  %v706_v8 = vld [vmem:[%s11886_s14 + $0x9e0] sm:$0xff]  ;;  %v9530_v13 = vcombine.low %v694_v63, %v698_v0  ;;  %v751_v63 = vld [vmem:[%s11886_s14 + $0xb48] sm:$0xff]  ;;  %v9581_v0 = vcombine.high %v743_v54, %v747_v56 }
 0x14b   : > { %v9538_v22 = vcombine.low %v702_v7, %v706_v8  ;;  %v799_v54 = vld [vmem:[%s11886_s14 + $0xcc8] sm:$0xff] }
 0x14c   : > { %v803_v56 = vld [vmem:[%s11886_s14 + $0xce8] sm:$0xff] }
 0x14d   : > { %5154 = vmatpush1.bf16.msra.mxu0 %v9474_v16  ;;  %5400 = vmatpush1.bf16.msra.mxu1 %v9476_v18  ;;  %v9539_v16 = vcombine.high %v702_v7, %v706_v8  ;;  %v714_v18 = vld [vmem:[%s11886_s14 + $0xa20] sm:$0xff]  ;;  %v759_v7 = vld [vmem:[%s11886_s14 + $0xb88] sm:$0xff]  ;;  %v9589_v8 = vcombine.high %v751_v63, %v755_v1 }
 0x14e   : > { %5164 = vmatprep.subr.bf16.mxu0 %v9483_v19  ;;  %5410 = vmatprep.subr.bf16.mxu1 %v9485_v53  ;;  %v711_v19 = vld [vmem:[%s11886_s14 + $0xa08] sm:$0xff]  ;;  %v9540_v53 = vcombine.low %v703_v9, %v707_v11  ;;  %v9546_v32 = vcombine.low %v710_v17, %v714_v18  ;;  %v9588_v11 = vcombine.low %v751_v63, %v755_v1 }
 0x14f   : > { %v9549_v30 = vcombine.high %v711_v19, %v715_v21  ;;  %v9548_v33 = vcombine.low %v711_v19, %v715_v21  ;;  %v763_v9 = vld [vmem:[%s11886_s14 + $0xba8] sm:$0xff] }
 0x150   : > { %5156 = vmatmul.mubr.bf16.vlgmr.msra.gmra.mrb[0].mxu0 %v12070_v25  ;;  %5402 = vmatmul.mubr.bf16.vlgmr.msra.gmra.mrb[0].mxu1 %v12070_v25  ;;  %v771_v19 = vld [vmem:[%s11886_s14 + $0xbe8] sm:$0xff]  ;;  %v9596_v21 = vcombine.low %v759_v7, %v763_v9 }
 0x151   : > { %5165 = vmatpush1.bf16.msra.mxu0 %v9482_v26  ;;  %5411 = vmatpush1.bf16.msra.mxu1 %v9484_v27  ;;  %v9547_v26 = vcombine.high %v710_v17, %v714_v18  ;;  %v718_v27 = vld [vmem:[%s11886_s14 + $0xa40] sm:$0xff]  ;;  %v767_v17 = vld [vmem:[%s11886_s14 + $0xbc8] sm:$0xff]  ;;  %v9597_v18 = vcombine.high %v759_v7, %v763_v9 }
 0x152   : > { %5166 = vmatprep.subr.bf16.mxu0 %v9491_v28  ;;  %5412 = vmatprep.subr.bf16.mxu1 %v9493_v31  ;;  %v722_v28 = vld [vmem:[%s11886_s14 + $0xa60] sm:$0xff]  ;;  %v723_v31 = vld [vmem:[%s11886_s14 + $0xa68] sm:$0xff] }
 0x153   : > { %5196 = vmatprep.mubr.bf16.mxu0 %v12078_v15  ;;  %5442 = vmatprep.mubr.bf16.mxu1 %v12078_v15  ;;  %v9557_v38 = vcombine.high %v719_v29, %v723_v31  ;;  %v9556_v41 = vcombine.low %v719_v29, %v723_v31  ;;  %v779_v29 = vld [vmem:[%s11886_s14 + $0xc28] sm:$0xff]  ;;  %v782_v31 = vld [vmem:[%s11886_s14 + $0xc40] sm:$0xff] }
 0x154   : > { %v807_v63 = vld [vmem:[%s11886_s14 + $0xd08] sm:$0xff] }
 0x155   : > { %5167 = vmatpush1.bf16.msra.mxu0 %v9490_v34  ;;  %5413 = vmatpush1.bf16.msra.mxu1 %v9492_v35  ;;  %v9555_v34 = vcombine.high %v718_v27, %v722_v28  ;;  %v726_v35 = vld [vmem:[%s11886_s14 + $0xa80] sm:$0xff]  ;;  %v811_v1 = vld [vmem:[%s11886_s14 + $0xd28] sm:$0xff] }
 0x156   : > { %5168 = vmatprep.subr.bf16.mxu0 %v9499_v36  ;;  %5414 = vmatprep.subr.bf16.mxu1 %v9501_v40  ;;  %v730_v36 = vld [vmem:[%s11886_s14 + $0xaa0] sm:$0xff]  ;;  %v9554_v40 = vcombine.low %v718_v27, %v722_v28  ;;  %v775_v27 = vld [vmem:[%s11886_s14 + $0xc08] sm:$0xff]  ;;  %v9605_v28 = vcombine.high %v767_v17, %v771_v19 }
 0x157   : > { %v9613_v37 = vcombine.high %v775_v27, %v779_v29  ;;  %v815_v7 = vld [vmem:[%s11886_s14 + $0xd48] sm:$0xff] }
 0x158   : > { %v819_v9 = vld [vmem:[%s11886_s14 + $0xd68] sm:$0xff] }
 0x159   : > { %5169 = vmatpush1.bf16.msra.mxu0 %v9498_v42  ;;  %5415 = vmatpush1.bf16.msra.mxu1 %v9500_v43  ;;  %v9563_v42 = vcombine.high %v726_v35, %v730_v36  ;;  %v734_v43 = vld [vmem:[%s11886_s14 + $0xac0] sm:$0xff] }
 0x15a   : > { %5170 = vmatprep.subr.bf16.mxu0 %v9507_v44  ;;  %5416 = vmatprep.subr.bf16.mxu1 %v9509_v48  ;;  %v738_v44 = vld [vmem:[%s11886_s14 + $0xae0] sm:$0xff]  ;;  %v9562_v48 = vcombine.low %v726_v35, %v730_v36  ;;  %v783_v35 = vld [vmem:[%s11886_s14 + $0xc48] sm:$0xff] }
 0x15b   : > { %v787_v36 = vld [vmem:[%s11886_s14 + $0xc68] sm:$0xff] }
 0x15c   : > { %v9621_v45 = vcombine.high %v783_v35, %v787_v36 }
 0x15d   : > { %5171 = vmatpush1.bf16.msra.mxu0 %v9506_v50  ;;  %5417 = vmatpush1.bf16.msra.mxu1 %v9508_v51  ;;  %v9571_v50 = vcombine.high %v734_v43, %v738_v44  ;;  %v742_v51 = vld [vmem:[%s11886_s14 + $0xb00] sm:$0xff] }
 0x15e   : > { %5172 = vmatprep.subr.bf16.mxu0 %v9515_v52  ;;  %5418 = vmatprep.subr.bf16.mxu1 %v9517_v58  ;;  %v746_v52 = vld [vmem:[%s11886_s14 + $0xb20] sm:$0xff]  ;;  %v9570_v58 = vcombine.low %v734_v43, %v738_v44 }
 0x15f   : > { %v790_v43 = vld [vmem:[%s11886_s14 + $0xc80] sm:$0xff] }
 0x160   : > { %v794_v44 = vld [vmem:[%s11886_s14 + $0xca0] sm:$0xff] }
 0x161   : > { %5173 = vmatpush1.bf16.msra.mxu0 %v9514_v60  ;;  %5419 = vmatpush1.bf16.msra.mxu1 %v9516_v61  ;;  %v9579_v60 = vcombine.high %v742_v51, %v746_v52  ;;  %v750_v61 = vld [vmem:[%s11886_s14 + $0xb40] sm:$0xff] }
 0x162   : > { %5174 = vmatprep.subr.bf16.mxu0 %v9523_v62  ;;  %5420 = vmatprep.subr.bf16.mxu1 %v9525_v2  ;;  %v754_v62 = vld [vmem:[%s11886_s14 + $0xb60] sm:$0xff]  ;;  %v9578_v2 = vcombine.low %v742_v51, %v746_v52 }
 0x163   : > { %v798_v51 = vld [vmem:[%s11886_s14 + $0xcc0] sm:$0xff] }
 0x164   : > { %v802_v52 = vld [vmem:[%s11886_s14 + $0xce0] sm:$0xff] }
 0x165   : > { %5175 = vmatpush1.bf16.msra.mxu0 %v9522_v4  ;;  %5421 = vmatpush1.bf16.msra.mxu1 %v9524_v5  ;;  %v9587_v4 = vcombine.high %v750_v61, %v754_v62  ;;  %v758_v5 = vld [vmem:[%s11886_s14 + $0xb80] sm:$0xff] }
 0x166   : > { %5176 = vmatprep.subr.bf16.mxu0 %v9531_v6  ;;  %5422 = vmatprep.subr.bf16.mxu1 %v9533_v10  ;;  %v762_v6 = vld [vmem:[%s11886_s14 + $0xba0] sm:$0xff]  ;;  %v9586_v10 = vcombine.low %v750_v61, %v754_v62 }
 0x167   : > { %v806_v61 = vld [vmem:[%s11886_s14 + $0xd00] sm:$0xff] }
 0x168   : > { %v810_v62 = vld [vmem:[%s11886_s14 + $0xd20] sm:$0xff] }
 0x169   : > { %5177 = vmatpush1.bf16.msra.mxu0 %v9530_v13  ;;  %5423 = vmatpush1.bf16.msra.mxu1 %v9532_v14  ;;  %v9595_v13 = vcombine.high %v758_v5, %v762_v6  ;;  %v766_v14 = vld [vmem:[%s11886_s14 + $0xbc0] sm:$0xff] }
 0x16a   : > { %5178 = vmatprep.subr.bf16.mxu0 %v9539_v16  ;;  %5424 = vmatprep.subr.bf16.mxu1 %v9541_v20  ;;  %v770_v16 = vld [vmem:[%s11886_s14 + $0xbe0] sm:$0xff]  ;;  %v9594_v20 = vcombine.low %v758_v5, %v762_v6 }
 0x16b   : > { %v814_v5 = vld [vmem:[%s11886_s14 + $0xd40] sm:$0xff] }
 0x16c   : > { %v818_v6 = vld [vmem:[%s11886_s14 + $0xd60] sm:$0xff] }
 0x16d   : > { %5179 = vmatpush1.bf16.msra.mxu0 %v9538_v22  ;;  %5425 = vmatpush1.bf16.msra.mxu1 %v9540_v53  ;;  %v9603_v22 = vcombine.high %v766_v14, %v770_v16  ;;  %v774_v53 = vld [vmem:[%s11886_s14 + $0xc00] sm:$0xff] }
 0x16e   : > { %5180 = vmatprep.subr.bf16.mxu0 %v9547_v26  ;;  %5426 = vmatprep.subr.bf16.mxu1 %v9549_v30  ;;  %v778_v26 = vld [vmem:[%s11886_s14 + $0xc20] sm:$0xff]  ;;  %v9602_v30 = vcombine.low %v766_v14, %v770_v16 }
 0x16f   : > { %v822_v14 = vld [vmem:[%s11886_s14 + $0xd80] sm:$0xff] }
 0x170   : > { %v826_v16 = vld [vmem:[%s11886_s14 + $0xda0] sm:$0xff] }
 0x171   : > { %5181 = vmatpush1.bf16.msra.mxu0 %v9546_v32  ;;  %5427 = vmatpush1.bf16.msra.mxu1 %v9548_v33  ;;  %v9604_v32 = vcombine.low %v767_v17, %v771_v19  ;;  %v9611_v33 = vcombine.high %v774_v53, %v778_v26  ;;  %v823_v17 = vld [vmem:[%s11886_s14 + $0xd88] sm:$0xff] }
 0x172   : > { %5182 = vmatprep.subr.bf16.mxu0 %v9555_v34  ;;  %5428 = vmatprep.subr.bf16.mxu1 %v9557_v38  ;;  %v786_v34 = vld [vmem:[%s11886_s14 + $0xc60] sm:$0xff]  ;;  %v12145_v38 = vld [vmem:[%s11878_s8 + $0x18] sm:$0xff] }
 0x173   : > { %v12157_v24 = vcombine.high %v12145_v38, %v12145_v38  ;;  %v827_v19 = vld [vmem:[%s11886_s14 + $0xda8] sm:$0xff] }
 0x175   : > { %5183 = vmatpush1.bf16.msra.mxu0 %v9554_v40  ;;  %5429 = vmatpush1.bf16.msra.mxu1 %v9556_v41  ;;  %v9610_v40 = vcombine.low %v774_v53, %v778_v26  ;;  %v9612_v41 = vcombine.low %v775_v27, %v779_v29  ;;  %v830_v53 = vld [vmem:[%s11886_s14 + $0xdc0] sm:$0xff]  ;;  %v831_v27 = vld [vmem:[%s11886_s14 + $0xdc8] sm:$0xff] }
 0x176   : > { %5184 = vmatprep.subr.bf16.mxu0 %v9563_v42  ;;  %5430 = vmatprep.subr.bf16.mxu1 %v9565_v46  ;;  %v9619_v42 = vcombine.high %v782_v31, %v786_v34  ;;  %v791_v46 = vld [vmem:[%s11886_s14 + $0xc88] sm:$0xff]  ;;  %v834_v26 = vld [vmem:[%s11886_s14 + $0xde0] sm:$0xff] }
 0x177   : > { %v835_v29 = vld [vmem:[%s11886_s14 + $0xde8] sm:$0xff] }
 0x179   : > { %5185 = vmatpush1.bf16.msra.mxu0 %v9562_v48  ;;  %5431 = vmatpush1.bf16.msra.mxu1 %v9564_v49  ;;  %v9618_v48 = vcombine.low %v782_v31, %v786_v34  ;;  %v9620_v49 = vcombine.low %v783_v35, %v787_v36  ;;  %v9660_v31 = vcombine.low %v823_v17, %v827_v19  ;;  %v842_v34 = vld [vmem:[%s11886_s14 + $0xe20] sm:$0xff]  ;;  %v839_v35 = vld [vmem:[%s11886_s14 + $0xe08] sm:$0xff] }
 0x17a   : > { %5186 = vmatprep.subr.bf16.mxu0 %v9571_v50  ;;  %5432 = vmatprep.subr.bf16.mxu1 %v9573_v55  ;;  %v9627_v50 = vcombine.high %v790_v43, %v794_v44  ;;  %v9629_v55 = vcombine.high %v791_v46, %v795_v47  ;;  %v9669_v36 = vcombine.high %v831_v27, %v835_v29 }
 0x17d   : > { %5187 = vmatpush1.bf16.msra.mxu0 %v9570_v58  ;;  %5433 = vmatpush1.bf16.msra.mxu1 %v9572_v59  ;;  %v9626_v58 = vcombine.low %v790_v43, %v794_v44  ;;  %v9628_v59 = vcombine.low %v791_v46, %v795_v47  ;;  %v846_v43 = vld [vmem:[%s11886_s14 + $0xe40] sm:$0xff]  ;;  %v851_v47 = vld [vmem:[%s11886_s14 + $0xe68] sm:$0xff] }
 0x17e   : > { %5188 = vmatprep.subr.bf16.mxu0 %v9579_v60  ;;  %5434 = vmatprep.subr.bf16.mxu1 %v9581_v0  ;;  %v9635_v60 = vcombine.high %v798_v51, %v802_v52  ;;  %v9637_v0 = vcombine.high %v799_v54, %v803_v56  ;;  %v850_v44 = vld [vmem:[%s11886_s14 + $0xe60] sm:$0xff] }
 0x181   : > { %5189 = vmatpush1.bf16.msra.mxu0 %v9578_v2  ;;  %5435 = vmatpush1.bf16.msra.mxu1 %v9580_v3  ;;  %v9634_v2 = vcombine.low %v798_v51, %v802_v52  ;;  %v9636_v3 = vcombine.low %v799_v54, %v803_v56  ;;  %v854_v51 = vld [vmem:[%s11886_s14 + $0xe80] sm:$0xff]  ;;  %v855_v54 = vld [vmem:[%s11886_s14 + $0xe88] sm:$0xff] }
 0x182   : > { %5190 = vmatprep.subr.bf16.mxu0 %v9587_v4  ;;  %5436 = vmatprep.subr.bf16.mxu1 %v9589_v8  ;;  %v9643_v4 = vcombine.high %v806_v61, %v810_v62  ;;  %v9645_v8 = vcombine.high %v807_v63, %v811_v1  ;;  %v858_v52 = vld [vmem:[%s11886_s14 + $0xea0] sm:$0xff]  ;;  %v859_v56 = vld [vmem:[%s11886_s14 + $0xea8] sm:$0xff] }
 0x185   : > { %5191 = vmatpush1.bf16.msra.mxu0 %v9586_v10  ;;  %5437 = vmatpush1.bf16.msra.mxu1 %v9588_v11  ;;  %v9642_v10 = vcombine.low %v806_v61, %v810_v62  ;;  %v9644_v11 = vcombine.low %v807_v63, %v811_v1  ;;  %v862_v61 = vld [vmem:[%s11886_s14 + $0xec0] sm:$0xff]  ;;  %v863_v63 = vld [vmem:[%s11886_s14 + $0xec8] sm:$0xff] }
 0x186   : > { %5192 = vmatprep.subr.bf16.mxu0 %v9595_v13  ;;  %5438 = vmatprep.subr.bf16.mxu1 %v9597_v18  ;;  %v9651_v13 = vcombine.high %v814_v5, %v818_v6  ;;  %v9653_v18 = vcombine.high %v815_v7, %v819_v9  ;;  %v866_v62 = vld [vmem:[%s11886_s14 + $0xee0] sm:$0xff]  ;;  %v867_v1 = vld [vmem:[%s11886_s14 + $0xee8] sm:$0xff] }
 0x189   : > { %5193 = vmatpush1.bf16.msra.mxu0 %v9594_v20  ;;  %5439 = vmatpush1.bf16.msra.mxu1 %v9596_v21  ;;  %v9650_v20 = vcombine.low %v814_v5, %v818_v6  ;;  %v9652_v21 = vcombine.low %v815_v7, %v819_v9  ;;  %v870_v5 = vld [vmem:[%s11886_s14 + $0xf00] sm:$0xff]  ;;  %v871_v7 = vld [vmem:[%s11886_s14 + $0xf08] sm:$0xff] }
 0x18a   : > { %5194 = vmatprep.subr.bf16.mxu0 %v9603_v22  ;;  %5440 = vmatprep.subr.bf16.mxu1 %v9605_v28  ;;  %v9659_v22 = vcombine.high %v822_v14, %v826_v16  ;;  %v9661_v28 = vcombine.high %v823_v17, %v827_v19  ;;  %v874_v6 = vld [vmem:[%s11886_s14 + $0xf20] sm:$0xff]  ;;  %v875_v9 = vld [vmem:[%s11886_s14 + $0xf28] sm:$0xff] }
 0x18b   : > { %v879_v17 = vld [vmem:[%s11886_s14 + $0xf48] sm:$0xff] }
 0x18c   : > { %v883_v19 = vld [vmem:[%s11886_s14 + $0xf68] sm:$0xff] }
 0x18d   : > { %5195 = vmatpush1.bf16.msra.mxu0 %v9602_v30  ;;  %5441 = vmatpush1.bf16.msra.mxu1 %v9604_v32  ;;  %v9658_v30 = vcombine.low %v822_v14, %v826_v16  ;;  %v9667_v32 = vcombine.high %v830_v53, %v834_v26  ;;  %v878_v14 = vld [vmem:[%s11886_s14 + $0xf40] sm:$0xff] }
 0x18e   : > { %5205 = vmatprep.subr.bf16.mxu0 %v9611_v33  ;;  %5451 = vmatprep.subr.bf16.mxu1 %v9613_v37  ;;  %v838_v33 = vld [vmem:[%s11886_s14 + $0xe00] sm:$0xff]  ;;  %v843_v37 = vld [vmem:[%s11886_s14 + $0xe28] sm:$0xff] }
 0x18f   : > { %v9677_v46 = vcombine.high %v839_v35, %v843_v37  ;;  %v882_v16 = vld [vmem:[%s11886_s14 + $0xf60] sm:$0xff] }
 0x190   : > { %5197 = vmatmul.mubr.bf16.vlgmr.msra.gmra.mrb[0].mxu0 %v12149_v39  ;;  %5443 = vmatmul.mubr.bf16.vlgmr.msra.gmra.mrb[0].mxu1 %v12149_v39 }
 0x191   : > { %5206 = vmatpush1.bf16.msra.mxu0 %v9610_v40  ;;  %5452 = vmatpush1.bf16.msra.mxu1 %v9612_v41  ;;  %v9666_v40 = vcombine.low %v830_v53, %v834_v26  ;;  %v9668_v41 = vcombine.low %v831_v27, %v835_v29  ;;  %v886_v53 = vld [vmem:[%s11886_s14 + $0xf80] sm:$0xff]  ;;  %v887_v27 = vld [vmem:[%s11886_s14 + $0xf88] sm:$0xff] }
 0x192   : > { %5207 = vmatprep.subr.bf16.mxu0 %v9619_v42  ;;  %5453 = vmatprep.subr.bf16.mxu1 %v9621_v45  ;;  %v9675_v42 = vcombine.high %v838_v33, %v842_v34  ;;  %v847_v45 = vld [vmem:[%s11886_s14 + $0xe48] sm:$0xff]  ;;  %v890_v26 = vld [vmem:[%s11886_s14 + $0xfa0] sm:$0xff] }
 0x193   : > { %5237 = vmatprep.mubr.bf16.mxu0 %v12157_v24  ;;  %5483 = vmatprep.mubr.bf16.mxu1 %v12157_v24  ;;  %v891_v29 = vld [vmem:[%s11886_s14 + $0xfa8] sm:$0xff] }
 0x195   : > { %5208 = vmatpush1.bf16.msra.mxu0 %v9618_v48  ;;  %5454 = vmatpush1.bf16.msra.mxu1 %v9620_v49  ;;  %v9674_v48 = vcombine.low %v838_v33, %v842_v34  ;;  %v9676_v49 = vcombine.low %v839_v35, %v843_v37  ;;  %v894_v33 = vld [vmem:[%s11886_s14 + $0xfc0] sm:$0xff]  ;;  %v895_v35 = vld [vmem:[%s11886_s14 + $0xfc8] sm:$0xff] }
 0x196   : > { %5209 = vmatprep.subr.bf16.mxu0 %v9627_v50  ;;  %5455 = vmatprep.subr.bf16.mxu1 %v9629_v55  ;;  %v9683_v50 = vcombine.high %v846_v43, %v850_v44  ;;  %v9685_v55 = vcombine.high %v847_v45, %v851_v47  ;;  %v898_v34 = vld [vmem:[%s11886_s14 + $0xfe0] sm:$0xff]  ;;  %v899_v37 = vld [vmem:[%s11886_s14 + $0xfe8] sm:$0xff] }
 0x199   : > { %5210 = vmatpush1.bf16.msra.mxu0 %v9626_v58  ;;  %5456 = vmatpush1.bf16.msra.mxu1 %v9628_v59  ;;  %v9682_v58 = vcombine.low %v846_v43, %v850_v44  ;;  %v9684_v59 = vcombine.low %v847_v45, %v851_v47  ;;  %v902_v43 = vld [vmem:[%s11886_s14 + $0x1000] sm:$0xff]  ;;  %v903_v45 = vld [vmem:[%s11886_s14 + $0x1008] sm:$0xff] }
 0x19a   : > { %5211 = vmatprep.subr.bf16.mxu0 %v9635_v60  ;;  %5457 = vmatprep.subr.bf16.mxu1 %v9637_v0  ;;  %v9691_v60 = vcombine.high %v854_v51, %v858_v52  ;;  %v9693_v0 = vcombine.high %v855_v54, %v859_v56  ;;  %v906_v44 = vld [vmem:[%s11886_s14 + $0x1020] sm:$0xff]  ;;  %v907_v47 = vld [vmem:[%s11886_s14 + $0x1028] sm:$0xff] }
 0x19d   : > { %5212 = vmatpush1.bf16.msra.mxu0 %v9634_v2  ;;  %5458 = vmatpush1.bf16.msra.mxu1 %v9636_v3  ;;  %v9690_v2 = vcombine.low %v854_v51, %v858_v52  ;;  %v9692_v3 = vcombine.low %v855_v54, %v859_v56  ;;  %v9739_v51 = vcombine.high %v902_v43, %v906_v44  ;;  %v914_v52 = vld [vmem:[%s11886_s14 + $0x1060] sm:$0xff]  ;;  %v911_v54 = vld [vmem:[%s11886_s14 + $0x1048] sm:$0xff] }
 0x19e   : > { %5213 = vmatprep.subr.bf16.mxu0 %v9643_v4  ;;  %5459 = vmatprep.subr.bf16.mxu1 %v9645_v8  ;;  %v9699_v4 = vcombine.high %v862_v61, %v866_v62  ;;  %v9701_v8 = vcombine.high %v863_v63, %v867_v1  ;;  %v9741_v56 = vcombine.high %v903_v45, %v907_v47 }
 0x1a1   : > { %5214 = vmatpush1.bf16.msra.mxu0 %v9642_v10  ;;  %5460 = vmatpush1.bf16.msra.mxu1 %v9644_v11  ;;  %v9698_v10 = vcombine.low %v862_v61, %v866_v62  ;;  %v9700_v11 = vcombine.low %v863_v63, %v867_v1  ;;  %v9740_v61 = vcombine.low %v903_v45, %v907_v47  ;;  %v918_v63 = vld [vmem:[%s11886_s14 + $0x1080] sm:$0xff] }
 0x1a2   : > { %5215 = vmatprep.subr.bf16.mxu0 %v9651_v13  ;;  %5461 = vmatprep.subr.bf16.mxu1 %v9653_v18  ;;  %v9707_v13 = vcombine.high %v870_v5, %v874_v6  ;;  %v9709_v18 = vcombine.high %v871_v7, %v875_v9  ;;  %v922_v1 = vld [vmem:[%s11886_s14 + $0x10a0] sm:$0xff] }
 0x1a3   : > { %v962_v47 = vld [vmem:[%s11886_s14 + $0x11e0] sm:$0xff] }
 0x1a5   : > { %5216 = vmatpush1.bf16.msra.mxu0 %v9650_v20  ;;  %5462 = vmatpush1.bf16.msra.mxu1 %v9652_v21  ;;  %v9706_v20 = vcombine.low %v870_v5, %v874_v6  ;;  %v9708_v21 = vcombine.low %v871_v7, %v875_v9  ;;  %v9755_v6 = vcombine.high %v918_v63, %v922_v1  ;;  %v930_v9 = vld [vmem:[%s11886_s14 + $0x10e0] sm:$0xff] }
 0x1a6   : > { %5217 = vmatprep.subr.bf16.mxu0 %v9659_v22  ;;  %5463 = vmatprep.subr.bf16.mxu1 %v9661_v28  ;;  %v9715_v22 = vcombine.high %v878_v14, %v882_v16  ;;  %v9717_v28 = vcombine.high %v879_v17, %v883_v19 }
 0x1a9   : > { %5218 = vmatpush1.bf16.msra.mxu0 %v9658_v30  ;;  %5464 = vmatpush1.bf16.msra.mxu1 %v9660_v31  ;;  %v9714_v30 = vcombine.low %v878_v14, %v882_v16  ;;  %v9716_v31 = vcombine.low %v879_v17, %v883_v19  ;;  %v938_v19 = vld [vmem:[%s11886_s14 + $0x1120] sm:$0xff] }
 0x1aa   : > { %5219 = vmatprep.subr.bf16.mxu0 %v9667_v32  ;;  %5465 = vmatprep.subr.bf16.mxu1 %v9669_v36  ;;  %v9723_v32 = vcombine.high %v886_v53, %v890_v26  ;;  %v9725_v36 = vcombine.high %v887_v27, %v891_v29 }
 0x1ad   : > { %5220 = vmatpush1.bf16.msra.mxu0 %v9666_v40  ;;  %5466 = vmatpush1.bf16.msra.mxu1 %v9668_v41  ;;  %v9722_v40 = vcombine.low %v886_v53, %v890_v26  ;;  %v9724_v41 = vcombine.low %v887_v27, %v891_v29  ;;  %v946_v29 = vld [vmem:[%s11886_s14 + $0x1160] sm:$0xff] }
 0x1ae   : > { %5221 = vmatprep.subr.bf16.mxu0 %v9675_v42  ;;  %5467 = vmatprep.subr.bf16.mxu1 %v9677_v46  ;;  %v9731_v42 = vcombine.high %v894_v33, %v898_v34  ;;  %v9733_v46 = vcombine.high %v895_v35, %v899_v37 }
 0x1b1   : > { %5222 = vmatpush1.bf16.msra.mxu0 %v9674_v48  ;;  %5468 = vmatpush1.bf16.msra.mxu1 %v9676_v49  ;;  %v9730_v48 = vcombine.low %v894_v33, %v898_v34  ;;  %v910_v49 = vld [vmem:[%s11886_s14 + $0x1040] sm:$0xff] }
 0x1b2   : > { %5223 = vmatprep.subr.bf16.mxu0 %v9683_v50  ;;  %5469 = vmatprep.subr.bf16.mxu1 %v9685_v55  ;;  %v9732_v50 = vcombine.low %v895_v35, %v899_v37  ;;  %v915_v55 = vld [vmem:[%s11886_s14 + $0x1068] sm:$0xff]  ;;  %v9747_v62 = vcombine.high %v910_v49, %v914_v52  ;;  %v954_v37 = vld [vmem:[%s11886_s14 + $0x11a0] sm:$0xff] }
 0x1b3   : > { %v9748_v5 = vcombine.low %v911_v54, %v915_v55 }
 0x1b5   : > { %5224 = vmatpush1.bf16.msra.mxu0 %v9682_v58  ;;  %5470 = vmatpush1.bf16.msra.mxu1 %v9684_v59  ;;  %v12224_v58 = vld [vmem:[%s11878_s8 + $0x20] sm:$0xff]  ;;  %v12228_v59 = vcombine.low %v12145_v38, %v12145_v38  ;;  %v919_v38 = vld [vmem:[%s11886_s14 + $0x1088] sm:$0xff] }
 0x1b6   : > { %5225 = vmatprep.subr.bf16.mxu0 %v9691_v60  ;;  %5471 = vmatprep.subr.bf16.mxu1 %v9693_v0  ;;  %v9738_v60 = vcombine.low %v902_v43, %v906_v44  ;;  %v9749_v0 = vcombine.high %v911_v54, %v915_v55  ;;  %v966_v55 = vld [vmem:[%s11886_s14 + $0x1200] sm:$0xff] }
 0x1b9   : > { %5226 = vmatpush1.bf16.msra.mxu0 %v9690_v2  ;;  %5472 = vmatpush1.bf16.msra.mxu1 %v9692_v3  ;;  %v12234_v2 = vcombine.high %v12224_v58, %v12224_v58  ;;  %v923_v3 = vld [vmem:[%s11886_s14 + $0x10a8] sm:$0xff] }
 0x1ba   : > { %5227 = vmatprep.subr.bf16.mxu0 %v9699_v4  ;;  %5473 = vmatprep.subr.bf16.mxu1 %v9701_v8  ;;  %v9746_v4 = vcombine.low %v910_v49, %v914_v52  ;;  %v9757_v7 = vcombine.high %v919_v38, %v923_v3  ;;  %v926_v8 = vld [vmem:[%s11886_s14 + $0x10c0] sm:$0xff]  ;;  %v9756_v14 = vcombine.low %v919_v38, %v923_v3  ;;  %v963_v49 = vld [vmem:[%s11886_s14 + $0x11e8] sm:$0xff] }
 0x1bb   : > { %v9763_v16 = vcombine.high %v926_v8, %v930_v9  ;;  %v974_v38 = vld [vmem:[%s11886_s14 + $0x1240] sm:$0xff] }
 0x1bc   : > { %v978_v3 = vld [vmem:[%s11886_s14 + $0x1260] sm:$0xff] }
 0x1bd   : > { %5228 = vmatpush1.bf16.msra.mxu0 %v9698_v10  ;;  %5474 = vmatpush1.bf16.msra.mxu1 %v9700_v11  ;;  %v927_v10 = vld [vmem:[%s11886_s14 + $0x10c8] sm:$0xff] }
 0x1be   : > { %5229 = vmatprep.subr.bf16.mxu0 %v9707_v13  ;;  %5475 = vmatprep.subr.bf16.mxu1 %v9709_v18  ;;  %v931_v11 = vld [vmem:[%s11886_s14 + $0x10e8] sm:$0xff]  ;;  %v9754_v13 = vcombine.low %v918_v63, %v922_v1  ;;  %v934_v18 = vld [vmem:[%s11886_s14 + $0x1100] sm:$0xff] }
 0x1bf   : > { %v9765_v17 = vcombine.high %v927_v10, %v931_v11  ;;  %v9764_v53 = vcombine.low %v927_v10, %v931_v11  ;;  %v9771_v26 = vcombine.high %v934_v18, %v938_v19  ;;  %v982_v10 = vld [vmem:[%s11886_s14 + $0x1280] sm:$0xff] }
 0x1c0   : > { %v986_v11 = vld [vmem:[%s11886_s14 + $0x12a0] sm:$0xff] }
 0x1c1   : > { %5230 = vmatpush1.bf16.msra.mxu0 %v9706_v20  ;;  %5476 = vmatpush1.bf16.msra.mxu1 %v9708_v21  ;;  %v935_v20 = vld [vmem:[%s11886_s14 + $0x1108] sm:$0xff] }
 0x1c2   : > { %5231 = vmatprep.subr.bf16.mxu0 %v9715_v22  ;;  %5477 = vmatprep.subr.bf16.mxu1 %v9717_v28  ;;  %v939_v21 = vld [vmem:[%s11886_s14 + $0x1128] sm:$0xff]  ;;  %v9762_v22 = vcombine.low %v926_v8, %v930_v9  ;;  %v942_v28 = vld [vmem:[%s11886_s14 + $0x1140] sm:$0xff]  ;;  %v9811_v8 = vcombine.high %v974_v38, %v978_v3 }
 0x1c3   : > { %v9773_v27 = vcombine.high %v935_v20, %v939_v21  ;;  %v9772_v33 = vcombine.low %v935_v20, %v939_v21  ;;  %v9779_v34 = vcombine.high %v942_v28, %v946_v29  ;;  %v990_v20 = vld [vmem:[%s11886_s14 + $0x12c0] sm:$0xff] }
 0x1c4   : > { %v994_v21 = vld [vmem:[%s11886_s14 + $0x12e0] sm:$0xff] }
 0x1c5   : > { %5232 = vmatpush1.bf16.msra.mxu0 %v9714_v30  ;;  %5478 = vmatpush1.bf16.msra.mxu1 %v9716_v31  ;;  %v943_v30 = vld [vmem:[%s11886_s14 + $0x1148] sm:$0xff] }
 0x1c6   : > { %5233 = vmatprep.subr.bf16.mxu0 %v9723_v32  ;;  %5479 = vmatprep.subr.bf16.mxu1 %v9725_v36  ;;  %v947_v31 = vld [vmem:[%s11886_s14 + $0x1168] sm:$0xff]  ;;  %v9770_v32 = vcombine.low %v934_v18, %v938_v19  ;;  %v950_v36 = vld [vmem:[%s11886_s14 + $0x1180] sm:$0xff]  ;;  %v9819_v18 = vcombine.high %v982_v10, %v986_v11 }
 0x1c7   : > { %v9781_v35 = vcombine.high %v943_v30, %v947_v31  ;;  %v9780_v43 = vcombine.low %v943_v30, %v947_v31  ;;  %v9787_v44 = vcombine.high %v950_v36, %v954_v37  ;;  %v998_v30 = vld [vmem:[%s11886_s14 + $0x1300] sm:$0xff] }
 0x1c8   : > { %v1002_v31 = vld [vmem:[%s11886_s14 + $0x1320] sm:$0xff] }
 0x1c9   : > { %5234 = vmatpush1.bf16.msra.mxu0 %v9722_v40  ;;  %5480 = vmatpush1.bf16.msra.mxu1 %v9724_v41  ;;  %v951_v40 = vld [vmem:[%s11886_s14 + $0x1188] sm:$0xff] }
 0x1ca   : > { %5235 = vmatprep.subr.bf16.mxu0 %v9731_v42  ;;  %5481 = vmatprep.subr.bf16.mxu1 %v9733_v46  ;;  %v955_v41 = vld [vmem:[%s11886_s14 + $0x11a8] sm:$0xff]  ;;  %v9778_v42 = vcombine.low %v942_v28, %v946_v29  ;;  %v958_v46 = vld [vmem:[%s11886_s14 + $0x11c0] sm:$0xff]  ;;  %v9827_v28 = vcombine.high %v990_v20, %v994_v21 }
 0x1cb   : > { %v9789_v45 = vcombine.high %v951_v40, %v955_v41  ;;  %v9795_v52 = vcombine.high %v958_v46, %v962_v47 }
 0x1cd   : > { %5236 = vmatpush1.bf16.msra.mxu0 %v9730_v48  ;;  %5482 = vmatpush1.bf16.msra.mxu1 %v9732_v50  ;;  %v959_v48 = vld [vmem:[%s11886_s14 + $0x11c8] sm:$0xff]  ;;  %v9786_v50 = vcombine.low %v950_v36, %v954_v37  ;;  %v9835_v36 = vcombine.high %v998_v30, %v1002_v31 }
 0x1ce   : > { %5246 = vmatprep.subr.bf16.mxu0 %v9739_v51  ;;  %5492 = vmatprep.subr.bf16.mxu1 %v9741_v56  ;;  %v9788_v51 = vcombine.low %v951_v40, %v955_v41  ;;  %v9797_v54 = vcombine.high %v959_v48, %v963_v49  ;;  %v970_v56 = vld [vmem:[%s11886_s14 + $0x1220] sm:$0xff]  ;;  %v9796_v63 = vcombine.low %v959_v48, %v963_v49 }
 0x1cf   : > { %v1006_v40 = vld [vmem:[%s11886_s14 + $0x1340] sm:$0xff] }
 0x1d0   : > { %5238 = vmatmul.mubr.bf16.vlgmr.msra.gmra.mrb[0].mxu0 %v12228_v59  ;;  %5484 = vmatmul.mubr.bf16.vlgmr.msra.gmra.mrb[0].mxu1 %v12228_v59  ;;  %v1010_v41 = vld [vmem:[%s11886_s14 + $0x1360] sm:$0xff] }
 0x1d1   : > { %5247 = vmatpush1.bf16.msra.mxu0 %v9738_v60  ;;  %5493 = vmatpush1.bf16.msra.mxu1 %v9740_v61  ;;  %v967_v60 = vld [vmem:[%s11886_s14 + $0x1208] sm:$0xff]  ;;  %v1014_v48 = vld [vmem:[%s11886_s14 + $0x1380] sm:$0xff] }
 0x1d2   : > { %5248 = vmatprep.subr.bf16.mxu0 %v9747_v62  ;;  %5494 = vmatprep.subr.bf16.mxu1 %v9749_v0  ;;  %v971_v61 = vld [vmem:[%s11886_s14 + $0x1228] sm:$0xff]  ;;  %v9794_v62 = vcombine.low %v958_v46, %v962_v47  ;;  %v9803_v0 = vcombine.high %v966_v55, %v970_v56  ;;  %v9843_v46 = vcombine.high %v1006_v40, %v1010_v41  ;;  %v1018_v49 = vld [vmem:[%s11886_s14 + $0x13a0] sm:$0xff] }
 0x1d3   : > { %5278 = vmatprep.mubr.bf16.mxu0 %v12234_v2  ;;  %5524 = vmatprep.mubr.bf16.mxu1 %v12234_v2  ;;  %v9805_v1 = vcombine.high %v967_v60, %v971_v61 }
 0x1d5   : > { %5249 = vmatpush1.bf16.msra.mxu0 %v9746_v4  ;;  %5495 = vmatpush1.bf16.msra.mxu1 %v9748_v5  ;;  %v975_v4 = vld [vmem:[%s11886_s14 + $0x1248] sm:$0xff] }
 0x1d6   : > { %5250 = vmatprep.subr.bf16.mxu0 %v9755_v6  ;;  %5496 = vmatprep.subr.bf16.mxu1 %v9757_v7  ;;  %v979_v5 = vld [vmem:[%s11886_s14 + $0x1268] sm:$0xff]  ;;  %v9802_v6 = vcombine.low %v966_v55, %v970_v56  ;;  %v9804_v7 = vcombine.low %v967_v60, %v971_v61  ;;  %v9851_v55 = vcombine.high %v1014_v48, %v1018_v49  ;;  %v1022_v60 = vld [vmem:[%s11886_s14 + $0x13c0] sm:$0xff] }
 0x1d7   : > { %v9813_v9 = vcombine.high %v975_v4, %v979_v5  ;;  %v1026_v61 = vld [vmem:[%s11886_s14 + $0x13e0] sm:$0xff] }
 0x1d9   : > { %5251 = vmatpush1.bf16.msra.mxu0 %v9754_v13  ;;  %5497 = vmatpush1.bf16.msra.mxu1 %v9756_v14  ;;  %v983_v13 = vld [vmem:[%s11886_s14 + $0x1288] sm:$0xff] }
 0x1da   : > { %5252 = vmatprep.subr.bf16.mxu0 %v9763_v16  ;;  %5498 = vmatprep.subr.bf16.mxu1 %v9765_v17  ;;  %v987_v14 = vld [vmem:[%s11886_s14 + $0x12a8] sm:$0xff]  ;;  %v9810_v16 = vcombine.low %v974_v38, %v978_v3  ;;  %v9812_v17 = vcombine.low %v975_v4, %v979_v5  ;;  %v9859_v38 = vcombine.high %v1022_v60, %v1026_v61  ;;  %v1030_v4 = vld [vmem:[%s11886_s14 + $0x1400] sm:$0xff] }
 0x1db   : > { %v9821_v19 = vcombine.high %v983_v13, %v987_v14  ;;  %v1034_v5 = vld [vmem:[%s11886_s14 + $0x1420] sm:$0xff] }
 0x1dd   : > { %5253 = vmatpush1.bf16.msra.mxu0 %v9762_v22  ;;  %5499 = vmatpush1.bf16.msra.mxu1 %v9764_v53  ;;  %v991_v22 = vld [vmem:[%s11886_s14 + $0x12c8] sm:$0xff] }
 0x1de   : > { %5254 = vmatprep.subr.bf16.mxu0 %v9771_v26  ;;  %5500 = vmatprep.subr.bf16.mxu1 %v9773_v27  ;;  %v995_v53 = vld [vmem:[%s11886_s14 + $0x12e8] sm:$0xff]  ;;  %v9818_v26 = vcombine.low %v982_v10, %v986_v11  ;;  %v9820_v27 = vcombine.low %v983_v13, %v987_v14  ;;  %v9867_v10 = vcombine.high %v1030_v4, %v1034_v5  ;;  %v1038_v13 = vld [vmem:[%s11886_s14 + $0x1440] sm:$0xff] }
 0x1df   : > { %v9829_v29 = vcombine.high %v991_v22, %v995_v53  ;;  %v1042_v14 = vld [vmem:[%s11886_s14 + $0x1460] sm:$0xff] }
 0x1e1   : > { %5255 = vmatpush1.bf16.msra.mxu0 %v9770_v32  ;;  %5501 = vmatpush1.bf16.msra.mxu1 %v9772_v33  ;;  %v999_v32 = vld [vmem:[%s11886_s14 + $0x1308] sm:$0xff] }
 0x1e2   : > { %5256 = vmatprep.subr.bf16.mxu0 %v9779_v34  ;;  %5502 = vmatprep.subr.bf16.mxu1 %v9781_v35  ;;  %v1003_v33 = vld [vmem:[%s11886_s14 + $0x1328] sm:$0xff]  ;;  %v9826_v34 = vcombine.low %v990_v20, %v994_v21  ;;  %v9828_v35 = vcombine.low %v991_v22, %v995_v53  ;;  %v9866_v20 = vcombine.low %v1030_v4, %v1034_v5 }
 0x1e3   : > { %v9837_v37 = vcombine.high %v999_v32, %v1003_v33  ;;  %v9875_v22 = vcombine.high %v1038_v13, %v1042_v14 }
 0x1e5   : > { %5257 = vmatpush1.bf16.msra.mxu0 %v9778_v42  ;;  %5503 = vmatpush1.bf16.msra.mxu1 %v9780_v43  ;;  %v1007_v42 = vld [vmem:[%s11886_s14 + $0x1348] sm:$0xff] }
 0x1e6   : > { %5258 = vmatprep.subr.bf16.mxu0 %v9787_v44  ;;  %5504 = vmatprep.subr.bf16.mxu1 %v9789_v45  ;;  %v1011_v43 = vld [vmem:[%s11886_s14 + $0x1368] sm:$0xff]  ;;  %v9834_v44 = vcombine.low %v998_v30, %v1002_v31  ;;  %v9836_v45 = vcombine.low %v999_v32, %v1003_v33  ;;  %v9874_v30 = vcombine.low %v1038_v13, %v1042_v14 }
 0x1e7   : > { %v9845_v47 = vcombine.high %v1007_v42, %v1011_v43 }
 0x1e9   : > { %5259 = vmatpush1.bf16.msra.mxu0 %v9786_v50  ;;  %5505 = vmatpush1.bf16.msra.mxu1 %v9788_v51  ;;  %v1015_v50 = vld [vmem:[%s11886_s14 + $0x1388] sm:$0xff] }
 0x1ea   : > { %5260 = vmatprep.subr.bf16.mxu0 %v9795_v52  ;;  %5506 = vmatprep.subr.bf16.mxu1 %v9797_v54  ;;  %v1019_v51 = vld [vmem:[%s11886_s14 + $0x13a8] sm:$0xff]  ;;  %v9842_v52 = vcombine.low %v1006_v40, %v1010_v41  ;;  %v9844_v54 = vcombine.low %v1007_v42, %v1011_v43 }
 0x1eb   : > { %v9853_v56 = vcombine.high %v1015_v50, %v1019_v51 }
 0x1ed   : > { %5261 = vmatpush1.bf16.msra.mxu0 %v9794_v62  ;;  %5507 = vmatpush1.bf16.msra.mxu1 %v9796_v63  ;;  %v1023_v62 = vld [vmem:[%s11886_s14 + $0x13c8] sm:$0xff] }
 0x1ee   : > { %5262 = vmatprep.subr.bf16.mxu0 %v9803_v0  ;;  %5508 = vmatprep.subr.bf16.mxu1 %v9805_v1  ;;  %v1027_v63 = vld [vmem:[%s11886_s14 + $0x13e8] sm:$0xff]  ;;  %v9850_v0 = vcombine.low %v1014_v48, %v1018_v49  ;;  %v9852_v1 = vcombine.low %v1015_v50, %v1019_v51 }
 0x1ef   : > { %v9861_v3 = vcombine.high %v1023_v62, %v1027_v63 }
 0x1f1   : > { %5263 = vmatpush1.bf16.msra.mxu0 %v9802_v6  ;;  %5509 = vmatpush1.bf16.msra.mxu1 %v9804_v7  ;;  %v1031_v6 = vld [vmem:[%s11886_s14 + $0x1408] sm:$0xff] }
 0x1f2   : > { %5264 = vmatprep.subr.bf16.mxu0 %v9811_v8  ;;  %5510 = vmatprep.subr.bf16.mxu1 %v9813_v9  ;;  %v1035_v7 = vld [vmem:[%s11886_s14 + $0x1428] sm:$0xff]  ;;  %v9858_v8 = vcombine.low %v1022_v60, %v1026_v61  ;;  %v9860_v9 = vcombine.low %v1023_v62, %v1027_v63 }
 0x1f3   : > { %v9869_v11 = vcombine.high %v1031_v6, %v1035_v7  ;;  %v9868_v21 = vcombine.low %v1031_v6, %v1035_v7 }
 0x1f5   : > { %5265 = vmatpush1.bf16.msra.mxu0 %v9810_v16  ;;  %5511 = vmatpush1.bf16.msra.mxu1 %v9812_v17  ;;  %v12302_v16 = vcombine.low %v12224_v58, %v12224_v58  ;;  %v1039_v17 = vld [vmem:[%s11886_s14 + $0x1448] sm:$0xff] }
 0x1f6   : > { %5266 = vmatprep.subr.bf16.mxu0 %v9819_v18  ;;  %5512 = vmatprep.subr.bf16.mxu1 %v9821_v19  ;;  %v1043_v18 = vld [vmem:[%s11886_s14 + $0x1468] sm:$0xff] }
 0x1f7   : > { %v12307_v19 = vld [vmem:[%s11878_s8 + $0x28] sm:$0xff]  ;;  %v9877_v53 = vcombine.high %v1039_v17, %v1043_v18  ;;  %v9876_v31 = vcombine.low %v1039_v17, %v1043_v18 }
 0x1f8   : > { %v12313_v58 = vcombine.high %v12307_v19, %v12307_v19 }
 0x1f9   : > { %5267 = vmatpush1.bf16.msra.mxu0 %v9818_v26  ;;  %5513 = vmatpush1.bf16.msra.mxu1 %v9820_v27  ;;  %v1046_v26 = vld [vmem:[%s11886_s14 + $0x1480] sm:$0xff] }
 0x1fa   : > { %5268 = vmatprep.subr.bf16.mxu0 %v9827_v28  ;;  %5514 = vmatprep.subr.bf16.mxu1 %v9829_v29  ;;  %v1050_v27 = vld [vmem:[%s11886_s14 + $0x14a0] sm:$0xff]  ;;  %v1047_v28 = vld [vmem:[%s11886_s14 + $0x1488] sm:$0xff] }
 0x1fb   : > { %v1051_v29 = vld [vmem:[%s11886_s14 + $0x14a8] sm:$0xff]  ;;  %v9883_v32 = vcombine.high %v1046_v26, %v1050_v27  ;;  %v9882_v40 = vcombine.low %v1046_v26, %v1050_v27 }
 0x1fc   : > { %v9885_v33 = vcombine.high %v1047_v28, %v1051_v29  ;;  %v9884_v41 = vcombine.low %v1047_v28, %v1051_v29 }
 0x1fd   : > { %5269 = vmatpush1.bf16.msra.mxu0 %v9826_v34  ;;  %5515 = vmatpush1.bf16.msra.mxu1 %v9828_v35  ;;  %v1054_v34 = vld [vmem:[%s11886_s14 + $0x14c0] sm:$0xff] }
 0x1fe   : > { %5270 = vmatprep.subr.bf16.mxu0 %v9835_v36  ;;  %5516 = vmatprep.subr.bf16.mxu1 %v9837_v37  ;;  %v1058_v35 = vld [vmem:[%s11886_s14 + $0x14e0] sm:$0xff]  ;;  %v1055_v36 = vld [vmem:[%s11886_s14 + $0x14c8] sm:$0xff] }
 0x1ff   : > { %v1059_v37 = vld [vmem:[%s11886_s14 + $0x14e8] sm:$0xff]  ;;  %v9891_v42 = vcombine.high %v1054_v34, %v1058_v35  ;;  %v9890_v48 = vcombine.low %v1054_v34, %v1058_v35 }
 0x200   : > { %v9893_v43 = vcombine.high %v1055_v36, %v1059_v37  ;;  %v9892_v49 = vcombine.low %v1055_v36, %v1059_v37 }
 0x201   : > { %5271 = vmatpush1.bf16.msra.mxu0 %v9834_v44  ;;  %5517 = vmatpush1.bf16.msra.mxu1 %v9836_v45  ;;  %v1062_v44 = vld [vmem:[%s11886_s14 + $0x1500] sm:$0xff] }
 0x202   : > { %5272 = vmatprep.subr.bf16.mxu0 %v9843_v46  ;;  %5518 = vmatprep.subr.bf16.mxu1 %v9845_v47  ;;  %v1066_v45 = vld [vmem:[%s11886_s14 + $0x1520] sm:$0xff]  ;;  %v1063_v46 = vld [vmem:[%s11886_s14 + $0x1508] sm:$0xff] }
 0x203   : > { %v1067_v47 = vld [vmem:[%s11886_s14 + $0x1528] sm:$0xff]  ;;  %v9899_v50 = vcombine.high %v1062_v44, %v1066_v45  ;;  %v9898_v60 = vcombine.low %v1062_v44, %v1066_v45 }
 0x204   : > { %v9901_v51 = vcombine.high %v1063_v46, %v1067_v47  ;;  %v9900_v61 = vcombine.low %v1063_v46, %v1067_v47 }
 0x205   : > { %5273 = vmatpush1.bf16.msra.mxu0 %v9842_v52  ;;  %5519 = vmatpush1.bf16.msra.mxu1 %v9844_v54  ;;  %v1070_v52 = vld [vmem:[%s11886_s14 + $0x1540] sm:$0xff] }
 0x206   : > { %5274 = vmatprep.subr.bf16.mxu0 %v9851_v55  ;;  %5520 = vmatprep.subr.bf16.mxu1 %v9853_v56  ;;  %v1074_v54 = vld [vmem:[%s11886_s14 + $0x1560] sm:$0xff]  ;;  %v1071_v55 = vld [vmem:[%s11886_s14 + $0x1548] sm:$0xff] }
 0x207   : > { %v1075_v56 = vld [vmem:[%s11886_s14 + $0x1568] sm:$0xff]  ;;  %v9907_v62 = vcombine.high %v1070_v52, %v1074_v54  ;;  %v9906_v4 = vcombine.low %v1070_v52, %v1074_v54 }
 0x208   : > { %v9909_v63 = vcombine.high %v1071_v55, %v1075_v56  ;;  %v9908_v5 = vcombine.low %v1071_v55, %v1075_v56 }
 0x209   : > { %5275 = vmatpush1.bf16.msra.mxu0 %v9850_v0  ;;  %5521 = vmatpush1.bf16.msra.mxu1 %v9852_v1  ;;  %v1078_v0 = vld [vmem:[%s11886_s14 + $0x1580] sm:$0xff] }
 0x20a   : > { %5276 = vmatprep.subr.bf16.mxu0 %v9859_v38  ;;  %5522 = vmatprep.subr.bf16.mxu1 %v9861_v3  ;;  %v1082_v1 = vld [vmem:[%s11886_s14 + $0x15a0] sm:$0xff]  ;;  %v1079_v38 = vld [vmem:[%s11886_s14 + $0x1588] sm:$0xff] }
 0x20b   : > { %v1083_v3 = vld [vmem:[%s11886_s14 + $0x15a8] sm:$0xff]  ;;  %v9915_v6 = vcombine.high %v1078_v0, %v1082_v1  ;;  %v9914_v13 = vcombine.low %v1078_v0, %v1082_v1 }
 0x20c   : > { %v9917_v7 = vcombine.high %v1079_v38, %v1083_v3  ;;  %v9916_v14 = vcombine.low %v1079_v38, %v1083_v3 }
 0x20d   : > { %5277 = vmatpush1.bf16.msra.mxu0 %v9858_v8  ;;  %5523 = vmatpush1.bf16.msra.mxu1 %v9860_v9  ;;  %v1086_v8 = vld [vmem:[%s11886_s14 + $0x15c0] sm:$0xff] }
 0x20e   : > { %5287 = vmatprep.subr.bf16.mxu0 %v9867_v10  ;;  %5533 = vmatprep.subr.bf16.mxu1 %v9869_v11  ;;  %v1090_v9 = vld [vmem:[%s11886_s14 + $0x15e0] sm:$0xff]  ;;  %v1087_v10 = vld [vmem:[%s11886_s14 + $0x15c8] sm:$0xff] }
 0x20f   : > { %v1091_v11 = vld [vmem:[%s11886_s14 + $0x15e8] sm:$0xff]  ;;  %v9923_v17 = vcombine.high %v1086_v8, %v1090_v9  ;;  %v9922_v26 = vcombine.low %v1086_v8, %v1090_v9 }
 0x210   : > { %5279 = vmatmul.mubr.bf16.vlgmr.msra.gmra.mrb[0].mxu0 %v12302_v16  ;;  %5525 = vmatmul.mubr.bf16.vlgmr.msra.gmra.mrb[0].mxu1 %v12302_v16  ;;  %v9925_v18 = vcombine.high %v1087_v10, %v1091_v11  ;;  %v9924_v27 = vcombine.low %v1087_v10, %v1091_v11 }
 0x211   : > { %5288 = vmatpush1.bf16.msra.mxu0 %v9866_v20  ;;  %5534 = vmatpush1.bf16.msra.mxu1 %v9868_v21  ;;  %v1094_v20 = vld [vmem:[%s11886_s14 + $0x1600] sm:$0xff] }
 0x212   : > { %5289 = vmatprep.subr.bf16.mxu0 %v9875_v22  ;;  %5535 = vmatprep.subr.bf16.mxu1 %v9877_v53  ;;  %v1098_v21 = vld [vmem:[%s11886_s14 + $0x1620] sm:$0xff]  ;;  %v1095_v22 = vld [vmem:[%s11886_s14 + $0x1608] sm:$0xff] }
 0x213   : > { %5319 = vmatprep.mubr.bf16.mxu0 %v12313_v58  ;;  %5565 = vmatprep.mubr.bf16.mxu1 %v12313_v58  ;;  %v1099_v53 = vld [vmem:[%s11886_s14 + $0x1628] sm:$0xff]  ;;  %v9931_v28 = vcombine.high %v1094_v20, %v1098_v21  ;;  %v9930_v34 = vcombine.low %v1094_v20, %v1098_v21 }
 0x214   : > { %v9933_v29 = vcombine.high %v1095_v22, %v1099_v53  ;;  %v9932_v35 = vcombine.low %v1095_v22, %v1099_v53 }
 0x215   : > { %5290 = vmatpush1.bf16.msra.mxu0 %v9874_v30  ;;  %5536 = vmatpush1.bf16.msra.mxu1 %v9876_v31  ;;  %v1102_v30 = vld [vmem:[%s11886_s14 + $0x1640] sm:$0xff] }
 0x216   : > { %5291 = vmatprep.subr.bf16.mxu0 %v9883_v32  ;;  %5537 = vmatprep.subr.bf16.mxu1 %v9885_v33  ;;  %v1106_v31 = vld [vmem:[%s11886_s14 + $0x1660] sm:$0xff]  ;;  %v1103_v32 = vld [vmem:[%s11886_s14 + $0x1648] sm:$0xff] }
 0x217   : > { %v1107_v33 = vld [vmem:[%s11886_s14 + $0x1668] sm:$0xff]  ;;  %v9939_v36 = vcombine.high %v1102_v30, %v1106_v31  ;;  %v9938_v44 = vcombine.low %v1102_v30, %v1106_v31 }
 0x218   : > { %v9941_v37 = vcombine.high %v1103_v32, %v1107_v33  ;;  %v9940_v45 = vcombine.low %v1103_v32, %v1107_v33 }
 0x219   : > { %5292 = vmatpush1.bf16.msra.mxu0 %v9882_v40  ;;  %5538 = vmatpush1.bf16.msra.mxu1 %v9884_v41  ;;  %v1110_v40 = vld [vmem:[%s11886_s14 + $0x1680] sm:$0xff] }
 0x21a   : > { %5293 = vmatprep.subr.bf16.mxu0 %v9891_v42  ;;  %5539 = vmatprep.subr.bf16.mxu1 %v9893_v43  ;;  %v1114_v41 = vld [vmem:[%s11886_s14 + $0x16a0] sm:$0xff]  ;;  %v1111_v42 = vld [vmem:[%s11886_s14 + $0x1688] sm:$0xff] }
 0x21b   : > { %v1115_v43 = vld [vmem:[%s11886_s14 + $0x16a8] sm:$0xff]  ;;  %v9947_v46 = vcombine.high %v1110_v40, %v1114_v41  ;;  %v9946_v52 = vcombine.low %v1110_v40, %v1114_v41 }
 0x21c   : > { %v9949_v47 = vcombine.high %v1111_v42, %v1115_v43  ;;  %v9948_v54 = vcombine.low %v1111_v42, %v1115_v43 }
 0x21d   : > { %5294 = vmatpush1.bf16.msra.mxu0 %v9890_v48  ;;  %5540 = vmatpush1.bf16.msra.mxu1 %v9892_v49  ;;  %v1118_v48 = vld [vmem:[%s11886_s14 + $0x16c0] sm:$0xff] }
 0x21e   : > { %5295 = vmatprep.subr.bf16.mxu0 %v9899_v50  ;;  %5541 = vmatprep.subr.bf16.mxu1 %v9901_v51  ;;  %v1122_v49 = vld [vmem:[%s11886_s14 + $0x16e0] sm:$0xff]  ;;  %v1119_v50 = vld [vmem:[%s11886_s14 + $0x16c8] sm:$0xff] }
 0x21f   : > { %v1123_v51 = vld [vmem:[%s11886_s14 + $0x16e8] sm:$0xff]  ;;  %v9955_v55 = vcombine.high %v1118_v48, %v1122_v49  ;;  %v9954_v0 = vcombine.low %v1118_v48, %v1122_v49  ;;  %v405_v48 = vld [vmem:[%s11886_s14 + $0x78] sm:$0xff] }
 0x220   : > { %v9957_v56 = vcombine.high %v1119_v50, %v1123_v51  ;;  %v9956_v1 = vcombine.low %v1119_v50, %v1123_v51 }
 0x221   : > { %5296 = vmatpush1.bf16.msra.mxu0 %v9898_v60  ;;  %5542 = vmatpush1.bf16.msra.mxu1 %v9900_v61  ;;  %v1126_v60 = vld [vmem:[%s11886_s14 + $0x1700] sm:$0xff] }
 0x222   : > { %5297 = vmatprep.subr.bf16.mxu0 %v9907_v62  ;;  %5543 = vmatprep.subr.bf16.mxu1 %v9909_v63  ;;  %v1130_v61 = vld [vmem:[%s11886_s14 + $0x1720] sm:$0xff]  ;;  %v1127_v62 = vld [vmem:[%s11886_s14 + $0x1708] sm:$0xff] }
 0x223   : > { %v1131_v63 = vld [vmem:[%s11886_s14 + $0x1728] sm:$0xff]  ;;  %v9963_v38 = vcombine.high %v1126_v60, %v1130_v61  ;;  %v9962_v8 = vcombine.low %v1126_v60, %v1130_v61 }
 0x224   : > { %v9965_v3 = vcombine.high %v1127_v62, %v1131_v63  ;;  %v9964_v9 = vcombine.low %v1127_v62, %v1131_v63 }
 0x225   : > { %5298 = vmatpush1.bf16.msra.mxu0 %v9906_v4  ;;  %5544 = vmatpush1.bf16.msra.mxu1 %v9908_v5  ;;  %v1134_v4 = vld [vmem:[%s11886_s14 + $0x1740] sm:$0xff] }
 0x226   : > { %5299 = vmatprep.subr.bf16.mxu0 %v9915_v6  ;;  %5545 = vmatprep.subr.bf16.mxu1 %v9917_v7  ;;  %v1138_v5 = vld [vmem:[%s11886_s14 + $0x1760] sm:$0xff]  ;;  %v1135_v6 = vld [vmem:[%s11886_s14 + $0x1748] sm:$0xff] }
 0x227   : > { %v1139_v7 = vld [vmem:[%s11886_s14 + $0x1768] sm:$0xff]  ;;  %v9971_v10 = vcombine.high %v1134_v4, %v1138_v5  ;;  %v9970_v20 = vcombine.low %v1134_v4, %v1138_v5 }
 0x228   : > { %v9973_v11 = vcombine.high %v1135_v6, %v1139_v7  ;;  %v9972_v21 = vcombine.low %v1135_v6, %v1139_v7 }
 0x229   : > { %5300 = vmatpush1.bf16.msra.mxu0 %v9914_v13  ;;  %5546 = vmatpush1.bf16.msra.mxu1 %v9916_v14  ;;  %v1142_v13 = vld [vmem:[%s11886_s14 + $0x1780] sm:$0xff] }
 0x22a   : > { %5301 = vmatprep.subr.bf16.mxu0 %v9923_v17  ;;  %5547 = vmatprep.subr.bf16.mxu1 %v9925_v18  ;;  %v1146_v14 = vld [vmem:[%s11886_s14 + $0x17a0] sm:$0xff]  ;;  %v1143_v17 = vld [vmem:[%s11886_s14 + $0x1788] sm:$0xff] }
 0x22b   : > { %v1147_v18 = vld [vmem:[%s11886_s14 + $0x17a8] sm:$0xff]  ;;  %v9979_v22 = vcombine.high %v1142_v13, %v1146_v14  ;;  %v9978_v30 = vcombine.low %v1142_v13, %v1146_v14 }
 0x22c   : > { %v9981_v53 = vcombine.high %v1143_v17, %v1147_v18  ;;  %v9980_v31 = vcombine.low %v1143_v17, %v1147_v18  ;;  %v432_v18 = vld [vmem:[%s11886_s14 + $0x150] sm:$0xff] }
 0x22d   : > { %5302 = vmatpush1.bf16.msra.mxu0 %v9922_v26  ;;  %5548 = vmatpush1.bf16.msra.mxu1 %v9924_v27  ;;  %v1150_v26 = vld [vmem:[%s11886_s14 + $0x17c0] sm:$0xff] }
 0x22e   : > { %5303 = vmatprep.subr.bf16.mxu0 %v9931_v28  ;;  %5549 = vmatprep.subr.bf16.mxu1 %v9933_v29  ;;  %v1154_v27 = vld [vmem:[%s11886_s14 + $0x17e0] sm:$0xff]  ;;  %v1151_v28 = vld [vmem:[%s11886_s14 + $0x17c8] sm:$0xff] }
 0x22f   : > { %v1155_v29 = vld [vmem:[%s11886_s14 + $0x17e8] sm:$0xff]  ;;  %v9987_v32 = vcombine.high %v1150_v26, %v1154_v27  ;;  %v9986_v40 = vcombine.low %v1150_v26, %v1154_v27 }
 0x230   : > { %v9989_v33 = vcombine.high %v1151_v28, %v1155_v29  ;;  %v9988_v41 = vcombine.low %v1151_v28, %v1155_v29  ;;  %v440_v29 = vld [vmem:[%s11886_s14 + $0x190] sm:$0xff] }
 0x231   : > { %5304 = vmatpush1.bf16.msra.mxu0 %v9930_v34  ;;  %5550 = vmatpush1.bf16.msra.mxu1 %v9932_v35  ;;  %v392_v34 = vld [vmem:[%s11886_s14 + $0x10] sm:$0xff] }
 0x232   : > { %5305 = vmatprep.subr.bf16.mxu0 %v9939_v36  ;;  %5551 = vmatprep.subr.bf16.mxu1 %v9941_v37  ;;  %v396_v35 = vld [vmem:[%s11886_s14 + $0x30] sm:$0xff]  ;;  %v393_v36 = vld [vmem:[%s11886_s14 + $0x18] sm:$0xff] }
 0x233   : > { %v397_v37 = vld [vmem:[%s11886_s14 + $0x38] sm:$0xff]  ;;  %v9231_v42 = vcombine.high %v392_v34, %v396_v35  ;;  %v9230_v49 = vcombine.low %v392_v34, %v396_v35 }
 0x234   : > { %v9233_v43 = vcombine.high %v393_v36, %v397_v37  ;;  %v9232_v50 = vcombine.low %v393_v36, %v397_v37  ;;  %v448_v37 = vld [vmem:[%s11886_s14 + $0x1d0] sm:$0xff] }
 0x235   : > { %5306 = vmatpush1.bf16.msra.mxu0 %v9938_v44  ;;  %5552 = vmatpush1.bf16.msra.mxu1 %v9940_v45  ;;  %v400_v44 = vld [vmem:[%s11886_s14 + $0x50] sm:$0xff] }
 0x236   : > { %5307 = vmatprep.subr.bf16.mxu0 %v9947_v46  ;;  %5553 = vmatprep.subr.bf16.mxu1 %v9949_v47  ;;  %v404_v45 = vld [vmem:[%s11886_s14 + $0x70] sm:$0xff]  ;;  %v12381_v46 = vcombine.low %v12307_v19, %v12307_v19  ;;  %v401_v47 = vld [vmem:[%s11886_s14 + $0x58] sm:$0xff] }
 0x237   : > { %v9239_v51 = vcombine.high %v400_v44, %v404_v45  ;;  %v409_v19 = vld [vmem:[%s11886_s14 + $0x98] sm:$0xff]  ;;  %v9238_v60 = vcombine.low %v400_v44, %v404_v45  ;;  %v9240_v61 = vcombine.low %v401_v47, %v405_v48 }
 0x239   : > { %5308 = vmatpush1.bf16.msra.mxu0 %v9946_v52  ;;  %5554 = vmatpush1.bf16.msra.mxu1 %v9948_v54  ;;  %v9241_v52 = vcombine.high %v401_v47, %v405_v48  ;;  %v408_v54 = vld [vmem:[%s11886_s14 + $0x90] sm:$0xff] }
 0x23a   : > { %5309 = vmatprep.subr.bf16.mxu0 %v9955_v55  ;;  %5555 = vmatprep.subr.bf16.mxu1 %v9957_v56  ;;  %v412_v55 = vld [vmem:[%s11886_s14 + $0xb0] sm:$0xff]  ;;  %v413_v56 = vld [vmem:[%s11886_s14 + $0xb8] sm:$0xff] }
 0x23b   : > { %v9247_v62 = vcombine.high %v408_v54, %v412_v55  ;;  %v9249_v63 = vcombine.high %v409_v19, %v413_v56  ;;  %v9246_v4 = vcombine.low %v408_v54, %v412_v55  ;;  %v9248_v5 = vcombine.low %v409_v19, %v413_v56  ;;  %v456_v48 = vld [vmem:[%s11886_s14 + $0x210] sm:$0xff] }
 0x23c   : > { %v464_v56 = vld [vmem:[%s11886_s14 + $0x250] sm:$0xff] }
 0x23d   : > { %5310 = vmatpush1.bf16.msra.mxu0 %v9954_v0  ;;  %5556 = vmatpush1.bf16.msra.mxu1 %v9956_v1  ;;  %v416_v0 = vld [vmem:[%s11886_s14 + $0xd0] sm:$0xff] }
 0x23e   : > { %5311 = vmatprep.subr.bf16.mxu0 %v9963_v38  ;;  %5557 = vmatprep.subr.bf16.mxu1 %v9965_v3  ;;  %v420_v1 = vld [vmem:[%s11886_s14 + $0xf0] sm:$0xff]  ;;  %v417_v38 = vld [vmem:[%s11886_s14 + $0xd8] sm:$0xff] }
 0x23f   : > { %v421_v3 = vld [vmem:[%s11886_s14 + $0xf8] sm:$0xff]  ;;  %v9255_v6 = vcombine.high %v416_v0, %v420_v1  ;;  %v9254_v13 = vcombine.low %v416_v0, %v420_v1 }
 0x240   : > { %v9257_v7 = vcombine.high %v417_v38, %v421_v3 }
 0x241   : > { %5312 = vmatpush1.bf16.msra.mxu0 %v9962_v8  ;;  %5558 = vmatpush1.bf16.msra.mxu1 %v9964_v9  ;;  %v424_v8 = vld [vmem:[%s11886_s14 + $0x110] sm:$0xff] }
 0x242   : > { %5313 = vmatprep.subr.bf16.mxu0 %v9971_v10  ;;  %5559 = vmatprep.subr.bf16.mxu1 %v9973_v11  ;;  %v428_v9 = vld [vmem:[%s11886_s14 + $0x130] sm:$0xff]  ;;  %v425_v10 = vld [vmem:[%s11886_s14 + $0x118] sm:$0xff] }
 0x243   : > { %v429_v11 = vld [vmem:[%s11886_s14 + $0x138] sm:$0xff]  ;;  %v9263_v14 = vcombine.high %v424_v8, %v428_v9 }
 0x244   : > { %v9265_v17 = vcombine.high %v425_v10, %v429_v11  ;;  %v9264_v26 = vcombine.low %v425_v10, %v429_v11  ;;  %v480_v11 = vld [vmem:[%s11886_s14 + $0x2d0] sm:$0xff] }
 0x245   : > { %5314 = vmatpush1.bf16.msra.mxu0 %v9970_v20  ;;  %5560 = vmatpush1.bf16.msra.mxu1 %v9972_v21  ;;  %v436_v20 = vld [vmem:[%s11886_s14 + $0x170] sm:$0xff]  ;;  %v433_v21 = vld [vmem:[%s11886_s14 + $0x158] sm:$0xff] }
 0x246   : > { %5315 = vmatprep.subr.bf16.mxu0 %v9979_v22  ;;  %5561 = vmatprep.subr.bf16.mxu1 %v9981_v53  ;;  %v437_v22 = vld [vmem:[%s11886_s14 + $0x178] sm:$0xff]  ;;  %v9262_v53 = vcombine.low %v424_v8, %v428_v9  ;;  %v9271_v27 = vcombine.high %v432_v18, %v436_v20 }
 0x247   : > { %v9273_v28 = vcombine.high %v433_v21, %v437_v22  ;;  %v9272_v34 = vcombine.low %v433_v21, %v437_v22  ;;  %v488_v22 = vld [vmem:[%s11886_s14 + $0x310] sm:$0xff] }
 0x249   : > { %5316 = vmatpush1.bf16.msra.mxu0 %v9978_v30  ;;  %5562 = vmatpush1.bf16.msra.mxu1 %v9980_v31  ;;  %v444_v30 = vld [vmem:[%s11886_s14 + $0x1b0] sm:$0xff]  ;;  %v441_v31 = vld [vmem:[%s11886_s14 + $0x198] sm:$0xff] }
 0x24a   : > { %5317 = vmatprep.subr.bf16.mxu0 %v9987_v32  ;;  %5563 = vmatprep.subr.bf16.mxu1 %v9989_v33  ;;  %v445_v32 = vld [vmem:[%s11886_s14 + $0x1b8] sm:$0xff]  ;;  %v9270_v33 = vcombine.low %v432_v18, %v436_v20  ;;  %v9279_v35 = vcombine.high %v440_v29, %v444_v30 }
 0x24b   : > { %v9281_v36 = vcombine.high %v441_v31, %v445_v32  ;;  %v9280_v44 = vcombine.low %v441_v31, %v445_v32  ;;  %v496_v32 = vld [vmem:[%s11886_s14 + $0x350] sm:$0xff] }
 0x24d   : > { %5318 = vmatpush1.bf16.msra.mxu0 %v9986_v40  ;;  %5564 = vmatpush1.bf16.msra.mxu1 %v9988_v41  ;;  %v452_v40 = vld [vmem:[%s11886_s14 + $0x1f0] sm:$0xff]  ;;  %v449_v41 = vld [vmem:[%s11886_s14 + $0x1d8] sm:$0xff] }
 0x24e   : > { %5574 = vmatprep.subr.bf16.mxu0 %v9231_v42  ;;  %5820 = vmatprep.subr.bf16.mxu1 %v9233_v43  ;;  %v453_v42 = vld [vmem:[%s11886_s14 + $0x1f8] sm:$0xff]  ;;  %v9278_v43 = vcombine.low %v440_v29, %v444_v30  ;;  %v9287_v45 = vcombine.high %v448_v37, %v452_v40 }
 0x24f   : > { %v9289_v47 = vcombine.high %v449_v41, %v453_v42  ;;  %v9288_v54 = vcombine.low %v449_v41, %v453_v42  ;;  %v504_v42 = vld [vmem:[%s11886_s14 + $0x390] sm:$0xff] }
 0x250   : > { %5320 = vmatmul.mubr.bf16.vlgmr.msra.gmra.mrb[0].mxu0 %v12381_v46  ;;  %5566 = vmatmul.mubr.bf16.vlgmr.msra.gmra.mrb[0].mxu1 %v12381_v46 }
 0x251   : > { %5575 = vmatpush1.bf16.msra.mxu0 %v9230_v49  ;;  %5821 = vmatpush1.bf16.msra.mxu1 %v9232_v50  ;;  %v460_v49 = vld [vmem:[%s11886_s14 + $0x230] sm:$0xff]  ;;  %v457_v50 = vld [vmem:[%s11886_s14 + $0x218] sm:$0xff] }
 0x252   : > { %5576 = vmatprep.subr.bf16.mxu0 %v9239_v51  ;;  %5822 = vmatprep.subr.bf16.mxu1 %v9241_v52  ;;  %v461_v51 = vld [vmem:[%s11886_s14 + $0x238] sm:$0xff]  ;;  %v9286_v52 = vcombine.low %v448_v37, %v452_v40  ;;  %v9295_v55 = vcombine.high %v456_v48, %v460_v49 }
 0x253   : > { %5606 = vmatprep.mubr.bf16.mxu0 %v11940_v57  ;;  %5852 = vmatprep.mubr.bf16.mxu1 %v11940_v57  ;;  %v9256_v57 = vcombine.low %v417_v38, %v421_v3  ;;  %v9297_v19 = vcombine.high %v457_v50, %v461_v51  ;;  %v9296_v0 = vcombine.low %v457_v50, %v461_v51  ;;  %v472_v3 = vld [vmem:[%s11886_s14 + $0x290] sm:$0xff] }
 0x254   : > { %v512_v51 = vld [vmem:[%s11886_s14 + $0x3d0] sm:$0xff] }
 0x255   : > { %5577 = vmatpush1.bf16.msra.mxu0 %v9238_v60  ;;  %5823 = vmatpush1.bf16.msra.mxu1 %v9240_v61  ;;  %v468_v60 = vld [vmem:[%s11886_s14 + $0x270] sm:$0xff]  ;;  %v465_v61 = vld [vmem:[%s11886_s14 + $0x258] sm:$0xff] }
 0x256   : > { %5578 = vmatprep.subr.bf16.mxu0 %v9247_v62  ;;  %5824 = vmatprep.subr.bf16.mxu1 %v9249_v63  ;;  %v469_v62 = vld [vmem:[%s11886_s14 + $0x278] sm:$0xff]  ;;  %v9294_v63 = vcombine.low %v456_v48, %v460_v49  ;;  %v9303_v1 = vcombine.high %v464_v56, %v468_v60 }
 0x257   : > { %v9305_v38 = vcombine.high %v465_v61, %v469_v62  ;;  %v9304_v8 = vcombine.low %v465_v61, %v469_v62  ;;  %v520_v62 = vld [vmem:[%s11886_s14 + $0x410] sm:$0xff] }
 0x259   : > { %5579 = vmatpush1.bf16.msra.mxu0 %v9246_v4  ;;  %5825 = vmatpush1.bf16.msra.mxu1 %v9248_v5  ;;  %v476_v4 = vld [vmem:[%s11886_s14 + $0x2b0] sm:$0xff]  ;;  %v473_v5 = vld [vmem:[%s11886_s14 + $0x298] sm:$0xff] }
 0x25a   : > { %5580 = vmatprep.subr.bf16.mxu0 %v9255_v6  ;;  %5826 = vmatprep.subr.bf16.mxu1 %v9257_v7  ;;  %v477_v6 = vld [vmem:[%s11886_s14 + $0x2b8] sm:$0xff]  ;;  %v9302_v7 = vcombine.low %v464_v56, %v468_v60  ;;  %v9311_v9 = vcombine.high %v472_v3, %v476_v4 }
 0x25b   : > { %v9313_v10 = vcombine.high %v473_v5, %v477_v6  ;;  %v9312_v18 = vcombine.low %v473_v5, %v477_v6  ;;  %v528_v6 = vld [vmem:[%s11886_s14 + $0x450] sm:$0xff] }
 0x25d   : > { %5581 = vmatpush1.bf16.msra.mxu0 %v9254_v13  ;;  %5827 = vmatpush1.bf16.msra.mxu1 %v9256_v57  ;;  %v484_v13 = vld [vmem:[%s11886_s14 + $0x2f0] sm:$0xff]  ;;  %v481_v57 = vld [vmem:[%s11886_s14 + $0x2d8] sm:$0xff] }
 0x25e   : > { %5582 = vmatprep.subr.bf16.mxu0 %v9263_v14  ;;  %5828 = vmatprep.subr.bf16.mxu1 %v9265_v17  ;;  %v485_v14 = vld [vmem:[%s11886_s14 + $0x2f8] sm:$0xff]  ;;  %v9310_v17 = vcombine.low %v472_v3, %v476_v4  ;;  %v9319_v20 = vcombine.high %v480_v11, %v484_v13 }
 0x25f   : > { %v9321_v21 = vcombine.high %v481_v57, %v485_v14  ;;  %v9320_v29 = vcombine.low %v481_v57, %v485_v14  ;;  %v536_v14 = vld [vmem:[%s11886_s14 + $0x490] sm:$0xff] }
 0x261   : > { %5583 = vmatpush1.bf16.msra.mxu0 %v9262_v53  ;;  %5829 = vmatpush1.bf16.msra.mxu1 %v9264_v26  ;;  %v492_v53 = vld [vmem:[%s11886_s14 + $0x330] sm:$0xff]  ;;  %v489_v26 = vld [vmem:[%s11886_s14 + $0x318] sm:$0xff] }
 0x262   : > { %5584 = vmatprep.subr.bf16.mxu0 %v9271_v27  ;;  %5830 = vmatprep.subr.bf16.mxu1 %v9273_v28  ;;  %v493_v27 = vld [vmem:[%s11886_s14 + $0x338] sm:$0xff]  ;;  %v9318_v28 = vcombine.low %v480_v11, %v484_v13  ;;  %v9327_v30 = vcombine.high %v488_v22, %v492_v53 }
 0x263   : > { %v9329_v31 = vcombine.high %v489_v26, %v493_v27  ;;  %v9328_v37 = vcombine.low %v489_v26, %v493_v27  ;;  %v544_v27 = vld [vmem:[%s11886_s14 + $0x4d0] sm:$0xff] }
 0x265   : > { %5585 = vmatpush1.bf16.msra.mxu0 %v9270_v33  ;;  %5831 = vmatpush1.bf16.msra.mxu1 %v9272_v34  ;;  %v500_v33 = vld [vmem:[%s11886_s14 + $0x370] sm:$0xff]  ;;  %v497_v34 = vld [vmem:[%s11886_s14 + $0x358] sm:$0xff] }
 0x266   : > { %5586 = vmatprep.subr.bf16.mxu0 %v9279_v35  ;;  %5832 = vmatprep.subr.bf16.mxu1 %v9281_v36  ;;  %v501_v35 = vld [vmem:[%s11886_s14 + $0x378] sm:$0xff]  ;;  %v9326_v36 = vcombine.low %v488_v22, %v492_v53  ;;  %v9335_v40 = vcombine.high %v496_v32, %v500_v33 }
 0x267   : > { %v9337_v41 = vcombine.high %v497_v34, %v501_v35  ;;  %v9336_v48 = vcombine.low %v497_v34, %v501_v35  ;;  %v552_v34 = vld [vmem:[%s11886_s14 + $0x510] sm:$0xff] }
 0x268   : > { %v556_v35 = vld [vmem:[%s11886_s14 + $0x530] sm:$0xff] }
 0x269   : > { %5587 = vmatpush1.bf16.msra.mxu0 %v9278_v43  ;;  %5833 = vmatpush1.bf16.msra.mxu1 %v9280_v44  ;;  %v508_v43 = vld [vmem:[%s11886_s14 + $0x3b0] sm:$0xff]  ;;  %v505_v44 = vld [vmem:[%s11886_s14 + $0x398] sm:$0xff] }
 0x26a   : > { %5588 = vmatprep.subr.bf16.mxu0 %v9287_v45  ;;  %5834 = vmatprep.subr.bf16.mxu1 %v9289_v47  ;;  %v509_v45 = vld [vmem:[%s11886_s14 + $0x3b8] sm:$0xff]  ;;  %v9334_v47 = vcombine.low %v496_v32, %v500_v33  ;;  %v9343_v49 = vcombine.high %v504_v42, %v508_v43 }
 0x26b   : > { %v9345_v50 = vcombine.high %v505_v44, %v509_v45  ;;  %v9344_v56 = vcombine.low %v505_v44, %v509_v45  ;;  %v564_v44 = vld [vmem:[%s11886_s14 + $0x570] sm:$0xff]  ;;  %v561_v45 = vld [vmem:[%s11886_s14 + $0x558] sm:$0xff] }
 0x26d   : > { %5589 = vmatpush1.bf16.msra.mxu0 %v9286_v52  ;;  %5835 = vmatpush1.bf16.msra.mxu1 %v9288_v54  ;;  %v516_v52 = vld [vmem:[%s11886_s14 + $0x3f0] sm:$0xff]  ;;  %v513_v54 = vld [vmem:[%s11886_s14 + $0x3d8] sm:$0xff] }
 0x26e   : > { %5590 = vmatprep.subr.bf16.mxu0 %v9295_v55  ;;  %5836 = vmatprep.subr.bf16.mxu1 %v9297_v19  ;;  %v517_v55 = vld [vmem:[%s11886_s14 + $0x3f8] sm:$0xff]  ;;  %v9342_v19 = vcombine.low %v504_v42, %v508_v43  ;;  %v9351_v60 = vcombine.high %v512_v51, %v516_v52  ;;  %v560_v43 = vld [vmem:[%s11886_s14 + $0x550] sm:$0xff] }
 0x26f   : > { %v9353_v61 = vcombine.high %v513_v54, %v517_v55  ;;  %v9352_v3 = vcombine.low %v513_v54, %v517_v55  ;;  %v572_v54 = vld [vmem:[%s11886_s14 + $0x5b0] sm:$0xff]  ;;  %v569_v55 = vld [vmem:[%s11886_s14 + $0x598] sm:$0xff] }
 0x271   : > { %5591 = vmatpush1.bf16.msra.mxu0 %v9294_v63  ;;  %5837 = vmatpush1.bf16.msra.mxu1 %v9296_v0  ;;  %v524_v63 = vld [vmem:[%s11886_s14 + $0x430] sm:$0xff]  ;;  %v521_v0 = vld [vmem:[%s11886_s14 + $0x418] sm:$0xff] }
 0x272   : > { %5592 = vmatprep.subr.bf16.mxu0 %v9303_v1  ;;  %5838 = vmatprep.subr.bf16.mxu1 %v9305_v38  ;;  %v525_v1 = vld [vmem:[%s11886_s14 + $0x438] sm:$0xff]  ;;  %v9350_v38 = vcombine.low %v512_v51, %v516_v52  ;;  %v9359_v4 = vcombine.high %v520_v62, %v524_v63  ;;  %v568_v52 = vld [vmem:[%s11886_s14 + $0x590] sm:$0xff] }
 0x273   : > { %v9361_v5 = vcombine.high %v521_v0, %v525_v1  ;;  %v9360_v11 = vcombine.low %v521_v0, %v525_v1  ;;  %v580_v0 = vld [vmem:[%s11886_s14 + $0x5f0] sm:$0xff]  ;;  %v577_v1 = vld [vmem:[%s11886_s14 + $0x5d8] sm:$0xff] }
 0x275   : > { %5593 = vmatpush1.bf16.msra.mxu0 %v9302_v7  ;;  %5839 = vmatpush1.bf16.msra.mxu1 %v9304_v8  ;;  %v532_v7 = vld [vmem:[%s11886_s14 + $0x470] sm:$0xff]  ;;  %v529_v8 = vld [vmem:[%s11886_s14 + $0x458] sm:$0xff] }
 0x276   : > { %5594 = vmatprep.subr.bf16.mxu0 %v9311_v9  ;;  %5840 = vmatprep.subr.bf16.mxu1 %v9313_v10  ;;  %v533_v9 = vld [vmem:[%s11886_s14 + $0x478] sm:$0xff]  ;;  %v9358_v10 = vcombine.low %v520_v62, %v524_v63  ;;  %v9367_v13 = vcombine.high %v528_v6, %v532_v7  ;;  %v576_v63 = vld [vmem:[%s11886_s14 + $0x5d0] sm:$0xff] }
 0x277   : > { %v9369_v57 = vcombine.high %v529_v8, %v533_v9  ;;  %v9368_v22 = vcombine.low %v529_v8, %v533_v9  ;;  %v588_v8 = vld [vmem:[%s11886_s14 + $0x630] sm:$0xff]  ;;  %v585_v9 = vld [vmem:[%s11886_s14 + $0x618] sm:$0xff] }
 0x279   : > { %5595 = vmatpush1.bf16.msra.mxu0 %v9310_v17  ;;  %5841 = vmatpush1.bf16.msra.mxu1 %v9312_v18  ;;  %v540_v17 = vld [vmem:[%s11886_s14 + $0x4b0] sm:$0xff]  ;;  %v537_v18 = vld [vmem:[%s11886_s14 + $0x498] sm:$0xff] }
 0x27a   : > { %5596 = vmatprep.subr.bf16.mxu0 %v9319_v20  ;;  %5842 = vmatprep.subr.bf16.mxu1 %v9321_v21  ;;  %v541_v20 = vld [vmem:[%s11886_s14 + $0x4b8] sm:$0xff]  ;;  %v9366_v21 = vcombine.low %v528_v6, %v532_v7  ;;  %v9375_v53 = vcombine.high %v536_v14, %v540_v17  ;;  %v584_v7 = vld [vmem:[%s11886_s14 + $0x610] sm:$0xff] }
 0x27b   : > { %v9377_v26 = vcombine.high %v537_v18, %v541_v20 }
 0x27d   : > { %5597 = vmatpush1.bf16.msra.mxu0 %v9318_v28  ;;  %5843 = vmatpush1.bf16.msra.mxu1 %v9320_v29  ;;  %v548_v28 = vld [vmem:[%s11886_s14 + $0x4f0] sm:$0xff]  ;;  %v545_v29 = vld [vmem:[%s11886_s14 + $0x4d8] sm:$0xff] }
 0x27e   : > { %5598 = vmatprep.subr.bf16.mxu0 %v9327_v30  ;;  %5844 = vmatprep.subr.bf16.mxu1 %v9329_v31  ;;  %v549_v30 = vld [vmem:[%s11886_s14 + $0x4f8] sm:$0xff]  ;;  %v9376_v31 = vcombine.low %v537_v18, %v541_v20  ;;  %v9383_v32 = vcombine.high %v544_v27, %v548_v28  ;;  %v596_v18 = vld [vmem:[%s11886_s14 + $0x670] sm:$0xff] }
 0x27f   : > { %v9385_v33 = vcombine.high %v545_v29, %v549_v30  ;;  %v593_v20 = vld [vmem:[%s11886_s14 + $0x658] sm:$0xff] }
 0x281   : > { %5599 = vmatpush1.bf16.msra.mxu0 %v9326_v36  ;;  %5845 = vmatpush1.bf16.msra.mxu1 %v9328_v37  ;;  %v553_v36 = vld [vmem:[%s11886_s14 + $0x518] sm:$0xff] }
 0x282   : > { %5600 = vmatprep.subr.bf16.mxu0 %v9335_v40  ;;  %5846 = vmatprep.subr.bf16.mxu1 %v9337_v41  ;;  %v557_v37 = vld [vmem:[%s11886_s14 + $0x538] sm:$0xff]  ;;  %v9382_v40 = vcombine.low %v544_v27, %v548_v28  ;;  %v9391_v41 = vcombine.high %v552_v34, %v556_v35  ;;  %v600_v28 = vld [vmem:[%s11886_s14 + $0x690] sm:$0xff] }
 0x283   : > { %v9393_v42 = vcombine.high %v553_v36, %v557_v37 }
 0x285   : > { %5601 = vmatpush1.bf16.msra.mxu0 %v9334_v47  ;;  %5847 = vmatpush1.bf16.msra.mxu1 %v9336_v48  ;;  %v565_v47 = vld [vmem:[%s11886_s14 + $0x578] sm:$0xff]  ;;  %v9390_v48 = vcombine.low %v552_v34, %v556_v35  ;;  %v608_v35 = vld [vmem:[%s11886_s14 + $0x6d0] sm:$0xff] }
 0x286   : > { %5602 = vmatprep.subr.bf16.mxu0 %v9343_v49  ;;  %5848 = vmatprep.subr.bf16.mxu1 %v9345_v50  ;;  %v9392_v49 = vcombine.low %v553_v36, %v557_v37  ;;  %v9399_v50 = vcombine.high %v560_v43, %v564_v44  ;;  %v9401_v51 = vcombine.high %v561_v45, %v565_v47  ;;  %v612_v36 = vld [vmem:[%s11886_s14 + $0x6f0] sm:$0xff]  ;;  %v609_v37 = vld [vmem:[%s11886_s14 + $0x6d8] sm:$0xff] }
 0x289   : > { %5603 = vmatpush1.bf16.msra.mxu0 %v9342_v19  ;;  %5849 = vmatpush1.bf16.msra.mxu1 %v9344_v56  ;;  %v573_v19 = vld [vmem:[%s11886_s14 + $0x5b8] sm:$0xff]  ;;  %v9398_v56 = vcombine.low %v560_v43, %v564_v44  ;;  %v616_v44 = vld [vmem:[%s11886_s14 + $0x710] sm:$0xff] }
 0x28a   : > { %5604 = vmatprep.subr.bf16.mxu0 %v9351_v60  ;;  %5850 = vmatprep.subr.bf16.mxu1 %v9353_v61  ;;  %v9400_v60 = vcombine.low %v561_v45, %v565_v47  ;;  %v9407_v61 = vcombine.high %v568_v52, %v572_v54  ;;  %v9409_v62 = vcombine.high %v569_v55, %v573_v19  ;;  %v620_v45 = vld [vmem:[%s11886_s14 + $0x730] sm:$0xff]  ;;  %v617_v47 = vld [vmem:[%s11886_s14 + $0x718] sm:$0xff] }
 0x28d   : > { %5605 = vmatpush1.bf16.msra.mxu0 %v9350_v38  ;;  %5851 = vmatpush1.bf16.msra.mxu1 %v9352_v3  ;;  %v581_v38 = vld [vmem:[%s11886_s14 + $0x5f8] sm:$0xff]  ;;  %v9406_v3 = vcombine.low %v568_v52, %v572_v54  ;;  %v624_v54 = vld [vmem:[%s11886_s14 + $0x750] sm:$0xff] }
 0x28e   : > { %5615 = vmatprep.subr.bf16.mxu0 %v9359_v4  ;;  %5861 = vmatprep.subr.bf16.mxu1 %v9361_v5  ;;  %v9408_v4 = vcombine.low %v569_v55, %v573_v19  ;;  %v9415_v5 = vcombine.high %v576_v63, %v580_v0  ;;  %v9417_v6 = vcombine.high %v577_v1, %v581_v38  ;;  %v628_v55 = vld [vmem:[%s11886_s14 + $0x770] sm:$0xff]  ;;  %v625_v19 = vld [vmem:[%s11886_s14 + $0x758] sm:$0xff] }
 0x290   : > { %5607 = vmatmul.mubr.bf16.vlgmr.msra.gmra.mrb[4].mxu0 %v11986_v12  ;;  %5853 = vmatmul.mubr.bf16.vlgmr.msra.gmra.mrb[4].mxu1 %v11986_v12  ;;  %v9374_v12 = vcombine.low %v536_v14, %v540_v17  ;;  %v592_v17 = vld [vmem:[%s11886_s14 + $0x650] sm:$0xff] }
 0x291   : > { %5616 = vmatpush1.bf16.msra.mxu0 %v9358_v10  ;;  %5862 = vmatpush1.bf16.msra.mxu1 %v9360_v11  ;;  %v589_v10 = vld [vmem:[%s11886_s14 + $0x638] sm:$0xff]  ;;  %v9414_v11 = vcombine.low %v576_v63, %v580_v0  ;;  %v632_v0 = vld [vmem:[%s11886_s14 + $0x790] sm:$0xff] }
 0x292   : > { %5617 = vmatprep.subr.bf16.mxu0 %v9367_v13  ;;  %5863 = vmatprep.subr.bf16.mxu1 %v9369_v57  ;;  %v9416_v13 = vcombine.low %v577_v1, %v581_v38  ;;  %v9423_v57 = vcombine.high %v584_v7, %v588_v8  ;;  %v9425_v14 = vcombine.high %v585_v9, %v589_v10  ;;  %v636_v1 = vld [vmem:[%s11886_s14 + $0x7b0] sm:$0xff]  ;;  %v633_v38 = vld [vmem:[%s11886_s14 + $0x798] sm:$0xff] }
 0x293   : > { %5647 = vmatprep.mubr.bf16.mxu0 %v11999_v23  ;;  %5893 = vmatprep.mubr.bf16.mxu1 %v11999_v23  ;;  %v9384_v23 = vcombine.low %v545_v29, %v549_v30  ;;  %v604_v29 = vld [vmem:[%s11886_s14 + $0x6b0] sm:$0xff]  ;;  %v601_v30 = vld [vmem:[%s11886_s14 + $0x698] sm:$0xff] }
 0x295   : > { %5618 = vmatpush1.bf16.msra.mxu0 %v9366_v21  ;;  %5864 = vmatpush1.bf16.msra.mxu1 %v9368_v22  ;;  %v597_v21 = vld [vmem:[%s11886_s14 + $0x678] sm:$0xff]  ;;  %v9422_v22 = vcombine.low %v584_v7, %v588_v8  ;;  %v640_v8 = vld [vmem:[%s11886_s14 + $0x7d0] sm:$0xff] }
 0x296   : > { %5619 = vmatprep.subr.bf16.mxu0 %v9375_v53  ;;  %5865 = vmatprep.subr.bf16.mxu1 %v9377_v26  ;;  %v9424_v53 = vcombine.low %v585_v9, %v589_v10  ;;  %v9431_v26 = vcombine.high %v592_v17, %v596_v18  ;;  %v9433_v27 = vcombine.high %v593_v20, %v597_v21  ;;  %v644_v9 = vld [vmem:[%s11886_s14 + $0x7f0] sm:$0xff]  ;;  %v641_v10 = vld [vmem:[%s11886_s14 + $0x7d8] sm:$0xff] }
 0x299   : > { %5620 = vmatpush1.bf16.msra.mxu0 %v9374_v12  ;;  %5866 = vmatpush1.bf16.msra.mxu1 %v9376_v31  ;;  %v605_v12 = vld [vmem:[%s11886_s14 + $0x6b8] sm:$0xff]  ;;  %v9430_v31 = vcombine.low %v592_v17, %v596_v18  ;;  %v648_v18 = vld [vmem:[%s11886_s14 + $0x810] sm:$0xff] }
 0x29a   : > { %5621 = vmatprep.subr.bf16.mxu0 %v9383_v32  ;;  %5867 = vmatprep.subr.bf16.mxu1 %v9385_v33  ;;  %v9432_v32 = vcombine.low %v593_v20, %v597_v21  ;;  %v9439_v33 = vcombine.high %v600_v28, %v604_v29  ;;  %v9441_v34 = vcombine.high %v601_v30, %v605_v12  ;;  %v652_v20 = vld [vmem:[%s11886_s14 + $0x830] sm:$0xff]  ;;  %v649_v21 = vld [vmem:[%s11886_s14 + $0x818] sm:$0xff] }
 0x29d   : > { %5622 = vmatpush1.bf16.msra.mxu0 %v9382_v40  ;;  %5868 = vmatpush1.bf16.msra.mxu1 %v9384_v23  ;;  %v613_v40 = vld [vmem:[%s11886_s14 + $0x6f8] sm:$0xff]  ;;  %v9438_v23 = vcombine.low %v600_v28, %v604_v29  ;;  %v656_v29 = vld [vmem:[%s11886_s14 + $0x850] sm:$0xff] }
 0x29e   : > { %5623 = vmatprep.subr.bf16.mxu0 %v9391_v41  ;;  %5869 = vmatprep.subr.bf16.mxu1 %v9393_v42  ;;  %v9440_v41 = vcombine.low %v601_v30, %v605_v12  ;;  %v9447_v42 = vcombine.high %v608_v35, %v612_v36  ;;  %v9449_v43 = vcombine.high %v609_v37, %v613_v40  ;;  %v660_v30 = vld [vmem:[%s11886_s14 + $0x870] sm:$0xff]  ;;  %v657_v12 = vld [vmem:[%s11886_s14 + $0x858] sm:$0xff] }
 0x2a1   : > { %5624 = vmatpush1.bf16.msra.mxu0 %v9390_v48  ;;  %5870 = vmatpush1.bf16.msra.mxu1 %v9392_v49  ;;  %v621_v48 = vld [vmem:[%s11886_s14 + $0x738] sm:$0xff]  ;;  %v9446_v49 = vcombine.low %v608_v35, %v612_v36  ;;  %v664_v36 = vld [vmem:[%s11886_s14 + $0x890] sm:$0xff] }
 0x2a2   : > { %5625 = vmatprep.subr.bf16.mxu0 %v9399_v50  ;;  %5871 = vmatprep.subr.bf16.mxu1 %v9401_v51  ;;  %v9448_v50 = vcombine.low %v609_v37, %v613_v40  ;;  %v9455_v51 = vcombine.high %v616_v44, %v620_v45  ;;  %v9457_v52 = vcombine.high %v617_v47, %v621_v48  ;;  %v668_v37 = vld [vmem:[%s11886_s14 + $0x8b0] sm:$0xff]  ;;  %v665_v40 = vld [vmem:[%s11886_s14 + $0x898] sm:$0xff] }
 0x2a5   : > { %5626 = vmatpush1.bf16.msra.mxu0 %v9398_v56  ;;  %5872 = vmatpush1.bf16.msra.mxu1 %v9400_v60  ;;  %v629_v56 = vld [vmem:[%s11886_s14 + $0x778] sm:$0xff]  ;;  %v9454_v60 = vcombine.low %v616_v44, %v620_v45  ;;  %v672_v45 = vld [vmem:[%s11886_s14 + $0x8d0] sm:$0xff] }
 0x2a6   : > { %5627 = vmatprep.subr.bf16.mxu0 %v9407_v61  ;;  %5873 = vmatprep.subr.bf16.mxu1 %v9409_v62  ;;  %v9456_v61 = vcombine.low %v617_v47, %v621_v48  ;;  %v9463_v62 = vcombine.high %v624_v54, %v628_v55  ;;  %v9465_v63 = vcombine.high %v625_v19, %v629_v56  ;;  %v676_v47 = vld [vmem:[%s11886_s14 + $0x8f0] sm:$0xff]  ;;  %v673_v48 = vld [vmem:[%s11886_s14 + $0x8d8] sm:$0xff] }
 0x2a9   : > { %5628 = vmatpush1.bf16.msra.mxu0 %v9406_v3  ;;  %5874 = vmatpush1.bf16.msra.mxu1 %v9408_v4  ;;  %v637_v3 = vld [vmem:[%s11886_s14 + $0x7b8] sm:$0xff]  ;;  %v9462_v4 = vcombine.low %v624_v54, %v628_v55  ;;  %v680_v54 = vld [vmem:[%s11886_s14 + $0x910] sm:$0xff] }
 0x2aa   : > { %5629 = vmatprep.subr.bf16.mxu0 %v9415_v5  ;;  %5875 = vmatprep.subr.bf16.mxu1 %v9417_v6  ;;  %v9464_v5 = vcombine.low %v625_v19, %v629_v56  ;;  %v9471_v6 = vcombine.high %v632_v0, %v636_v1  ;;  %v9473_v7 = vcombine.high %v633_v38, %v637_v3  ;;  %v684_v55 = vld [vmem:[%s11886_s14 + $0x930] sm:$0xff]  ;;  %v681_v19 = vld [vmem:[%s11886_s14 + $0x918] sm:$0xff] }
 0x2ab   : > { %v685_v56 = vld [vmem:[%s11886_s14 + $0x938] sm:$0xff] }
 0x2ad   : > { %5630 = vmatpush1.bf16.msra.mxu0 %v9414_v11  ;;  %5876 = vmatpush1.bf16.msra.mxu1 %v9416_v13  ;;  %v645_v11 = vld [vmem:[%s11886_s14 + $0x7f8] sm:$0xff]  ;;  %v9470_v13 = vcombine.low %v632_v0, %v636_v1  ;;  %v692_v0 = vld [vmem:[%s11886_s14 + $0x970] sm:$0xff] }
 0x2ae   : > { %5631 = vmatprep.subr.bf16.mxu0 %v9423_v57  ;;  %5877 = vmatprep.subr.bf16.mxu1 %v9425_v14  ;;  %v9472_v57 = vcombine.low %v633_v38, %v637_v3  ;;  %v9479_v14 = vcombine.high %v640_v8, %v644_v9  ;;  %v9481_v17 = vcombine.high %v641_v10, %v645_v11  ;;  %v689_v1 = vld [vmem:[%s11886_s14 + $0x958] sm:$0xff] }
 0x2af   : > { %v693_v38 = vld [vmem:[%s11886_s14 + $0x978] sm:$0xff]  ;;  %v9518_v3 = vcombine.low %v680_v54, %v684_v55 }
 0x2b1   : > { %5632 = vmatpush1.bf16.msra.mxu0 %v9422_v22  ;;  %5878 = vmatpush1.bf16.msra.mxu1 %v9424_v53  ;;  %v653_v22 = vld [vmem:[%s11886_s14 + $0x838] sm:$0xff]  ;;  %v9478_v53 = vcombine.low %v640_v8, %v644_v9  ;;  %v700_v8 = vld [vmem:[%s11886_s14 + $0x9b0] sm:$0xff] }
 0x2b2   : > { %5633 = vmatprep.subr.bf16.mxu0 %v9431_v26  ;;  %5879 = vmatprep.subr.bf16.mxu1 %v9433_v27  ;;  %v9480_v26 = vcombine.low %v641_v10, %v645_v11  ;;  %v9487_v27 = vcombine.high %v648_v18, %v652_v20  ;;  %v9489_v28 = vcombine.high %v649_v21, %v653_v22  ;;  %v697_v9 = vld [vmem:[%s11886_s14 + $0x998] sm:$0xff] }
 0x2b3   : > { %v701_v10 = vld [vmem:[%s11886_s14 + $0x9b8] sm:$0xff] }
 0x2b5   : > { %5634 = vmatpush1.bf16.msra.mxu0 %v9430_v31  ;;  %5880 = vmatpush1.bf16.msra.mxu1 %v9432_v32  ;;  %v661_v31 = vld [vmem:[%s11886_s14 + $0x878] sm:$0xff]  ;;  %v9486_v32 = vcombine.low %v648_v18, %v652_v20  ;;  %v708_v18 = vld [vmem:[%s11886_s14 + $0x9f0] sm:$0xff] }
 0x2b6   : > { %5635 = vmatprep.subr.bf16.mxu0 %v9439_v33  ;;  %5881 = vmatprep.subr.bf16.mxu1 %v9441_v34  ;;  %v9488_v33 = vcombine.low %v649_v21, %v653_v22  ;;  %v9495_v34 = vcombine.high %v656_v29, %v660_v30  ;;  %v9497_v35 = vcombine.high %v657_v12, %v661_v31  ;;  %v705_v20 = vld [vmem:[%s11886_s14 + $0x9d8] sm:$0xff] }
 0x2b7   : > { %v709_v21 = vld [vmem:[%s11886_s14 + $0x9f8] sm:$0xff] }
 0x2b9   : > { %5636 = vmatpush1.bf16.msra.mxu0 %v9438_v23  ;;  %5882 = vmatpush1.bf16.msra.mxu1 %v9440_v41  ;;  %v669_v23 = vld [vmem:[%s11886_s14 + $0x8b8] sm:$0xff]  ;;  %v9494_v41 = vcombine.low %v656_v29, %v660_v30  ;;  %v716_v29 = vld [vmem:[%s11886_s14 + $0xa30] sm:$0xff] }
 0x2ba   : > { %5637 = vmatprep.subr.bf16.mxu0 %v9447_v42  ;;  %5883 = vmatprep.subr.bf16.mxu1 %v9449_v43  ;;  %v9496_v42 = vcombine.low %v657_v12, %v661_v31  ;;  %v9503_v43 = vcombine.high %v664_v36, %v668_v37  ;;  %v9505_v44 = vcombine.high %v665_v40, %v669_v23  ;;  %v713_v30 = vld [vmem:[%s11886_s14 + $0xa18] sm:$0xff] }
 0x2bb   : > { %v717_v12 = vld [vmem:[%s11886_s14 + $0xa38] sm:$0xff] }
 0x2bd   : > { %5638 = vmatpush1.bf16.msra.mxu0 %v9446_v49  ;;  %5884 = vmatpush1.bf16.msra.mxu1 %v9448_v50  ;;  %v677_v49 = vld [vmem:[%s11886_s14 + $0x8f8] sm:$0xff]  ;;  %v9504_v50 = vcombine.low %v665_v40, %v669_v23 }
 0x2be   : > { %5639 = vmatprep.subr.bf16.mxu0 %v9455_v51  ;;  %5885 = vmatprep.subr.bf16.mxu1 %v9457_v52  ;;  %v9511_v51 = vcombine.high %v672_v45, %v676_v47  ;;  %v9513_v52 = vcombine.high %v673_v48, %v677_v49  ;;  %v725_v40 = vld [vmem:[%s11886_s14 + $0xa78] sm:$0xff] }
 0x2c1   : > { %5640 = vmatpush1.bf16.msra.mxu0 %v9454_v60  ;;  %5886 = vmatpush1.bf16.msra.mxu1 %v9456_v61  ;;  %v9510_v60 = vcombine.low %v672_v45, %v676_v47  ;;  %v9519_v61 = vcombine.high %v680_v54, %v684_v55  ;;  %v732_v45 = vld [vmem:[%s11886_s14 + $0xab0] sm:$0xff]  ;;  %v729_v47 = vld [vmem:[%s11886_s14 + $0xa98] sm:$0xff] }
 0x2c2   : > { %5641 = vmatprep.subr.bf16.mxu0 %v9463_v62  ;;  %5887 = vmatprep.subr.bf16.mxu1 %v9465_v63  ;;  %v9521_v62 = vcombine.high %v681_v19, %v685_v56  ;;  %v688_v63 = vld [vmem:[%s11886_s14 + $0x950] sm:$0xff]  ;;  %v737_v55 = vld [vmem:[%s11886_s14 + $0xad8] sm:$0xff] }
 0x2c3   : > { %v9526_v11 = vcombine.low %v688_v63, %v692_v0  ;;  %v740_v54 = vld [vmem:[%s11886_s14 + $0xaf0] sm:$0xff] }
 0x2c5   : > { %5642 = vmatpush1.bf16.msra.mxu0 %v9462_v4  ;;  %5888 = vmatpush1.bf16.msra.mxu1 %v9464_v5  ;;  %v9520_v4 = vcombine.low %v681_v19, %v685_v56  ;;  %v9527_v5 = vcombine.high %v688_v63, %v692_v0  ;;  %v741_v19 = vld [vmem:[%s11886_s14 + $0xaf8] sm:$0xff]  ;;  %v748_v63 = vld [vmem:[%s11886_s14 + $0xb30] sm:$0xff] }
 0x2c6   : > { %5643 = vmatprep.subr.bf16.mxu0 %v9471_v6  ;;  %5889 = vmatprep.subr.bf16.mxu1 %v9473_v7  ;;  %v9529_v6 = vcombine.high %v689_v1, %v693_v38  ;;  %v696_v7 = vld [vmem:[%s11886_s14 + $0x990] sm:$0xff]  ;;  %v745_v0 = vld [vmem:[%s11886_s14 + $0xb18] sm:$0xff] }
 0x2c7   : > { %v9534_v22 = vcombine.low %v696_v7, %v700_v8 }
 0x2c9   : > { %5644 = vmatpush1.bf16.msra.mxu0 %v9470_v13  ;;  %5890 = vmatpush1.bf16.msra.mxu1 %v9472_v57  ;;  %v9528_v13 = vcombine.low %v689_v1, %v693_v38  ;;  %v9535_v57 = vcombine.high %v696_v7, %v700_v8  ;;  %v749_v1 = vld [vmem:[%s11886_s14 + $0xb38] sm:$0xff]  ;;  %v756_v7 = vld [vmem:[%s11886_s14 + $0xb70] sm:$0xff] }
 0x2ca   : > { %5645 = vmatprep.subr.bf16.mxu0 %v9479_v14  ;;  %5891 = vmatprep.subr.bf16.mxu1 %v9481_v17  ;;  %v9537_v14 = vcombine.high %v697_v9, %v701_v10  ;;  %v704_v17 = vld [vmem:[%s11886_s14 + $0x9d0] sm:$0xff]  ;;  %v753_v8 = vld [vmem:[%s11886_s14 + $0xb58] sm:$0xff] }
 0x2cb   : > { %v9542_v31 = vcombine.low %v704_v17, %v708_v18 }
 0x2cd   : > { %5646 = vmatpush1.bf16.msra.mxu0 %v9478_v53  ;;  %5892 = vmatpush1.bf16.msra.mxu1 %v9480_v26  ;;  %v9536_v53 = vcombine.low %v697_v9, %v701_v10  ;;  %v9543_v26 = vcombine.high %v704_v17, %v708_v18  ;;  %v757_v9 = vld [vmem:[%s11886_s14 + $0xb78] sm:$0xff]  ;;  %v764_v17 = vld [vmem:[%s11886_s14 + $0xbb0] sm:$0xff] }
 0x2ce   : > { %5656 = vmatprep.subr.bf16.mxu0 %v9487_v27  ;;  %5902 = vmatprep.subr.bf16.mxu1 %v9489_v28  ;;  %v9545_v27 = vcombine.high %v705_v20, %v709_v21  ;;  %v712_v28 = vld [vmem:[%s11886_s14 + $0xa10] sm:$0xff]  ;;  %v761_v18 = vld [vmem:[%s11886_s14 + $0xb98] sm:$0xff] }
 0x2cf   : > { %v9550_v23 = vcombine.low %v712_v28, %v716_v29 }
 0x2d0   : > { %5648 = vmatmul.mubr.bf16.vlgmr.msra.gmra.mrb[4].mxu0 %v12070_v25  ;;  %5894 = vmatmul.mubr.bf16.vlgmr.msra.gmra.mrb[4].mxu1 %v12070_v25  ;;  %v9502_v25 = vcombine.low %v664_v36, %v668_v37  ;;  %v724_v36 = vld [vmem:[%s11886_s14 + $0xa70] sm:$0xff]  ;;  %v721_v37 = vld [vmem:[%s11886_s14 + $0xa58] sm:$0xff] }
 0x2d1   : > { %5657 = vmatpush1.bf16.msra.mxu0 %v9486_v32  ;;  %5903 = vmatpush1.bf16.msra.mxu1 %v9488_v33  ;;  %v9544_v32 = vcombine.low %v705_v20, %v709_v21  ;;  %v9551_v33 = vcombine.high %v712_v28, %v716_v29  ;;  %v765_v20 = vld [vmem:[%s11886_s14 + $0xbb8] sm:$0xff]  ;;  %v772_v28 = vld [vmem:[%s11886_s14 + $0xbf0] sm:$0xff] }
 0x2d2   : > { %5658 = vmatprep.subr.bf16.mxu0 %v9495_v34  ;;  %5904 = vmatprep.subr.bf16.mxu1 %v9497_v35  ;;  %v9553_v34 = vcombine.high %v713_v30, %v717_v12  ;;  %v720_v35 = vld [vmem:[%s11886_s14 + $0xa50] sm:$0xff]  ;;  %v769_v29 = vld [vmem:[%s11886_s14 + $0xbd8] sm:$0xff] }
 0x2d3   : > { %5688 = vmatprep.mubr.bf16.mxu0 %v12078_v15  ;;  %5934 = vmatprep.mubr.bf16.mxu1 %v12078_v15  ;;  %v9512_v15 = vcombine.low %v673_v48, %v677_v49  ;;  %v733_v48 = vld [vmem:[%s11886_s14 + $0xab8] sm:$0xff]  ;;  %v9558_v49 = vcombine.low %v720_v35, %v724_v36 }
 0x2d5   : > { %5659 = vmatpush1.bf16.msra.mxu0 %v9494_v41  ;;  %5905 = vmatpush1.bf16.msra.mxu1 %v9496_v42  ;;  %v9552_v41 = vcombine.low %v713_v30, %v717_v12  ;;  %v9559_v42 = vcombine.high %v720_v35, %v724_v36  ;;  %v773_v30 = vld [vmem:[%s11886_s14 + $0xbf8] sm:$0xff]  ;;  %v780_v35 = vld [vmem:[%s11886_s14 + $0xc30] sm:$0xff] }
 0x2d6   : > { %5660 = vmatprep.subr.bf16.mxu0 %v9503_v43  ;;  %5906 = vmatprep.subr.bf16.mxu1 %v9505_v44  ;;  %v9561_v43 = vcombine.high %v721_v37, %v725_v40  ;;  %v728_v44 = vld [vmem:[%s11886_s14 + $0xa90] sm:$0xff]  ;;  %v777_v36 = vld [vmem:[%s11886_s14 + $0xc18] sm:$0xff] }
 0x2d7   : > { %v9566_v56 = vcombine.low %v728_v44, %v732_v45 }
 0x2d9   : > { %5661 = vmatpush1.bf16.msra.mxu0 %v9502_v25  ;;  %5907 = vmatpush1.bf16.msra.mxu1 %v9504_v50  ;;  %v9560_v25 = vcombine.low %v721_v37, %v725_v40  ;;  %v9567_v50 = vcombine.high %v728_v44, %v732_v45  ;;  %v781_v37 = vld [vmem:[%s11886_s14 + $0xc38] sm:$0xff]  ;;  %v788_v44 = vld [vmem:[%s11886_s14 + $0xc70] sm:$0xff] }
 0x2da   : > { %5662 = vmatprep.subr.bf16.mxu0 %v9511_v51  ;;  %5908 = vmatprep.subr.bf16.mxu1 %v9513_v52  ;;  %v9569_v51 = vcombine.high %v729_v47, %v733_v48  ;;  %v736_v52 = vld [vmem:[%s11886_s14 + $0xad0] sm:$0xff]  ;;  %v785_v45 = vld [vmem:[%s11886_s14 + $0xc58] sm:$0xff] }
 0x2db   : > { %v9574_v38 = vcombine.low %v736_v52, %v740_v54 }
 0x2dd   : > { %5663 = vmatpush1.bf16.msra.mxu0 %v9510_v60  ;;  %5909 = vmatpush1.bf16.msra.mxu1 %v9512_v15  ;;  %v9568_v60 = vcombine.low %v729_v47, %v733_v48  ;;  %v9575_v15 = vcombine.high %v736_v52, %v740_v54  ;;  %v789_v47 = vld [vmem:[%s11886_s14 + $0xc78] sm:$0xff]  ;;  %v796_v52 = vld [vmem:[%s11886_s14 + $0xcb0] sm:$0xff] }
 0x2de   : > { %5664 = vmatprep.subr.bf16.mxu0 %v9519_v61  ;;  %5910 = vmatprep.subr.bf16.mxu1 %v9521_v62  ;;  %v9577_v61 = vcombine.high %v737_v55, %v741_v19  ;;  %v744_v62 = vld [vmem:[%s11886_s14 + $0xb10] sm:$0xff]  ;;  %v793_v54 = vld [vmem:[%s11886_s14 + $0xc98] sm:$0xff] }
 0x2df   : > { %v9582_v10 = vcombine.low %v744_v62, %v748_v63 }
 0x2e1   : > { %5665 = vmatpush1.bf16.msra.mxu0 %v9518_v3  ;;  %5911 = vmatpush1.bf16.msra.mxu1 %v9520_v4  ;;  %v9576_v3 = vcombine.low %v737_v55, %v741_v19  ;;  %v9583_v4 = vcombine.high %v744_v62, %v748_v63  ;;  %v797_v55 = vld [vmem:[%s11886_s14 + $0xcb8] sm:$0xff]  ;;  %v804_v62 = vld [vmem:[%s11886_s14 + $0xcf0] sm:$0xff] }
 0x2e2   : > { %5666 = vmatprep.subr.bf16.mxu0 %v9527_v5  ;;  %5912 = vmatprep.subr.bf16.mxu1 %v9529_v6  ;;  %v9585_v5 = vcombine.high %v745_v0, %v749_v1  ;;  %v752_v6 = vld [vmem:[%s11886_s14 + $0xb50] sm:$0xff]  ;;  %v801_v63 = vld [vmem:[%s11886_s14 + $0xcd8] sm:$0xff] }
 0x2e3   : > { %v9590_v21 = vcombine.low %v752_v6, %v756_v7 }
 0x2e5   : > { %5667 = vmatpush1.bf16.msra.mxu0 %v9526_v11  ;;  %5913 = vmatpush1.bf16.msra.mxu1 %v9528_v13  ;;  %v9584_v11 = vcombine.low %v745_v0, %v749_v1  ;;  %v9591_v13 = vcombine.high %v752_v6, %v756_v7  ;;  %v805_v0 = vld [vmem:[%s11886_s14 + $0xcf8] sm:$0xff]  ;;  %v9632_v1 = vcombine.low %v793_v54, %v797_v55 }
 0x2e6   : > { %5668 = vmatprep.subr.bf16.mxu0 %v9535_v57  ;;  %5914 = vmatprep.subr.bf16.mxu1 %v9537_v14  ;;  %v9593_v57 = vcombine.high %v753_v8, %v757_v9  ;;  %v760_v14 = vld [vmem:[%s11886_s14 + $0xb90] sm:$0xff]  ;;  %v809_v6 = vld [vmem:[%s11886_s14 + $0xd18] sm:$0xff] }
 0x2e7   : > { %v9598_v12 = vcombine.low %v760_v14, %v764_v17  ;;  %v813_v7 = vld [vmem:[%s11886_s14 + $0xd38] sm:$0xff] }
 0x2e9   : > { %5669 = vmatpush1.bf16.msra.mxu0 %v9534_v22  ;;  %5915 = vmatpush1.bf16.msra.mxu1 %v9536_v53  ;;  %v9592_v22 = vcombine.low %v753_v8, %v757_v9  ;;  %v9599_v53 = vcombine.high %v760_v14, %v764_v17  ;;  %v821_v14 = vld [vmem:[%s11886_s14 + $0xd78] sm:$0xff] }
 0x2ea   : > { %5670 = vmatprep.subr.bf16.mxu0 %v9543_v26  ;;  %5916 = vmatprep.subr.bf16.mxu1 %v9545_v27  ;;  %v9601_v26 = vcombine.high %v761_v18, %v765_v20  ;;  %v768_v27 = vld [vmem:[%s11886_s14 + $0xbd0] sm:$0xff] }
 0x2eb   : > { %v9606_v40 = vcombine.low %v768_v27, %v772_v28 }
 0x2ed   : > { %5671 = vmatpush1.bf16.msra.mxu0 %v9542_v31  ;;  %5917 = vmatpush1.bf16.msra.mxu1 %v9544_v32  ;;  %v9600_v31 = vcombine.low %v761_v18, %v765_v20  ;;  %v9607_v32 = vcombine.high %v768_v27, %v772_v28  ;;  %v9648_v18 = vcombine.low %v809_v6, %v813_v7  ;;  %v829_v27 = vld [vmem:[%s11886_s14 + $0xdb8] sm:$0xff] }
 0x2ee   : > { %5672 = vmatprep.subr.bf16.mxu0 %v9551_v33  ;;  %5918 = vmatprep.subr.bf16.mxu1 %v9553_v34  ;;  %v9609_v33 = vcombine.high %v769_v29, %v773_v30  ;;  %v776_v34 = vld [vmem:[%s11886_s14 + $0xc10] sm:$0xff] }
 0x2ef   : > { %v9614_v48 = vcombine.low %v776_v34, %v780_v35 }
 0x2f1   : > { %5673 = vmatpush1.bf16.msra.mxu0 %v9550_v23  ;;  %5919 = vmatpush1.bf16.msra.mxu1 %v9552_v41  ;;  %v9608_v23 = vcombine.low %v769_v29, %v773_v30  ;;  %v9615_v41 = vcombine.high %v776_v34, %v780_v35 }
 0x2f2   : > { %5674 = vmatprep.subr.bf16.mxu0 %v9559_v42  ;;  %5920 = vmatprep.subr.bf16.mxu1 %v9561_v43  ;;  %v9617_v42 = vcombine.high %v777_v36, %v781_v37  ;;  %v784_v43 = vld [vmem:[%s11886_s14 + $0xc50] sm:$0xff] }
 0x2f3   : > { %v9622_v19 = vcombine.low %v784_v43, %v788_v44 }
 0x2f5   : > { %5675 = vmatpush1.bf16.msra.mxu0 %v9558_v49  ;;  %5921 = vmatpush1.bf16.msra.mxu1 %v9560_v25  ;;  %v9616_v49 = vcombine.low %v777_v36, %v781_v37  ;;  %v9623_v25 = vcombine.high %v784_v43, %v788_v44  ;;  %v833_v36 = vld [vmem:[%s11886_s14 + $0xdd8] sm:$0xff] }
 0x2f6   : > { %5676 = vmatprep.subr.bf16.mxu0 %v9567_v50  ;;  %5922 = vmatprep.subr.bf16.mxu1 %v9569_v51  ;;  %v9625_v50 = vcombine.high %v785_v45, %v789_v47  ;;  %v792_v51 = vld [vmem:[%s11886_s14 + $0xc90] sm:$0xff]  ;;  %v837_v37 = vld [vmem:[%s11886_s14 + $0xdf8] sm:$0xff] }
 0x2f9   : > { %5677 = vmatpush1.bf16.msra.mxu0 %v9566_v56  ;;  %5923 = vmatpush1.bf16.msra.mxu1 %v9568_v60  ;;  %v9624_v56 = vcombine.low %v785_v45, %v789_v47  ;;  %v9631_v60 = vcombine.high %v792_v51, %v796_v52 }
 0x2fa   : > { %5678 = vmatprep.subr.bf16.mxu0 %v9575_v15  ;;  %5924 = vmatprep.subr.bf16.mxu1 %v9577_v61  ;;  %v9633_v15 = vcombine.high %v793_v54, %v797_v55  ;;  %v800_v61 = vld [vmem:[%s11886_s14 + $0xcd0] sm:$0xff]  ;;  %v9672_v54 = vcombine.low %v833_v36, %v837_v37 }
 0x2fb   : > { %v9638_v8 = vcombine.low %v800_v61, %v804_v62 }
 0x2fd   : > { %5679 = vmatpush1.bf16.msra.mxu0 %v9574_v38  ;;  %5925 = vmatpush1.bf16.msra.mxu1 %v9576_v3  ;;  %v9639_v38 = vcombine.high %v800_v61, %v804_v62  ;;  %v9641_v3 = vcombine.high %v801_v63, %v805_v0  ;;  %v853_v61 = vld [vmem:[%s11886_s14 + $0xe78] sm:$0xff] }
 0x2fe   : > { %5680 = vmatprep.subr.bf16.mxu0 %v9583_v4  ;;  %5926 = vmatprep.subr.bf16.mxu1 %v9585_v5  ;;  %v808_v4 = vld [vmem:[%s11886_s14 + $0xd10] sm:$0xff] }
 0x2ff   : > { %v812_v5 = vld [vmem:[%s11886_s14 + $0xd30] sm:$0xff] }
 0x300   : > { %v9647_v9 = vcombine.high %v808_v4, %v812_v5  ;;  %v9646_v17 = vcombine.low %v808_v4, %v812_v5  ;;  %v861_v4 = vld [vmem:[%s11886_s14 + $0xeb8] sm:$0xff] }
 0x301   : > { %5681 = vmatpush1.bf16.msra.mxu0 %v9582_v10  ;;  %5927 = vmatpush1.bf16.msra.mxu1 %v9584_v11  ;;  %v9649_v10 = vcombine.high %v809_v6, %v813_v7  ;;  %v816_v11 = vld [vmem:[%s11886_s14 + $0xd50] sm:$0xff] }
 0x302   : > { %5682 = vmatprep.subr.bf16.mxu0 %v9591_v13  ;;  %5928 = vmatprep.subr.bf16.mxu1 %v9593_v57  ;;  %v820_v13 = vld [vmem:[%s11886_s14 + $0xd70] sm:$0xff]  ;;  %v817_v57 = vld [vmem:[%s11886_s14 + $0xd58] sm:$0xff] }
 0x303   : > { %v9655_v20 = vcombine.high %v816_v11, %v820_v13  ;;  %v9654_v28 = vcombine.low %v816_v11, %v820_v13  ;;  %v9656_v29 = vcombine.low %v817_v57, %v821_v14  ;;  %v869_v11 = vld [vmem:[%s11886_s14 + $0xef8] sm:$0xff] }
 0x305   : > { %5683 = vmatpush1.bf16.msra.mxu0 %v9590_v21  ;;  %5929 = vmatpush1.bf16.msra.mxu1 %v9592_v22  ;;  %v9657_v21 = vcombine.high %v817_v57, %v821_v14  ;;  %v824_v22 = vld [vmem:[%s11886_s14 + $0xd90] sm:$0xff] }
 0x306   : > { %5684 = vmatprep.subr.bf16.mxu0 %v9599_v53  ;;  %5930 = vmatprep.subr.bf16.mxu1 %v9601_v26  ;;  %v828_v53 = vld [vmem:[%s11886_s14 + $0xdb0] sm:$0xff]  ;;  %v825_v26 = vld [vmem:[%s11886_s14 + $0xd98] sm:$0xff] }
 0x307   : > { %v9663_v30 = vcombine.high %v824_v22, %v828_v53  ;;  %v9664_v44 = vcombine.low %v825_v26, %v829_v27 }
 0x309   : > { %5685 = vmatpush1.bf16.msra.mxu0 %v9598_v12  ;;  %5931 = vmatpush1.bf16.msra.mxu1 %v9600_v31  ;;  %v9665_v31 = vcombine.high %v825_v26, %v829_v27 }
 0x30a   : > { %5686 = vmatprep.subr.bf16.mxu0 %v9607_v32  ;;  %5932 = vmatprep.subr.bf16.mxu1 %v9609_v33  ;;  %v832_v32 = vld [vmem:[%s11886_s14 + $0xdd0] sm:$0xff] }
 0x30b   : > { %v836_v33 = vld [vmem:[%s11886_s14 + $0xdf0] sm:$0xff] }
 0x30c   : > { %v9671_v45 = vcombine.high %v832_v32, %v836_v33 }
 0x30d   : > { %5687 = vmatpush1.bf16.msra.mxu0 %v9606_v40  ;;  %5933 = vmatpush1.bf16.msra.mxu1 %v9608_v23 }
 0x30e   : > { %5697 = vmatprep.subr.bf16.mxu0 %v9615_v41  ;;  %5943 = vmatprep.subr.bf16.mxu1 %v9617_v42  ;;  %v9662_v41 = vcombine.low %v824_v22, %v828_v53  ;;  %v877_v22 = vld [vmem:[%s11886_s14 + $0xf38] sm:$0xff] }
 0x310   : > { %5689 = vmatmul.mubr.bf16.vlgmr.msra.gmra.mrb[4].mxu0 %v12149_v39  ;;  %5935 = vmatmul.mubr.bf16.vlgmr.msra.gmra.mrb[4].mxu1 %v12149_v39  ;;  %v9630_v39 = vcombine.low %v792_v51, %v796_v52  ;;  %v845_v51 = vld [vmem:[%s11886_s14 + $0xe38] sm:$0xff]  ;;  %v9670_v52 = vcombine.low %v832_v32, %v836_v33 }
 0x311   : > { %5698 = vmatpush1.bf16.msra.mxu0 %v9614_v48  ;;  %5944 = vmatpush1.bf16.msra.mxu1 %v9616_v49  ;;  %v9673_v48 = vcombine.high %v833_v36, %v837_v37  ;;  %v840_v49 = vld [vmem:[%s11886_s14 + $0xe10] sm:$0xff]  ;;  %v885_v32 = vld [vmem:[%s11886_s14 + $0xf78] sm:$0xff] }
 0x312   : > { %5699 = vmatprep.subr.bf16.mxu0 %v9623_v25  ;;  %5945 = vmatprep.subr.bf16.mxu1 %v9625_v50  ;;  %v844_v25 = vld [vmem:[%s11886_s14 + $0xe30] sm:$0xff]  ;;  %v841_v50 = vld [vmem:[%s11886_s14 + $0xe18] sm:$0xff] }
 0x313   : > { %5729 = vmatprep.mubr.bf16.mxu0 %v12157_v24  ;;  %5975 = vmatprep.mubr.bf16.mxu1 %v12157_v24  ;;  %v9640_v24 = vcombine.low %v801_v63, %v805_v0  ;;  %v9679_v55 = vcombine.high %v840_v49, %v844_v25  ;;  %v9678_v62 = vcombine.low %v840_v49, %v844_v25  ;;  %v896_v25 = vld [vmem:[%s11886_s14 + $0xfd0] sm:$0xff] }
 0x314   : > { %v9680_v63 = vcombine.low %v841_v50, %v845_v51 }
 0x315   : > { %5700 = vmatpush1.bf16.msra.mxu0 %v9622_v19  ;;  %5946 = vmatpush1.bf16.msra.mxu1 %v9624_v56  ;;  %v9681_v19 = vcombine.high %v841_v50, %v845_v51  ;;  %v848_v56 = vld [vmem:[%s11886_s14 + $0xe50] sm:$0xff]  ;;  %v897_v51 = vld [vmem:[%s11886_s14 + $0xfd8] sm:$0xff] }
 0x316   : > { %5701 = vmatprep.subr.bf16.mxu0 %v9631_v60  ;;  %5947 = vmatprep.subr.bf16.mxu1 %v9633_v15  ;;  %v852_v60 = vld [vmem:[%s11886_s14 + $0xe70] sm:$0xff]  ;;  %v849_v15 = vld [vmem:[%s11886_s14 + $0xe58] sm:$0xff] }
 0x317   : > { %v9687_v0 = vcombine.high %v848_v56, %v852_v60  ;;  %v9686_v5 = vcombine.low %v848_v56, %v852_v60  ;;  %v9688_v6 = vcombine.low %v849_v15, %v853_v61  ;;  %v900_v50 = vld [vmem:[%s11886_s14 + $0xff0] sm:$0xff] }
 0x318   : > { %v904_v60 = vld [vmem:[%s11886_s14 + $0x1010] sm:$0xff] }
 0x319   : > { %5702 = vmatpush1.bf16.msra.mxu0 %v9630_v39  ;;  %5948 = vmatpush1.bf16.msra.mxu1 %v9632_v1  ;;  %v9689_v39 = vcombine.high %v849_v15, %v853_v61  ;;  %v856_v1 = vld [vmem:[%s11886_s14 + $0xe90] sm:$0xff]  ;;  %v905_v61 = vld [vmem:[%s11886_s14 + $0x1018] sm:$0xff] }
 0x31a   : > { %5703 = vmatprep.subr.bf16.mxu0 %v9639_v38  ;;  %5949 = vmatprep.subr.bf16.mxu1 %v9641_v3  ;;  %v860_v38 = vld [vmem:[%s11886_s14 + $0xeb0] sm:$0xff]  ;;  %v857_v3 = vld [vmem:[%s11886_s14 + $0xe98] sm:$0xff] }
 0x31b   : > { %v9695_v7 = vcombine.high %v856_v1, %v860_v38  ;;  %v9694_v13 = vcombine.low %v856_v1, %v860_v38  ;;  %v9696_v57 = vcombine.low %v857_v3, %v861_v4  ;;  %v908_v15 = vld [vmem:[%s11886_s14 + $0x1030] sm:$0xff] }
 0x31c   : > { %v912_v38 = vld [vmem:[%s11886_s14 + $0x1050] sm:$0xff] }
 0x31d   : > { %5704 = vmatpush1.bf16.msra.mxu0 %v9638_v8  ;;  %5950 = vmatpush1.bf16.msra.mxu1 %v9640_v24  ;;  %v9697_v8 = vcombine.high %v857_v3, %v861_v4  ;;  %v864_v24 = vld [vmem:[%s11886_s14 + $0xed0] sm:$0xff]  ;;  %v913_v4 = vld [vmem:[%s11886_s14 + $0x1058] sm:$0xff] }
 0x31e   : > { %5705 = vmatprep.subr.bf16.mxu0 %v9647_v9  ;;  %5951 = vmatprep.subr.bf16.mxu1 %v9649_v10  ;;  %v868_v9 = vld [vmem:[%s11886_s14 + $0xef0] sm:$0xff]  ;;  %v865_v10 = vld [vmem:[%s11886_s14 + $0xed8] sm:$0xff] }
 0x31f   : > { %v9703_v14 = vcombine.high %v864_v24, %v868_v9  ;;  %v9702_v53 = vcombine.low %v864_v24, %v868_v9  ;;  %v9704_v26 = vcombine.low %v865_v10, %v869_v11  ;;  %v916_v3 = vld [vmem:[%s11886_s14 + $0x1070] sm:$0xff] }
 0x320   : > { %v920_v9 = vld [vmem:[%s11886_s14 + $0x1090] sm:$0xff] }
 0x321   : > { %5706 = vmatpush1.bf16.msra.mxu0 %v9646_v17  ;;  %5952 = vmatpush1.bf16.msra.mxu1 %v9648_v18  ;;  %v9705_v17 = vcombine.high %v865_v10, %v869_v11  ;;  %v872_v18 = vld [vmem:[%s11886_s14 + $0xf10] sm:$0xff]  ;;  %v921_v11 = vld [vmem:[%s11886_s14 + $0x1098] sm:$0xff] }
 0x322   : > { %5707 = vmatprep.subr.bf16.mxu0 %v9655_v20  ;;  %5953 = vmatprep.subr.bf16.mxu1 %v9657_v21  ;;  %v876_v20 = vld [vmem:[%s11886_s14 + $0xf30] sm:$0xff]  ;;  %v873_v21 = vld [vmem:[%s11886_s14 + $0xf18] sm:$0xff] }
 0x323   : > { %v12613_v12 = vpop.f32.mrb[0].mxu0  ;;  %v12617_v34 = vpop.f32.mrb[0].mxu1  ;;  %v9711_v27 = vcombine.high %v872_v18, %v876_v20  ;;  %v9710_v33 = vcombine.low %v872_v18, %v876_v20  ;;  %v9712_v36 = vcombine.low %v873_v21, %v877_v22  ;;  %v924_v10 = vld [vmem:[%s11886_s14 + $0x10b0] sm:$0xff] }
 0x324   : > { %v12619_v35 = vpop.f32.mrb[1].mxu0  ;;  %v12623_v40 = vpop.f32.mrb[1].mxu1  ;;  %v928_v20 = vld [vmem:[%s11886_s14 + $0x10d0] sm:$0xff] }
 0x325   : > { %v5325_v23 = vpop.f32.mrb[2].mxu0  ;;  %5708 = vmatpush1.bf16.msra.mxu0 %v9654_v28  ;;  %v5571_v42 = vpop.f32.mrb[2].mxu1  ;;  %5954 = vmatpush1.bf16.msra.mxu1 %v9656_v29  ;;  %v9713_v28 = vcombine.high %v873_v21, %v877_v22  ;;  %v880_v29 = vld [vmem:[%s11886_s14 + $0xf50] sm:$0xff]  ;;  %v929_v22 = vld [vmem:[%s11886_s14 + $0x10d8] sm:$0xff] }
 0x326   : > { %v5326_v43 = vpop.f32.mrb[3].mxu0  ;;  %5709 = vmatprep.subr.bf16.mxu0 %v9663_v30  ;;  %v5572_v47 = vpop.f32.mrb[3].mxu1  ;;  %5955 = vmatprep.subr.bf16.mxu1 %v9665_v31  ;;  %v884_v30 = vld [vmem:[%s11886_s14 + $0xf70] sm:$0xff]  ;;  %v881_v31 = vld [vmem:[%s11886_s14 + $0xf58] sm:$0xff] }
 0x327   : > { %v9719_v37 = vcombine.high %v880_v29, %v884_v30  ;;  %v9721_v23 = vcombine.high %v881_v31, %v885_v32  ;;  %v892_v42 = vld [vmem:[%s11886_s14 + $0xfb0] sm:$0xff]  ;;  %v889_v43 = vld [vmem:[%s11886_s14 + $0xf98] sm:$0xff]  ;;  %v9720_v47 = vcombine.low %v881_v31, %v885_v32 }
 0x328   : > { %v932_v21 = vld [vmem:[%s11886_s14 + $0x10f0] sm:$0xff]  ;;  %v937_v31 = vld [vmem:[%s11886_s14 + $0x1118] sm:$0xff] }
 0x329   : > { %5710 = vmatpush1.bf16.msra.mxu0 %v9662_v41  ;;  %5956 = vmatpush1.bf16.msra.mxu1 %v9664_v44  ;;  %v888_v41 = vld [vmem:[%s11886_s14 + $0xf90] sm:$0xff]  ;;  %v893_v44 = vld [vmem:[%s11886_s14 + $0xfb8] sm:$0xff] }
 0x32a   : > { %5711 = vmatprep.subr.bf16.mxu0 %v9671_v45  ;;  %5957 = vmatprep.subr.bf16.mxu1 %v9673_v48  ;;  %v9718_v45 = vcombine.low %v880_v29, %v884_v30  ;;  %v9727_v48 = vcombine.high %v888_v41, %v892_v42  ;;  %v9729_v49 = vcombine.high %v889_v43, %v893_v44  ;;  %v936_v29 = vld [vmem:[%s11886_s14 + $0x1110] sm:$0xff]  ;;  %v941_v32 = vld [vmem:[%s11886_s14 + $0x1138] sm:$0xff] }
 0x32b   : > { %v940_v30 = vld [vmem:[%s11886_s14 + $0x1130] sm:$0xff] }
 0x32d   : > { %5712 = vmatpush1.bf16.msra.mxu0 %v9670_v52  ;;  %5958 = vmatpush1.bf16.msra.mxu1 %v9672_v54  ;;  %v901_v52 = vld [vmem:[%s11886_s14 + $0xff8] sm:$0xff]  ;;  %v9726_v54 = vcombine.low %v888_v41, %v892_v42  ;;  %v948_v41 = vld [vmem:[%s11886_s14 + $0x1170] sm:$0xff] }
 0x32e   : > { %5713 = vmatprep.subr.bf16.mxu0 %v9679_v55  ;;  %5959 = vmatprep.subr.bf16.mxu1 %v9681_v19  ;;  %v9728_v55 = vcombine.low %v889_v43, %v893_v44  ;;  %v9735_v19 = vcombine.high %v896_v25, %v900_v50  ;;  %v9737_v56 = vcombine.high %v897_v51, %v901_v52  ;;  %v945_v42 = vld [vmem:[%s11886_s14 + $0x1158] sm:$0xff] }
 0x32f   : > { %v949_v43 = vld [vmem:[%s11886_s14 + $0x1178] sm:$0xff]  ;;  %v9774_v44 = vcombine.low %v936_v29, %v940_v30 }
 0x331   : > { %5714 = vmatpush1.bf16.msra.mxu0 %v9678_v62  ;;  %5960 = vmatpush1.bf16.msra.mxu1 %v9680_v63  ;;  %v909_v62 = vld [vmem:[%s11886_s14 + $0x1038] sm:$0xff]  ;;  %v9734_v63 = vcombine.low %v896_v25, %v900_v50  ;;  %v956_v25 = vld [vmem:[%s11886_s14 + $0x11b0] sm:$0xff] }
 0x332   : > { %5715 = vmatprep.subr.bf16.mxu0 %v9687_v0  ;;  %5961 = vmatprep.subr.bf16.mxu1 %v9689_v39  ;;  %v9736_v0 = vcombine.low %v897_v51, %v901_v52  ;;  %v9743_v39 = vcombine.high %v904_v60, %v908_v15  ;;  %v9745_v1 = vcombine.high %v905_v61, %v909_v62  ;;  %v953_v50 = vld [vmem:[%s11886_s14 + $0x1198] sm:$0xff] }
 0x333   : > { %v957_v51 = vld [vmem:[%s11886_s14 + $0x11b8] sm:$0xff] }
 0x335   : > { %5716 = vmatpush1.bf16.msra.mxu0 %v9686_v5  ;;  %5962 = vmatpush1.bf16.msra.mxu1 %v9688_v6  ;;  %v917_v5 = vld [vmem:[%s11886_s14 + $0x1078] sm:$0xff]  ;;  %v9742_v6 = vcombine.low %v904_v60, %v908_v15  ;;  %v964_v60 = vld [vmem:[%s11886_s14 + $0x11f0] sm:$0xff] }
 0x336   : > { %5717 = vmatprep.subr.bf16.mxu0 %v9695_v7  ;;  %5963 = vmatprep.subr.bf16.mxu1 %v9697_v8  ;;  %v9744_v7 = vcombine.low %v905_v61, %v909_v62  ;;  %v9751_v8 = vcombine.high %v912_v38, %v916_v3  ;;  %v9753_v24 = vcombine.high %v913_v4, %v917_v5  ;;  %v961_v15 = vld [vmem:[%s11886_s14 + $0x11d8] sm:$0xff] }
 0x337   : > { %v965_v61 = vld [vmem:[%s11886_s14 + $0x11f8] sm:$0xff] }
 0x339   : > { %5718 = vmatpush1.bf16.msra.mxu0 %v9694_v13  ;;  %5964 = vmatpush1.bf16.msra.mxu1 %v9696_v57  ;;  %v925_v13 = vld [vmem:[%s11886_s14 + $0x10b8] sm:$0xff]  ;;  %v9750_v57 = vcombine.low %v912_v38, %v916_v3  ;;  %v972_v38 = vld [vmem:[%s11886_s14 + $0x1230] sm:$0xff] }
 0x33a   : > { %5719 = vmatprep.subr.bf16.mxu0 %v9703_v14  ;;  %5965 = vmatprep.subr.bf16.mxu1 %v9705_v17  ;;  %v9752_v14 = vcombine.low %v913_v4, %v917_v5  ;;  %v9759_v17 = vcombine.high %v920_v9, %v924_v10  ;;  %v9761_v18 = vcombine.high %v921_v11, %v925_v13  ;;  %v969_v3 = vld [vmem:[%s11886_s14 + $0x1218] sm:$0xff] }
 0x33b   : > { %v973_v4 = vld [vmem:[%s11886_s14 + $0x1238] sm:$0xff] }
 0x33d   : > { %5720 = vmatpush1.bf16.msra.mxu0 %v9702_v53  ;;  %5966 = vmatpush1.bf16.msra.mxu1 %v9704_v26  ;;  %v933_v53 = vld [vmem:[%s11886_s14 + $0x10f8] sm:$0xff]  ;;  %v9760_v26 = vcombine.low %v921_v11, %v925_v13 }
 0x33e   : > { %5721 = vmatprep.subr.bf16.mxu0 %v9711_v27  ;;  %5967 = vmatprep.subr.bf16.mxu1 %v9713_v28  ;;  %v9767_v27 = vcombine.high %v928_v20, %v932_v21  ;;  %v9769_v28 = vcombine.high %v929_v22, %v933_v53  ;;  %v981_v11 = vld [vmem:[%s11886_s14 + $0x1278] sm:$0xff] }
 0x341   : > { %5722 = vmatpush1.bf16.msra.mxu0 %v9710_v33  ;;  %5968 = vmatpush1.bf16.msra.mxu1 %v9712_v36  ;;  %v9766_v33 = vcombine.low %v928_v20, %v932_v21  ;;  %v9775_v36 = vcombine.high %v936_v29, %v940_v30  ;;  %v988_v20 = vld [vmem:[%s11886_s14 + $0x12b0] sm:$0xff]  ;;  %v985_v21 = vld [vmem:[%s11886_s14 + $0x1298] sm:$0xff] }
 0x342   : > { %5723 = vmatprep.subr.bf16.mxu0 %v9719_v37  ;;  %5969 = vmatprep.subr.bf16.mxu1 %v9721_v23  ;;  %v9777_v37 = vcombine.high %v937_v31, %v941_v32  ;;  %v944_v23 = vld [vmem:[%s11886_s14 + $0x1150] sm:$0xff]  ;;  %v993_v30 = vld [vmem:[%s11886_s14 + $0x12d8] sm:$0xff] }
 0x343   : > { %v9782_v52 = vcombine.low %v944_v23, %v948_v41  ;;  %v996_v29 = vld [vmem:[%s11886_s14 + $0x12f0] sm:$0xff] }
 0x345   : > { %5724 = vmatpush1.bf16.msra.mxu0 %v9718_v45  ;;  %5970 = vmatpush1.bf16.msra.mxu1 %v9720_v47  ;;  %v9776_v45 = vcombine.low %v937_v31, %v941_v32  ;;  %v9783_v47 = vcombine.high %v944_v23, %v948_v41  ;;  %v997_v31 = vld [vmem:[%s11886_s14 + $0x12f8] sm:$0xff]  ;;  %v1004_v23 = vld [vmem:[%s11886_s14 + $0x1330] sm:$0xff] }
 0x346   : > { %5725 = vmatprep.subr.bf16.mxu0 %v9727_v48  ;;  %5971 = vmatprep.subr.bf16.mxu1 %v9729_v49  ;;  %v9785_v48 = vcombine.high %v945_v42, %v949_v43  ;;  %v952_v49 = vld [vmem:[%s11886_s14 + $0x1190] sm:$0xff]  ;;  %v1001_v41 = vld [vmem:[%s11886_s14 + $0x1318] sm:$0xff] }
 0x347   : > { %v9790_v62 = vcombine.low %v952_v49, %v956_v25 }
 0x349   : > { %5726 = vmatpush1.bf16.msra.mxu0 %v9726_v54  ;;  %5972 = vmatpush1.bf16.msra.mxu1 %v9728_v55  ;;  %v9784_v54 = vcombine.low %v945_v42, %v949_v43  ;;  %v9791_v55 = vcombine.high %v952_v49, %v956_v25  ;;  %v1005_v42 = vld [vmem:[%s11886_s14 + $0x1338] sm:$0xff]  ;;  %v1012_v49 = vld [vmem:[%s11886_s14 + $0x1370] sm:$0xff] }
 0x34a   : > { %5727 = vmatprep.subr.bf16.mxu0 %v9735_v19  ;;  %5973 = vmatprep.subr.bf16.mxu1 %v9737_v56  ;;  %v9793_v19 = vcombine.high %v953_v50, %v957_v51  ;;  %v960_v56 = vld [vmem:[%s11886_s14 + $0x11d0] sm:$0xff]  ;;  %v1009_v25 = vld [vmem:[%s11886_s14 + $0x1358] sm:$0xff] }
 0x34b   : > { %v9798_v5 = vcombine.low %v960_v56, %v964_v60 }
 0x34d   : > { %5728 = vmatpush1.bf16.msra.mxu0 %v9734_v63  ;;  %5974 = vmatpush1.bf16.msra.mxu1 %v9736_v0  ;;  %v9792_v63 = vcombine.low %v953_v50, %v957_v51  ;;  %v9799_v0 = vcombine.high %v960_v56, %v964_v60  ;;  %v1013_v50 = vld [vmem:[%s11886_s14 + $0x1378] sm:$0xff]  ;;  %v1020_v56 = vld [vmem:[%s11886_s14 + $0x13b0] sm:$0xff] }
 0x34e   : > { %5738 = vmatprep.subr.bf16.mxu0 %v9743_v39  ;;  %5984 = vmatprep.subr.bf16.mxu1 %v9745_v1  ;;  %v9801_v39 = vcombine.high %v961_v15, %v965_v61  ;;  %v968_v1 = vld [vmem:[%s11886_s14 + $0x1210] sm:$0xff]  ;;  %v1017_v60 = vld [vmem:[%s11886_s14 + $0x1398] sm:$0xff] }
 0x34f   : > { %v9806_v13 = vcombine.low %v968_v1, %v972_v38 }
 0x350   : > { %5730 = vmatmul.mubr.bf16.vlgmr.msra.gmra.mrb[4].mxu0 %v12228_v59  ;;  %5976 = vmatmul.mubr.bf16.vlgmr.msra.gmra.mrb[4].mxu1 %v12228_v59  ;;  %v9758_v59 = vcombine.low %v920_v9, %v924_v10  ;;  %v980_v9 = vld [vmem:[%s11886_s14 + $0x1270] sm:$0xff]  ;;  %v977_v10 = vld [vmem:[%s11886_s14 + $0x1258] sm:$0xff] }
 0x351   : > { %5739 = vmatpush1.bf16.msra.mxu0 %v9742_v6  ;;  %5985 = vmatpush1.bf16.msra.mxu1 %v9744_v7  ;;  %v9800_v6 = vcombine.low %v961_v15, %v965_v61  ;;  %v9807_v7 = vcombine.high %v968_v1, %v972_v38  ;;  %v1021_v15 = vld [vmem:[%s11886_s14 + $0x13b8] sm:$0xff]  ;;  %v1028_v1 = vld [vmem:[%s11886_s14 + $0x13f0] sm:$0xff] }
 0x352   : > { %5740 = vmatprep.subr.bf16.mxu0 %v9751_v8  ;;  %5986 = vmatprep.subr.bf16.mxu1 %v9753_v24  ;;  %v9809_v8 = vcombine.high %v969_v3, %v973_v4  ;;  %v976_v24 = vld [vmem:[%s11886_s14 + $0x1250] sm:$0xff]  ;;  %v1025_v38 = vld [vmem:[%s11886_s14 + $0x13d8] sm:$0xff] }
 0x353   : > { %5770 = vmatprep.mubr.bf16.mxu0 %v12234_v2  ;;  %6016 = vmatprep.mubr.bf16.mxu1 %v12234_v2  ;;  %v9768_v2 = vcombine.low %v929_v22, %v933_v53  ;;  %v989_v22 = vld [vmem:[%s11886_s14 + $0x12b8] sm:$0xff]  ;;  %v9814_v53 = vcombine.low %v976_v24, %v980_v9 }
 0x355   : > { %5741 = vmatpush1.bf16.msra.mxu0 %v9750_v57  ;;  %5987 = vmatpush1.bf16.msra.mxu1 %v9752_v14  ;;  %v9808_v57 = vcombine.low %v969_v3, %v973_v4  ;;  %v9815_v14 = vcombine.high %v976_v24, %v980_v9  ;;  %v1029_v3 = vld [vmem:[%s11886_s14 + $0x13f8] sm:$0xff]  ;;  %v1036_v24 = vld [vmem:[%s11886_s14 + $0x1430] sm:$0xff] }
 0x356   : > { %5742 = vmatprep.subr.bf16.mxu0 %v9759_v17  ;;  %5988 = vmatprep.subr.bf16.mxu1 %v9761_v18  ;;  %v9817_v17 = vcombine.high %v977_v10, %v981_v11  ;;  %v984_v18 = vld [vmem:[%s11886_s14 + $0x1290] sm:$0xff]  ;;  %v1033_v9 = vld [vmem:[%s11886_s14 + $0x1418] sm:$0xff] }
 0x357   : > { %v9822_v32 = vcombine.low %v984_v18, %v988_v20 }
 0x359   : > { %5743 = vmatpush1.bf16.msra.mxu0 %v9758_v59  ;;  %5989 = vmatpush1.bf16.msra.mxu1 %v9760_v26  ;;  %v9816_v59 = vcombine.low %v977_v10, %v981_v11  ;;  %v9823_v26 = vcombine.high %v984_v18, %v988_v20  ;;  %v1037_v10 = vld [vmem:[%s11886_s14 + $0x1438] sm:$0xff]  ;;  %v1044_v18 = vld [vmem:[%s11886_s14 + $0x1470] sm:$0xff] }
 0x35a   : > { %5744 = vmatprep.subr.bf16.mxu0 %v9767_v27  ;;  %5990 = vmatprep.subr.bf16.mxu1 %v9769_v28  ;;  %v9825_v27 = vcombine.high %v985_v21, %v989_v22  ;;  %v992_v28 = vld [vmem:[%s11886_s14 + $0x12d0] sm:$0xff]  ;;  %v1041_v20 = vld [vmem:[%s11886_s14 + $0x1458] sm:$0xff] }
 0x35b   : > { %v9830_v43 = vcombine.low %v992_v28, %v996_v29 }
 0x35d   : > { %5745 = vmatpush1.bf16.msra.mxu0 %v9766_v33  ;;  %5991 = vmatpush1.bf16.msra.mxu1 %v9768_v2  ;;  %v9824_v33 = vcombine.low %v985_v21, %v989_v22  ;;  %v9831_v2 = vcombine.high %v992_v28, %v996_v29  ;;  %v1045_v21 = vld [vmem:[%s11886_s14 + $0x1478] sm:$0xff]  ;;  %v1052_v28 = vld [vmem:[%s11886_s14 + $0x14b0] sm:$0xff] }
 0x35e   : > { %5746 = vmatprep.subr.bf16.mxu0 %v9775_v36  ;;  %5992 = vmatprep.subr.bf16.mxu1 %v9777_v37  ;;  %v9833_v36 = vcombine.high %v993_v30, %v997_v31  ;;  %v1000_v37 = vld [vmem:[%s11886_s14 + $0x1310] sm:$0xff]  ;;  %v1049_v29 = vld [vmem:[%s11886_s14 + $0x1498] sm:$0xff] }
 0x35f   : > { %v9838_v51 = vcombine.low %v1000_v37, %v1004_v23 }
 0x361   : > { %5747 = vmatpush1.bf16.msra.mxu0 %v9774_v44  ;;  %5993 = vmatpush1.bf16.msra.mxu1 %v9776_v45  ;;  %v9832_v44 = vcombine.low %v993_v30, %v997_v31  ;;  %v9839_v45 = vcombine.high %v1000_v37, %v1004_v23  ;;  %v1053_v30 = vld [vmem:[%s11886_s14 + $0x14b8] sm:$0xff]  ;;  %v1060_v37 = vld [vmem:[%s11886_s14 + $0x14f0] sm:$0xff] }
 0x362   : > { %5748 = vmatprep.subr.bf16.mxu0 %v9783_v47  ;;  %5994 = vmatprep.subr.bf16.mxu1 %v9785_v48  ;;  %v9841_v47 = vcombine.high %v1001_v41, %v1005_v42  ;;  %v1008_v48 = vld [vmem:[%s11886_s14 + $0x1350] sm:$0xff]  ;;  %v1057_v23 = vld [vmem:[%s11886_s14 + $0x14d8] sm:$0xff] }
 0x363   : > { %v9846_v61 = vcombine.low %v1008_v48, %v1012_v49 }
 0x365   : > { %5749 = vmatpush1.bf16.msra.mxu0 %v9782_v52  ;;  %5995 = vmatpush1.bf16.msra.mxu1 %v9784_v54  ;;  %v9840_v52 = vcombine.low %v1001_v41, %v1005_v42  ;;  %v9847_v54 = vcombine.high %v1008_v48, %v1012_v49  ;;  %v1061_v41 = vld [vmem:[%s11886_s14 + $0x14f8] sm:$0xff]  ;;  %v9888_v42 = vcombine.low %v1049_v29, %v1053_v30 }
 0x366   : > { %5750 = vmatprep.subr.bf16.mxu0 %v9791_v55  ;;  %5996 = vmatprep.subr.bf16.mxu1 %v9793_v19  ;;  %v9849_v55 = vcombine.high %v1009_v25, %v1013_v50  ;;  %v1016_v19 = vld [vmem:[%s11886_s14 + $0x1390] sm:$0xff]  ;;  %v1065_v48 = vld [vmem:[%s11886_s14 + $0x1518] sm:$0xff] }
 0x367   : > { %v9854_v4 = vcombine.low %v1016_v19, %v1020_v56  ;;  %v1069_v49 = vld [vmem:[%s11886_s14 + $0x1538] sm:$0xff] }
 0x369   : > { %5751 = vmatpush1.bf16.msra.mxu0 %v9790_v62  ;;  %5997 = vmatpush1.bf16.msra.mxu1 %v9792_v63  ;;  %v9848_v62 = vcombine.low %v1009_v25, %v1013_v50  ;;  %v9855_v63 = vcombine.high %v1016_v19, %v1020_v56  ;;  %v1077_v19 = vld [vmem:[%s11886_s14 + $0x1578] sm:$0xff] }
 0x36a   : > { %5752 = vmatprep.subr.bf16.mxu0 %v9799_v0  ;;  %5998 = vmatprep.subr.bf16.mxu1 %v9801_v39  ;;  %v9857_v0 = vcombine.high %v1017_v60, %v1021_v15  ;;  %v1024_v39 = vld [vmem:[%s11886_s14 + $0x13d0] sm:$0xff] }
 0x36b   : > { %v9862_v11 = vcombine.low %v1024_v39, %v1028_v1 }
 0x36d   : > { %5753 = vmatpush1.bf16.msra.mxu0 %v9798_v5  ;;  %5999 = vmatpush1.bf16.msra.mxu1 %v9800_v6  ;;  %v9856_v5 = vcombine.low %v1017_v60, %v1021_v15  ;;  %v9863_v6 = vcombine.high %v1024_v39, %v1028_v1  ;;  %v9904_v60 = vcombine.low %v1065_v48, %v1069_v49  ;;  %v1085_v39 = vld [vmem:[%s11886_s14 + $0x15b8] sm:$0xff] }
 0x36e   : > { %5754 = vmatprep.subr.bf16.mxu0 %v9807_v7  ;;  %6000 = vmatprep.subr.bf16.mxu1 %v9809_v8  ;;  %v9865_v7 = vcombine.high %v1025_v38, %v1029_v3  ;;  %v1032_v8 = vld [vmem:[%s11886_s14 + $0x1410] sm:$0xff] }
 0x36f   : > { %v9870_v22 = vcombine.low %v1032_v8, %v1036_v24 }
 0x371   : > { %5755 = vmatpush1.bf16.msra.mxu0 %v9806_v13  ;;  %6001 = vmatpush1.bf16.msra.mxu1 %v9808_v57  ;;  %v9864_v13 = vcombine.low %v1025_v38, %v1029_v3  ;;  %v9871_v57 = vcombine.high %v1032_v8, %v1036_v24  ;;  %v1093_v8 = vld [vmem:[%s11886_s14 + $0x15f8] sm:$0xff] }
 0x372   : > { %5756 = vmatprep.subr.bf16.mxu0 %v9815_v14  ;;  %6002 = vmatprep.subr.bf16.mxu1 %v9817_v17  ;;  %v9873_v14 = vcombine.high %v1033_v9, %v1037_v10  ;;  %v1040_v17 = vld [vmem:[%s11886_s14 + $0x1450] sm:$0xff] }
 0x373   : > { %v9878_v31 = vcombine.low %v1040_v17, %v1044_v18 }
 0x375   : > { %5757 = vmatpush1.bf16.msra.mxu0 %v9814_v53  ;;  %6003 = vmatpush1.bf16.msra.mxu1 %v9816_v59  ;;  %v9872_v53 = vcombine.low %v1033_v9, %v1037_v10  ;;  %v9879_v59 = vcombine.high %v1040_v17, %v1044_v18  ;;  %v1101_v17 = vld [vmem:[%s11886_s14 + $0x1638] sm:$0xff] }
 0x376   : > { %5758 = vmatprep.subr.bf16.mxu0 %v9823_v26  ;;  %6004 = vmatprep.subr.bf16.mxu1 %v9825_v27  ;;  %v9881_v26 = vcombine.high %v1041_v20, %v1045_v21  ;;  %v1048_v27 = vld [vmem:[%s11886_s14 + $0x1490] sm:$0xff] }
 0x379   : > { %5759 = vmatpush1.bf16.msra.mxu0 %v9822_v32  ;;  %6005 = vmatpush1.bf16.msra.mxu1 %v9824_v33  ;;  %v9880_v32 = vcombine.low %v1041_v20, %v1045_v21  ;;  %v9887_v33 = vcombine.high %v1048_v27, %v1052_v28 }
 0x37a   : > { %5760 = vmatprep.subr.bf16.mxu0 %v9831_v2  ;;  %6006 = vmatprep.subr.bf16.mxu1 %v9833_v36  ;;  %v9889_v2 = vcombine.high %v1049_v29, %v1053_v30  ;;  %v1056_v36 = vld [vmem:[%s11886_s14 + $0x14d0] sm:$0xff] }
 0x37b   : > { %v9894_v25 = vcombine.low %v1056_v36, %v1060_v37 }
 0x37d   : > { %5761 = vmatpush1.bf16.msra.mxu0 %v9830_v43  ;;  %6007 = vmatpush1.bf16.msra.mxu1 %v9832_v44  ;;  %v9895_v43 = vcombine.high %v1056_v36, %v1060_v37  ;;  %v9897_v44 = vcombine.high %v1057_v23, %v1061_v41  ;;  %v1117_v36 = vld [vmem:[%s11886_s14 + $0x16b8] sm:$0xff] }
 0x37e   : > { %5762 = vmatprep.subr.bf16.mxu0 %v9839_v45  ;;  %6008 = vmatprep.subr.bf16.mxu1 %v9841_v47  ;;  %v1064_v45 = vld [vmem:[%s11886_s14 + $0x1510] sm:$0xff] }
 0x37f   : > { %v1068_v47 = vld [vmem:[%s11886_s14 + $0x1530] sm:$0xff] }
 0x380   : > { %v9903_v50 = vcombine.high %v1064_v45, %v1068_v47  ;;  %v9902_v56 = vcombine.low %v1064_v45, %v1068_v47  ;;  %v1125_v45 = vld [vmem:[%s11886_s14 + $0x16f8] sm:$0xff] }
 0x381   : > { %5763 = vmatpush1.bf16.msra.mxu0 %v9838_v51  ;;  %6009 = vmatpush1.bf16.msra.mxu1 %v9840_v52  ;;  %v9905_v51 = vcombine.high %v1065_v48, %v1069_v49  ;;  %v1072_v52 = vld [vmem:[%s11886_s14 + $0x1550] sm:$0xff] }
 0x382   : > { %5764 = vmatprep.subr.bf16.mxu0 %v9847_v54  ;;  %6010 = vmatprep.subr.bf16.mxu1 %v9849_v55  ;;  %v1076_v54 = vld [vmem:[%s11886_s14 + $0x1570] sm:$0xff]  ;;  %v1073_v55 = vld [vmem:[%s11886_s14 + $0x1558] sm:$0xff] }
 0x383   : > { %v9911_v15 = vcombine.high %v1072_v52, %v1076_v54  ;;  %v9910_v1 = vcombine.low %v1072_v52, %v1076_v54  ;;  %v9912_v38 = vcombine.low %v1073_v55, %v1077_v19  ;;  %v1133_v52 = vld [vmem:[%s11886_s14 + $0x1738] sm:$0xff] }
 0x385   : > { %5765 = vmatpush1.bf16.msra.mxu0 %v9846_v61  ;;  %6011 = vmatpush1.bf16.msra.mxu1 %v9848_v62  ;;  %v9913_v61 = vcombine.high %v1073_v55, %v1077_v19  ;;  %v1080_v62 = vld [vmem:[%s11886_s14 + $0x1590] sm:$0xff] }
 0x386   : > { %5766 = vmatprep.subr.bf16.mxu0 %v9855_v63  ;;  %6012 = vmatprep.subr.bf16.mxu1 %v9857_v0  ;;  %v1084_v63 = vld [vmem:[%s11886_s14 + $0x15b0] sm:$0xff]  ;;  %v1081_v0 = vld [vmem:[%s11886_s14 + $0x1598] sm:$0xff] }
 0x387   : > { %v9919_v3 = vcombine.high %v1080_v62, %v1084_v63  ;;  %v9918_v24 = vcombine.low %v1080_v62, %v1084_v63  ;;  %v9920_v9 = vcombine.low %v1081_v0, %v1085_v39  ;;  %v1141_v62 = vld [vmem:[%s11886_s14 + $0x1778] sm:$0xff] }
 0x389   : > { %5767 = vmatpush1.bf16.msra.mxu0 %v9854_v4  ;;  %6013 = vmatpush1.bf16.msra.mxu1 %v9856_v5  ;;  %v9921_v4 = vcombine.high %v1081_v0, %v1085_v39  ;;  %v1088_v5 = vld [vmem:[%s11886_s14 + $0x15d0] sm:$0xff] }
 0x38a   : > { %5768 = vmatprep.subr.bf16.mxu0 %v9863_v6  ;;  %6014 = vmatprep.subr.bf16.mxu1 %v9865_v7  ;;  %v1092_v6 = vld [vmem:[%s11886_s14 + $0x15f0] sm:$0xff]  ;;  %v1089_v7 = vld [vmem:[%s11886_s14 + $0x15d8] sm:$0xff] }
 0x38b   : > { %v9927_v10 = vcombine.high %v1088_v5, %v1092_v6  ;;  %v9926_v18 = vcombine.low %v1088_v5, %v1092_v6  ;;  %v9928_v20 = vcombine.low %v1089_v7, %v1093_v8  ;;  %v1149_v5 = vld [vmem:[%s11886_s14 + $0x17b8] sm:$0xff] }
 0x38d   : > { %5769 = vmatpush1.bf16.msra.mxu0 %v9862_v11  ;;  %6015 = vmatpush1.bf16.msra.mxu1 %v9864_v13  ;;  %v9929_v11 = vcombine.high %v1089_v7, %v1093_v8  ;;  %v1096_v13 = vld [vmem:[%s11886_s14 + $0x1610] sm:$0xff] }
 0x38e   : > { %5779 = vmatprep.subr.bf16.mxu0 %v9871_v57  ;;  %6025 = vmatprep.subr.bf16.mxu1 %v9873_v14  ;;  %v1100_v57 = vld [vmem:[%s11886_s14 + $0x1630] sm:$0xff]  ;;  %v1097_v14 = vld [vmem:[%s11886_s14 + $0x1618] sm:$0xff] }
 0x38f   : > { %v9935_v21 = vcombine.high %v1096_v13, %v1100_v57  ;;  %v9936_v29 = vcombine.low %v1097_v14, %v1101_v17 }
 0x390   : > { %5771 = vmatmul.mubr.bf16.vlgmr.msra.gmra.mrb[4].mxu0 %v12302_v16  ;;  %6017 = vmatmul.mubr.bf16.vlgmr.msra.gmra.mrb[4].mxu1 %v12302_v16  ;;  %v9886_v16 = vcombine.low %v1048_v27, %v1052_v28  ;;  %v1109_v27 = vld [vmem:[%s11886_s14 + $0x1678] sm:$0xff]  ;;  %v9934_v28 = vcombine.low %v1096_v13, %v1100_v57 }
 0x391   : > { %5780 = vmatpush1.bf16.msra.mxu0 %v9870_v22  ;;  %6026 = vmatpush1.bf16.msra.mxu1 %v9872_v53  ;;  %v9937_v22 = vcombine.high %v1097_v14, %v1101_v17  ;;  %v1104_v53 = vld [vmem:[%s11886_s14 + $0x1650] sm:$0xff]  ;;  %v1157_v13 = vld [vmem:[%s11886_s14 + $0x17f8] sm:$0xff] }
 0x392   : > { %5781 = vmatprep.subr.bf16.mxu0 %v9879_v59  ;;  %6027 = vmatprep.subr.bf16.mxu1 %v9881_v26  ;;  %v1108_v59 = vld [vmem:[%s11886_s14 + $0x1670] sm:$0xff]  ;;  %v1105_v26 = vld [vmem:[%s11886_s14 + $0x1658] sm:$0xff] }
 0x393   : > { %5811 = vmatprep.mubr.bf16.mxu0 %v12313_v58  ;;  %6057 = vmatprep.mubr.bf16.mxu1 %v12313_v58  ;;  %v9896_v58 = vcombine.low %v1057_v23, %v1061_v41  ;;  %v9943_v30 = vcombine.high %v1104_v53, %v1108_v59  ;;  %v9942_v37 = vcombine.low %v1104_v53, %v1108_v59  ;;  %v10657_v53 = vld [vmem:[%s11894_s12 + $0xc] ss:$48 sps:$4 sm:$0xff]   ;;  %v10652_v59 = vld [vmem:[%s11894_s12] ss:$48 sps:$4 sm:$0xff]  }
 0x394   : > { %v9944_v23 = vcombine.low %v1105_v26, %v1109_v27 }
 0x395   : > { %5782 = vmatpush1.bf16.msra.mxu0 %v9878_v31  ;;  %6028 = vmatpush1.bf16.msra.mxu1 %v9880_v32  ;;  %v9945_v31 = vcombine.high %v1105_v26, %v1109_v27  ;;  %v1112_v32 = vld [vmem:[%s11886_s14 + $0x1690] sm:$0xff]  ;;  %v10655_v26 = vld [vmem:[%s11894_s12 + $0x8] ss:$48 sps:$4 sm:$0xff]  }
 0x396   : > { %5783 = vmatprep.subr.bf16.mxu0 %v9887_v33  ;;  %6029 = vmatprep.subr.bf16.mxu1 %v9889_v2  ;;  %v1116_v33 = vld [vmem:[%s11886_s14 + $0x16b0] sm:$0xff]  ;;  %v1113_v2 = vld [vmem:[%s11886_s14 + $0x1698] sm:$0xff] }
 0x397   : > { %v9951_v41 = vcombine.high %v1112_v32, %v1116_v33  ;;  %v9950_v47 = vcombine.low %v1112_v32, %v1116_v33  ;;  %v9952_v48 = vcombine.low %v1113_v2, %v1117_v36  ;;  %v10660_v27 = vld [vmem:[%s11894_s12 + $0x64] ss:$48 sps:$4 sm:$0xff]   ;;  %v10669_v32 = vld [vmem:[%s11894_s12 + $0xcc] ss:$48 sps:$4 sm:$0xff]   ;;  %v10664_v33 = vld [vmem:[%s11894_s12 + $0xc0] ss:$48 sps:$4 sm:$0xff]  }
 0x399   : > { %5784 = vmatpush1.bf16.msra.mxu0 %v9886_v16  ;;  %6030 = vmatpush1.bf16.msra.mxu1 %v9888_v42  ;;  %v9953_v16 = vcombine.high %v1113_v2, %v1117_v36  ;;  %v1120_v42 = vld [vmem:[%s11886_s14 + $0x16d0] sm:$0xff]  ;;  %v10667_v2 = vld [vmem:[%s11894_s12 + $0xc8] ss:$48 sps:$4 sm:$0xff]   ;;  %v10675_v36 = vld [vmem:[%s11894_s12 + $0x12c] ss:$48 sps:$4 sm:$0xff]  }
 0x39a   : > { %5785 = vmatprep.subr.bf16.mxu0 %v9895_v43  ;;  %6031 = vmatprep.subr.bf16.mxu1 %v9897_v44  ;;  %v1124_v43 = vld [vmem:[%s11886_s14 + $0x16f0] sm:$0xff]  ;;  %v1121_v44 = vld [vmem:[%s11886_s14 + $0x16d8] sm:$0xff] }
 0x39b   : > { %v9959_v49 = vcombine.high %v1120_v42, %v1124_v43  ;;  %v9958_v54 = vcombine.low %v1120_v42, %v1124_v43  ;;  %v9960_v55 = vcombine.low %v1121_v44, %v1125_v45  ;;  %v10676_v42 = vld [vmem:[%s11894_s12 + $0x180] ss:$48 sps:$4 sm:$0xff]   ;;  %v10679_v43 = vld [vmem:[%s11894_s12 + $0x188] ss:$48 sps:$4 sm:$0xff]  }
 0x39d   : > { %5786 = vmatpush1.bf16.msra.mxu0 %v9894_v25  ;;  %6032 = vmatpush1.bf16.msra.mxu1 %v9896_v58  ;;  %v9961_v25 = vcombine.high %v1121_v44, %v1125_v45  ;;  %v1128_v58 = vld [vmem:[%s11886_s14 + $0x1710] sm:$0xff]  ;;  %v10687_v45 = vld [vmem:[%s11894_s12 + $0x1ec] ss:$48 sps:$4 sm:$0xff]  }
 0x39e   : > { %5787 = vmatprep.subr.bf16.mxu0 %v9903_v50  ;;  %6033 = vmatprep.subr.bf16.mxu1 %v9905_v51  ;;  %v1132_v50 = vld [vmem:[%s11886_s14 + $0x1730] sm:$0xff]  ;;  %v1129_v51 = vld [vmem:[%s11886_s14 + $0x1718] sm:$0xff] }
 0x39f   : > { %v9967_v19 = vcombine.high %v1128_v58, %v1132_v50  ;;  %v9966_v63 = vcombine.low %v1128_v58, %v1132_v50  ;;  %v9968_v0 = vcombine.low %v1129_v51, %v1133_v52  ;;  %v10684_v44 = vld [vmem:[%s11894_s12 + $0x1e4] ss:$48 sps:$4 sm:$0xff]   ;;  %v10688_v58 = vld [vmem:[%s11894_s12 + $0x240] ss:$48 sps:$4 sm:$0xff]   ;;  %v10691_v50 = vld [vmem:[%s11894_s12 + $0x248] ss:$48 sps:$4 sm:$0xff]  }
 0x3a1   : > { %5788 = vmatpush1.bf16.msra.mxu0 %v9902_v56  ;;  %6034 = vmatpush1.bf16.msra.mxu1 %v9904_v60  ;;  %v9969_v56 = vcombine.high %v1129_v51, %v1133_v52  ;;  %v1136_v60 = vld [vmem:[%s11886_s14 + $0x1750] sm:$0xff]  ;;  %v10699_v52 = vld [vmem:[%s11894_s12 + $0x2ac] ss:$48 sps:$4 sm:$0xff]  }
 0x3a2   : > { %5789 = vmatprep.subr.bf16.mxu0 %v9911_v15  ;;  %6035 = vmatprep.subr.bf16.mxu1 %v9913_v61  ;;  %v1140_v15 = vld [vmem:[%s11886_s14 + $0x1770] sm:$0xff]  ;;  %v1137_v61 = vld [vmem:[%s11886_s14 + $0x1758] sm:$0xff] }
 0x3a3   : > { %v9975_v39 = vcombine.high %v1136_v60, %v1140_v15  ;;  %v9974_v6 = vcombine.low %v1136_v60, %v1140_v15  ;;  %v9976_v7 = vcombine.low %v1137_v61, %v1141_v62  ;;  %v10696_v51 = vld [vmem:[%s11894_s12 + $0x2a4] ss:$48 sps:$4 sm:$0xff]   ;;  %v10700_v60 = vld [vmem:[%s11894_s12 + $0x300] ss:$48 sps:$4 sm:$0xff]   ;;  %v10703_v15 = vld [vmem:[%s11894_s12 + $0x308] ss:$48 sps:$4 sm:$0xff]  }
 0x3a5   : > { %5790 = vmatpush1.bf16.msra.mxu0 %v9910_v1  ;;  %6036 = vmatpush1.bf16.msra.mxu1 %v9912_v38  ;;  %v9977_v1 = vcombine.high %v1137_v61, %v1141_v62  ;;  %v1144_v38 = vld [vmem:[%s11886_s14 + $0x1790] sm:$0xff]  ;;  %v10711_v62 = vld [vmem:[%s11894_s12 + $0x36c] ss:$48 sps:$4 sm:$0xff]  }
 0x3a6   : > { %5791 = vmatprep.subr.bf16.mxu0 %v9919_v3  ;;  %6037 = vmatprep.subr.bf16.mxu1 %v9921_v4  ;;  %v1148_v3 = vld [vmem:[%s11886_s14 + $0x17b0] sm:$0xff]  ;;  %v1145_v4 = vld [vmem:[%s11886_s14 + $0x1798] sm:$0xff] }
 0x3a7   : > { %v9983_v8 = vcombine.high %v1144_v38, %v1148_v3  ;;  %v9982_v57 = vcombine.low %v1144_v38, %v1148_v3  ;;  %v9984_v14 = vcombine.low %v1145_v4, %v1149_v5  ;;  %v10708_v61 = vld [vmem:[%s11894_s12 + $0x364] ss:$48 sps:$4 sm:$0xff]   ;;  %v10712_v38 = vld [vmem:[%s11894_s12 + $0x3c0] ss:$48 sps:$4 sm:$0xff]   ;;  %v10715_v3 = vld [vmem:[%s11894_s12 + $0x3c8] ss:$48 sps:$4 sm:$0xff]  }
 0x3a9   : > { %5792 = vmatpush1.bf16.msra.mxu0 %v9918_v24  ;;  %6038 = vmatpush1.bf16.msra.mxu1 %v9920_v9  ;;  %v9985_v24 = vcombine.high %v1145_v4, %v1149_v5  ;;  %v1152_v9 = vld [vmem:[%s11886_s14 + $0x17d0] sm:$0xff]  ;;  %v10723_v5 = vld [vmem:[%s11894_s12 + $0x42c] ss:$48 sps:$4 sm:$0xff]  }
 0x3aa   : > { %5793 = vmatprep.subr.bf16.mxu0 %v9927_v10  ;;  %6039 = vmatprep.subr.bf16.mxu1 %v9929_v11  ;;  %v1156_v10 = vld [vmem:[%s11886_s14 + $0x17f0] sm:$0xff]  ;;  %v1153_v11 = vld [vmem:[%s11886_s14 + $0x17d8] sm:$0xff] }
 0x3ab   : > { %v9991_v17 = vcombine.high %v1152_v9, %v1156_v10  ;;  %v10720_v4 = vld [vmem:[%s11894_s12 + $0x424] ss:$48 sps:$4 sm:$0xff]  }
 0x3ad   : > { %5794 = vmatpush1.bf16.msra.mxu0 %v9926_v18  ;;  %6040 = vmatpush1.bf16.msra.mxu1 %v9928_v20  ;;  %v9993_v18 = vcombine.high %v1153_v11, %v1157_v13  ;;  %v9990_v20 = vcombine.low %v1152_v9, %v1156_v10  ;;  %v10724_v9 = vld [vmem:[%s11894_s12 + $0x480] ss:$48 sps:$4 sm:$0xff]   ;;  %v10727_v10 = vld [vmem:[%s11894_s12 + $0x488] ss:$48 sps:$4 sm:$0xff]  }
 0x3ae   : > { %5795 = vmatprep.subr.bf16.mxu0 %v9935_v21  ;;  %6041 = vmatprep.subr.bf16.mxu1 %v9937_v22  ;;  %v9992_v21 = vcombine.low %v1153_v11, %v1157_v13  ;;  %v10654_v22 = vld [vmem:[%s11894_s12 + $0x4] ss:$48 sps:$4 sm:$0xff]   ;;  %v10735_v13 = vld [vmem:[%s11894_s12 + $0x4ec] ss:$48 sps:$4 sm:$0xff]  }
 0x3af   : > { %v10732_v11 = vld [vmem:[%s11894_s12 + $0x4e4] ss:$48 sps:$4 sm:$0xff]  }
 0x3b1   : > { %5796 = vmatpush1.bf16.msra.mxu0 %v9934_v28  ;;  %6042 = vmatpush1.bf16.msra.mxu1 %v9936_v29  ;;  %v10663_v28 = vld [vmem:[%s11894_s12 + $0x6c] ss:$48 sps:$4 sm:$0xff]   ;;  %v10658_v29 = vld [vmem:[%s11894_s12 + $0x60] ss:$48 sps:$4 sm:$0xff]  }
 0x3b2   : > { %5797 = vmatprep.subr.bf16.mxu0 %v9943_v30  ;;  %6043 = vmatprep.subr.bf16.mxu1 %v9945_v31  ;;  %v10661_v30 = vld [vmem:[%s11894_s12 + $0x68] ss:$48 sps:$4 sm:$0xff]   ;;  %v10666_v31 = vld [vmem:[%s11894_s12 + $0xc4] ss:$48 sps:$4 sm:$0xff]  }
 0x3b5   : > { %5798 = vmatpush1.bf16.msra.mxu0 %v9942_v37  ;;  %6044 = vmatpush1.bf16.msra.mxu1 %v9944_v23  ;;  %v10670_v37 = vld [vmem:[%s11894_s12 + $0x120] ss:$48 sps:$4 sm:$0xff]   ;;  %v10673_v23 = vld [vmem:[%s11894_s12 + $0x128] ss:$48 sps:$4 sm:$0xff]  }
 0x3b6   : > { %5799 = vmatprep.subr.bf16.mxu0 %v9951_v41  ;;  %6045 = vmatprep.subr.bf16.mxu1 %v9953_v16  ;;  %v10678_v41 = vld [vmem:[%s11894_s12 + $0x184] ss:$48 sps:$4 sm:$0xff]   ;;  %v10681_v16 = vld [vmem:[%s11894_s12 + $0x18c] ss:$48 sps:$4 sm:$0xff]  }
 0x3b9   : > { %5800 = vmatpush1.bf16.msra.mxu0 %v9950_v47  ;;  %6046 = vmatpush1.bf16.msra.mxu1 %v9952_v48  ;;  %v10682_v47 = vld [vmem:[%s11894_s12 + $0x1e0] ss:$48 sps:$4 sm:$0xff]   ;;  %v10685_v48 = vld [vmem:[%s11894_s12 + $0x1e8] ss:$48 sps:$4 sm:$0xff]  }
 0x3ba   : > { %5801 = vmatprep.subr.bf16.mxu0 %v9959_v49  ;;  %6047 = vmatprep.subr.bf16.mxu1 %v9961_v25  ;;  %v10690_v49 = vld [vmem:[%s11894_s12 + $0x244] ss:$48 sps:$4 sm:$0xff]   ;;  %v10693_v25 = vld [vmem:[%s11894_s12 + $0x24c] ss:$48 sps:$4 sm:$0xff]  }
 0x3bd   : > { %5802 = vmatpush1.bf16.msra.mxu0 %v9958_v54  ;;  %6048 = vmatpush1.bf16.msra.mxu1 %v9960_v55  ;;  %v10694_v54 = vld [vmem:[%s11894_s12 + $0x2a0] ss:$48 sps:$4 sm:$0xff]   ;;  %v10697_v55 = vld [vmem:[%s11894_s12 + $0x2a8] ss:$48 sps:$4 sm:$0xff]  }
 0x3be   : > { %5803 = vmatprep.subr.bf16.mxu0 %v9967_v19  ;;  %6049 = vmatprep.subr.bf16.mxu1 %v9969_v56  ;;  %v10702_v19 = vld [vmem:[%s11894_s12 + $0x304] ss:$48 sps:$4 sm:$0xff]   ;;  %v10705_v56 = vld [vmem:[%s11894_s12 + $0x30c] ss:$48 sps:$4 sm:$0xff]  }
 0x3c1   : > { %5804 = vmatpush1.bf16.msra.mxu0 %v9966_v63  ;;  %6050 = vmatpush1.bf16.msra.mxu1 %v9968_v0  ;;  %v10706_v63 = vld [vmem:[%s11894_s12 + $0x360] ss:$48 sps:$4 sm:$0xff]   ;;  %v10709_v0 = vld [vmem:[%s11894_s12 + $0x368] ss:$48 sps:$4 sm:$0xff]  }
 0x3c2   : > { %5805 = vmatprep.subr.bf16.mxu0 %v9975_v39  ;;  %6051 = vmatprep.subr.bf16.mxu1 %v9977_v1  ;;  %v10714_v39 = vld [vmem:[%s11894_s12 + $0x3c4] ss:$48 sps:$4 sm:$0xff]   ;;  %v10717_v1 = vld [vmem:[%s11894_s12 + $0x3cc] ss:$48 sps:$4 sm:$0xff]  }
 0x3c5   : > { %5806 = vmatpush1.bf16.msra.mxu0 %v9974_v6  ;;  %6052 = vmatpush1.bf16.msra.mxu1 %v9976_v7  ;;  %v10718_v6 = vld [vmem:[%s11894_s12 + $0x420] ss:$48 sps:$4 sm:$0xff]   ;;  %v10721_v7 = vld [vmem:[%s11894_s12 + $0x428] ss:$48 sps:$4 sm:$0xff]  }
 0x3c6   : > { %5807 = vmatprep.subr.bf16.mxu0 %v9983_v8  ;;  %6053 = vmatprep.subr.bf16.mxu1 %v9985_v24  ;;  %v10726_v8 = vld [vmem:[%s11894_s12 + $0x484] ss:$48 sps:$4 sm:$0xff]   ;;  %v10729_v24 = vld [vmem:[%s11894_s12 + $0x48c] ss:$48 sps:$4 sm:$0xff]  }
 0x3c9   : > { %5808 = vmatpush1.bf16.msra.mxu0 %v9982_v57  ;;  %6054 = vmatpush1.bf16.msra.mxu1 %v9984_v14  ;;  %v10730_v57 = vld [vmem:[%s11894_s12 + $0x4e0] ss:$48 sps:$4 sm:$0xff]   ;;  %v10733_v14 = vld [vmem:[%s11894_s12 + $0x4e8] ss:$48 sps:$4 sm:$0xff]  }
 0x3ca   : > { %5809 = vmatprep.subr.bf16.mxu0 %v9991_v17  ;;  %6055 = vmatprep.subr.bf16.mxu1 %v9993_v18  ;;  %v10738_v17 = vld [vmem:[%s11894_s12 + $0x544] ss:$48 sps:$4 sm:$0xff]   ;;  %v10741_v18 = vld [vmem:[%s11894_s12 + $0x54c] ss:$48 sps:$4 sm:$0xff]  }
 0x3cd   : > { %5810 = vmatpush1.bf16.msra.mxu0 %v9990_v20  ;;  %6056 = vmatpush1.bf16.msra.mxu1 %v9992_v21  ;;  %v10736_v20 = vld [vmem:[%s11894_s12 + $0x540] ss:$48 sps:$4 sm:$0xff]   ;;  %v10739_v21 = vld [vmem:[%s11894_s12 + $0x548] ss:$48 sps:$4 sm:$0xff]  }
 0x3ce   : > { %8402 = vmatprep.subr.bf16.mxu0 %v10654_v22  ;;  %8484 = vmatprep.subr.bf16.mxu1 %v10657_v53  ;;  %v10744_v22 = vld [vmem:[%s11894_s12 + $0x5a4] ss:$48 sps:$4 sm:$0xff]   ;;  %v10747_v53 = vld [vmem:[%s11894_s12 + $0x5ac] ss:$48 sps:$4 sm:$0xff]  }
 0x3d0   : > { %5812 = vmatmul.mubr.bf16.vlgmr.msra.gmra.mrb[4].mxu0 %v12381_v46  ;;  %6058 = vmatmul.mubr.bf16.vlgmr.msra.gmra.mrb[4].mxu1 %v12381_v46  ;;  %v10672_v46 = vld [vmem:[%s11894_s12 + $0x124] ss:$48 sps:$4 sm:$0xff]  }
 0x3d1   : > { %8403 = vmatpush1.bf16.msra.mxu0 %v10652_v59  ;;  %8485 = vmatpush1.bf16.msra.mxu1 %v10655_v26  ;;  %v10742_v59 = vld [vmem:[%s11894_s12 + $0x5a0] ss:$48 sps:$4 sm:$0xff]   ;;  %v10745_v26 = vld [vmem:[%s11894_s12 + $0x5a8] ss:$48 sps:$4 sm:$0xff]  }
 0x3d2   : > { %8404 = vmatprep.subr.bf16.mxu0 %v10660_v27  ;;  %8486 = vmatprep.subr.bf16.mxu1 %v10663_v28  ;;  %v10750_v27 = vld [vmem:[%s11894_s12 + $0x604] ss:$48 sps:$4 sm:$0xff]   ;;  %v10753_v28 = vld [vmem:[%s11894_s12 + $0x60c] ss:$48 sps:$4 sm:$0xff]  }
 0x3d5   : > { %8405 = vmatpush1.bf16.msra.mxu0 %v10658_v29  ;;  %8487 = vmatpush1.bf16.msra.mxu1 %v10661_v30  ;;  %v1160_v29 = vlaneseq }
 0x3d6   : > { %8406 = vmatprep.subr.bf16.mxu0 %v10666_v31  ;;  %8488 = vmatprep.subr.bf16.mxu1 %v10669_v32  ;;  %v1158_v32 = vld [vmem:[%s11892_s5] sm:$0xff] }
 0x3d7   : > { %v12861_v30 = vshrl.u32 %v1160_v29, 7  ;;  %v10748_v29 = vld [vmem:[%s11894_s12 + $0x600] ss:$48 sps:$4 sm:$0xff]  }
 0x3d9   : > { %8407 = vmatpush1.bf16.msra.mxu0 %v10664_v33  ;;  %8489 = vmatpush1.bf16.msra.mxu1 %v10667_v2  ;;  %v12864_v31 = vsub.s32 0, %v12861_v30  ;;  %v12868_v33 = vsub.s32 2, %v12861_v30  ;;  %v12871_v2 = vsub.s32 1, %v12861_v30 }
 0x3da   : > { %8408 = vmatprep.subr.bf16.mxu0 %v10672_v46  ;;  %8490 = vmatprep.subr.bf16.mxu1 %v10675_v36  ;;  %v12874_v46 = vsub.s32 3, %v12861_v30 }
 0x3db   : > { %v1163_v36 = vrot.slane %v1158_v32, %v12864_v31 }
 0x3dd   : > { %8409 = vmatpush1.bf16.msra.mxu0 %v10670_v37  ;;  %8491 = vmatpush1.bf16.msra.mxu1 %v10673_v23  ;;  %v1171_v37 = vrot.slane %v1158_v32, %v12868_v33  ;;  %v1167_v23 = vrot.slane %v1158_v32, %v12871_v2 }
 0x3de   : > { %8410 = vmatprep.subr.bf16.mxu0 %v10678_v41  ;;  %8492 = vmatprep.subr.bf16.mxu1 %v10681_v16  ;;  %v1175_v41 = vrot.slane %v1158_v32, %v12874_v46  ;;  %v10385_v16 = vadd.f32 %v12613_v12, %v1163_v36 }
 0x3e1   : > { %8411 = vmatpush1.bf16.msra.mxu0 %v10676_v42  ;;  %8493 = vmatpush1.bf16.msra.mxu1 %v10679_v43  ;;  %v10387_v42 = vadd.f32 %v12617_v34, %v1171_v37  ;;  %v10386_v43 = vadd.f32 %v12619_v35, %v1167_v23  ;;  %v10756_v37 = vld [vmem:[%s11894_s12 + $0x664] ss:$48 sps:$4 sm:$0xff]   ;;  %v10759_v23 = vld [vmem:[%s11894_s12 + $0x66c] ss:$48 sps:$4 sm:$0xff]  }
 0x3e2   : > { %8412 = vmatprep.subr.bf16.mxu0 %v10684_v44  ;;  %8494 = vmatprep.subr.bf16.mxu1 %v10687_v45  ;;  %v10388_v44 = vadd.f32 %v12623_v40, %v1175_v41  ;;  %v6066_v45 = vsub.f32 0.0, %v10385_v16 }
 0x3e5   : > { %8413 = vmatpush1.bf16.msra.mxu0 %v10682_v47  ;;  %8495 = vmatpush1.bf16.msra.mxu1 %v10685_v48  ;;  %v6068_v47 = vsub.f32 0.0, %v10387_v42  ;;  %v6067_v48 = vsub.f32 0.0, %v10386_v43 }
 0x3e6   : > { %8414 = vmatprep.subr.bf16.mxu0 %v10690_v49  ;;  %8496 = vmatprep.subr.bf16.mxu1 %v10693_v25  ;;  %v6069_v49 = vsub.f32 0.0, %v10388_v44  ;;  %v6070_v25 = vmul.f32 1.442695, %v6066_v45  ;;  %v10760_v45 = vld [vmem:[%s11894_s12 + $0x6c0] ss:$48 sps:$4 sm:$0xff]  }
 0x3e8   : > { %11228 = vpow2.f32 %v6070_v25  ;;  %v10766_v25 = vld [vmem:[%s11894_s12 + $0x720] ss:$48 sps:$4 sm:$0xff]  }
 0x3e9   : > { %8415 = vmatpush1.bf16.msra.mxu0 %v10688_v58  ;;  %8497 = vmatpush1.bf16.msra.mxu1 %v10691_v50  ;;  %v6074_v58 = vmul.f32 1.442695, %v6068_v47  ;;  %v6072_v50 = vmul.f32 1.442695, %v6067_v48  ;;  %v10763_v47 = vld [vmem:[%s11894_s12 + $0x6c8] ss:$48 sps:$4 sm:$0xff]  }
 0x3ea   : > { %8416 = vmatprep.subr.bf16.mxu0 %v10696_v51  ;;  %8498 = vmatprep.subr.bf16.mxu1 %v10699_v52  ;;  %v6076_v51 = vmul.f32 1.442695, %v6069_v49  ;;  %v10768_v48 = vld [vmem:[%s11894_s12 + $0x724] ss:$48 sps:$4 sm:$0xff]   ;;  %v10771_v49 = vld [vmem:[%s11894_s12 + $0x72c] ss:$48 sps:$4 sm:$0xff]  }
 0x3eb   : > { %11230 = vpow2.f32 %v6074_v58  ;;  %v10769_v58 = vld [vmem:[%s11894_s12 + $0x728] ss:$48 sps:$4 sm:$0xff]  }
 0x3ec   : > { %11232 = vpow2.f32 %v6072_v50  ;;  %v10774_v50 = vld [vmem:[%s11894_s12 + $0x784] ss:$48 sps:$4 sm:$0xff]  }
 0x3ed   : > { %8417 = vmatpush1.bf16.msra.mxu0 %v10694_v54  ;;  %8499 = vmatpush1.bf16.msra.mxu1 %v10697_v55  ;;  %11234 = vpow2.f32 %v6076_v51  ;;  %v10777_v51 = vld [vmem:[%s11894_s12 + $0x78c] ss:$48 sps:$4 sm:$0xff]  }
 0x3ee   : > { %8418 = vmatprep.subr.bf16.mxu0 %v10702_v19  ;;  %8500 = vmatprep.subr.bf16.mxu1 %v10705_v56  ;;  %v1178_v56 = vsub.s32 4, %v12861_v30 }
 0x3f1   : > { %8419 = vmatpush1.bf16.msra.mxu0 %v10700_v60  ;;  %8501 = vmatpush1.bf16.msra.mxu1 %v10703_v15  ;;  %v1186_v60 = vsub.s32 6, %v12861_v30  ;;  %v1182_v15 = vsub.s32 5, %v12861_v30 }
 0x3f2   : > { %8420 = vmatprep.subr.bf16.mxu0 %v10708_v61  ;;  %8502 = vmatprep.subr.bf16.mxu1 %v10711_v62  ;;  %v11229_v52 = vpop.eup %11228  ;;  %v1190_v61 = vsub.s32 7, %v12861_v30 }
 0x3f3   : > { %v6078_v55 = vadd.f32 1.0, %v11229_v52  ;;  %v10772_v52 = vld [vmem:[%s11894_s12 + $0x780] ss:$48 sps:$4 sm:$0xff]  }
 0x3f5   : > { %8421 = vmatpush1.bf16.msra.mxu0 %v10706_v63  ;;  %8503 = vmatpush1.bf16.msra.mxu1 %v10709_v0  ;;  %v11231_v12 = vpop.eup %11230  ;;  %11236 = vrcp.f32 %v6078_v55  ;;  %v1179_v63 = vrot.slane %v1158_v32, %v1178_v56  ;;  %v10778_v55 = vld [vmem:[%s11894_s12 + $0x7e0] ss:$48 sps:$4 sm:$0xff]  }
 0x3f6   : > { %8422 = vmatprep.subr.bf16.mxu0 %v10714_v39  ;;  %8504 = vmatprep.subr.bf16.mxu1 %v10717_v1  ;;  %v11233_v54 = vpop.eup %11232  ;;  %v6080_v35 = vadd.f32 1.0, %v11231_v12  ;;  %v1187_v39 = vrot.slane %v1158_v32, %v1186_v60  ;;  %v1183_v1 = vrot.slane %v1158_v32, %v1182_v15  ;;  %v10775_v12 = vld [vmem:[%s11894_s12 + $0x788] ss:$48 sps:$4 sm:$0xff]  }
 0x3f7   : > { %v11235_v34 = vpop.eup %11234  ;;  %v6079_v19 = vadd.f32 1.0, %v11233_v54  ;;  %v10780_v54 = vld [vmem:[%s11894_s12 + $0x7e4] ss:$48 sps:$4 sm:$0xff]  }
 0x3f8   : > { %v6081_v40 = vadd.f32 1.0, %v11235_v34  ;;  %11238 = vrcp.f32 %v6080_v35  ;;  %v10783_v34 = vld [vmem:[%s11894_s12 + $0x7ec] ss:$48 sps:$4 sm:$0xff]   ;;  %v10781_v35 = vld [vmem:[%s11894_s12 + $0x7e8] ss:$48 sps:$4 sm:$0xff]  }
 0x3f9   : > { %8423 = vmatpush1.bf16.msra.mxu0 %v10712_v38  ;;  %8505 = vmatpush1.bf16.msra.mxu1 %v10715_v3  ;;  %11240 = vrcp.f32 %v6079_v19  ;;  %v1191_v3 = vrot.slane %v1158_v32, %v1190_v61  ;;  %v10751_v32 = vld [vmem:[%s11894_s12 + $0x608] ss:$48 sps:$4 sm:$0xff]   ;;  %v10786_v19 = vld [vmem:[%s11894_s12 + $0x844] ss:$48 sps:$4 sm:$0xff]  }
 0x3fa   : > { %8424 = vmatprep.subr.bf16.mxu0 %v10720_v4  ;;  %8506 = vmatprep.subr.bf16.mxu1 %v10723_v5  ;;  %11242 = vrcp.f32 %v6081_v40  ;;  %v10789_v40 = vld [vmem:[%s11894_s12 + $0x84c] ss:$48 sps:$4 sm:$0xff]  }
 0x3fd   : > { %8425 = vmatpush1.bf16.msra.mxu0 %v10718_v6  ;;  %8507 = vmatpush1.bf16.msra.mxu1 %v10721_v7 }
 0x3fe   : > { %8426 = vmatprep.subr.bf16.mxu0 %v10726_v8  ;;  %8508 = vmatprep.subr.bf16.mxu1 %v10729_v24 }
 0x3ff   : > { %v11237_v62 = vpop.eup %11236 }
 0x400   : > { %v6086_v6 = vmul.f32 %v11237_v62, %v10385_v16  ;;  %v10754_v16 = vld [vmem:[%s11894_s12 + $0x660] ss:$48 sps:$4 sm:$0xff]  }
 0x401   : > { %8427 = vmatpush1.bf16.msra.mxu0 %v10724_v9  ;;  %8509 = vmatpush1.bf16.msra.mxu1 %v10727_v10  ;;  %v10784_v62 = vld [vmem:[%s11894_s12 + $0x840] ss:$48 sps:$4 sm:$0xff]  }
 0x402   : > { %8428 = vmatprep.subr.bf16.mxu0 %v10732_v11  ;;  %8510 = vmatprep.subr.bf16.mxu1 %v10735_v13  ;;  %v11239_v0 = vpop.eup %11238 }
 0x403   : > { %v11241_v38 = vpop.eup %11240  ;;  %v6088_v9 = vmul.f32 %v11239_v0, %v10387_v42  ;;  %v10757_v42 = vld [vmem:[%s11894_s12 + $0x668] ss:$48 sps:$4 sm:$0xff]   ;;  %v10792_v0 = vld [vmem:[%s11894_s12 + $0x8a4] ss:$48 sps:$4 sm:$0xff]  }
 0x404   : > { %v11243_v4 = vpop.eup %11242  ;;  %v6087_v10 = vmul.f32 %v11241_v38, %v10386_v43  ;;  %v10762_v43 = vld [vmem:[%s11894_s12 + $0x6c4] ss:$48 sps:$4 sm:$0xff]   ;;  %v10793_v38 = vld [vmem:[%s11894_s12 + $0x8a8] ss:$48 sps:$4 sm:$0xff]  }
 0x405   : > { %8429 = vmatpush1.bf16.msra.mxu0 %v10730_v57  ;;  %8511 = vmatpush1.bf16.msra.mxu1 %v10733_v14 }
 0x406   : > { %8430 = vmatprep.subr.bf16.mxu0 %v10738_v17  ;;  %8512 = vmatprep.subr.bf16.mxu1 %v10741_v18  ;;  %v6089_v17 = vmul.f32 %v11243_v4, %v10388_v44  ;;  %v10765_v44 = vld [vmem:[%s11894_s12 + $0x6cc] ss:$48 sps:$4 sm:$0xff]  }
 0x407   : > { %v10801_v4 = vld [vmem:[%s11894_s12 + $0x90c] ss:$48 sps:$4 sm:$0xff]  }
 0x409   : > { %8431 = vmatpush1.bf16.msra.mxu0 %v10736_v20  ;;  %8513 = vmatpush1.bf16.msra.mxu1 %v10739_v21 }
 0x40a   : > { %8432 = vmatprep.subr.bf16.mxu0 %v10744_v22  ;;  %8514 = vmatprep.subr.bf16.mxu1 %v10747_v53 }
 0x40d   : > { %8433 = vmatpush1.bf16.msra.mxu0 %v10742_v59  ;;  %8515 = vmatpush1.bf16.msra.mxu1 %v10745_v26 }
 0x40e   : > { %8443 = vmatprep.subr.bf16.mxu0 %v10750_v27  ;;  %8525 = vmatprep.subr.bf16.mxu1 %v10753_v28 }
 0x4a3   : > { %v5813_v5 = vpop.f32.mrb[4].mxu0  ;;  %v6059_v8 = vpop.f32.mrb[4].mxu1 }
 0x4a4   : > { %v10389_v7 = vadd.f32 %v5813_v5, %v1179_v63  ;;  %v5815_v24 = vpop.f32.mrb[5].mxu0  ;;  %v10391_v11 = vadd.f32 %v6059_v8, %v1187_v39  ;;  %v6061_v57 = vpop.f32.mrb[5].mxu1  ;;  %v10787_v63 = vld [vmem:[%s11894_s12 + $0x848] ss:$48 sps:$4 sm:$0xff]   ;;  %v10795_v39 = vld [vmem:[%s11894_s12 + $0x8ac] ss:$48 sps:$4 sm:$0xff]  }
 0x4a5   : > { %v10390_v13 = vadd.f32 %v5815_v24, %v1183_v1  ;;  %v5817_v14 = vpop.f32.mrb[6].mxu0  ;;  %v10392_v20 = vadd.f32 %v6061_v57, %v1191_v3  ;;  %v6063_v21 = vpop.f32.mrb[6].mxu1  ;;  %v10790_v1 = vld [vmem:[%s11894_s12 + $0x8a0] ss:$48 sps:$4 sm:$0xff]   ;;  %v10798_v3 = vld [vmem:[%s11894_s12 + $0x904] ss:$48 sps:$4 sm:$0xff]  }
 0x4a6   : > { %v6090_v18 = vmul.f32 %v10389_v7, %v6086_v6  ;;  %v5818_v22 = vpop.f32.mrb[7].mxu0  ;;  %v12896_v53 = vmul.f32 %v10391_v11, %v6088_v9  ;;  %v6064_v26 = vpop.f32.mrb[7].mxu1  ;;  %v10796_v5 = vld [vmem:[%s11894_s12 + $0x900] ss:$48 sps:$4 sm:$0xff]   ;;  %v10799_v6 = vld [vmem:[%s11894_s12 + $0x908] ss:$48 sps:$4 sm:$0xff]  }
 0x4a7   : > { %v6091_v59 = vmul.f32 %v10390_v13, %v6087_v10  ;;  %v6093_v27 = vmul.f32 %v10392_v20, %v6089_v17  ;;  %v10804_v7 = vld [vmem:[%s11894_s12 + $0x964] ss:$48 sps:$4 sm:$0xff]   ;;  %v10807_v8 = vld [vmem:[%s11894_s12 + $0x96c] ss:$48 sps:$4 sm:$0xff]   ;;  %v10802_v24 = vld [vmem:[%s11894_s12 + $0x960] ss:$48 sps:$4 sm:$0xff]  }
 0x4a8   : > { %v12902_v36 = vpack.c.bf16 %v6090_v18, %v6090_v18  ;;  %v10805_v9 = vld [vmem:[%s11894_s12 + $0x968] ss:$48 sps:$4 sm:$0xff]   ;;  %v10810_v10 = vld [vmem:[%s11894_s12 + $0x9c4] ss:$48 sps:$4 sm:$0xff]   ;;  %v10813_v11 = vld [vmem:[%s11894_s12 + $0x9cc] ss:$48 sps:$4 sm:$0xff]  }
 0x4a9   : > { %v12898_v28 = vpack.c.bf16 %v6091_v59, %v6091_v59  ;;  %v12908_v41 = vpack.c.bf16 %v6093_v27, %v6093_v27  ;;  %v10808_v13 = vld [vmem:[%s11894_s12 + $0x9c0] ss:$48 sps:$4 sm:$0xff]   ;;  %v10811_v57 = vld [vmem:[%s11894_s12 + $0x9c8] ss:$48 sps:$4 sm:$0xff]   ;;  %v10816_v14 = vld [vmem:[%s11894_s12 + $0xa24] ss:$48 sps:$4 sm:$0xff]  }
 0x4aa   : > { %v10819_v17 = vld [vmem:[%s11894_s12 + $0xa2c] ss:$48 sps:$4 sm:$0xff]   ;;  %v10814_v18 = vld [vmem:[%s11894_s12 + $0xa20] ss:$48 sps:$4 sm:$0xff]   ;;  %v10817_v20 = vld [vmem:[%s11894_s12 + $0xa28] ss:$48 sps:$4 sm:$0xff]  }
 0x4ab   : > { %8434 = vmatprep.mubr.bf16.mxu0 %v12898_v28  ;;  %8516 = vmatprep.mubr.bf16.mxu1 %v12898_v28  ;;  %v10822_v21 = vld [vmem:[%s11894_s12 + $0xa84] ss:$48 sps:$4 sm:$0xff]   ;;  %v10825_v22 = vld [vmem:[%s11894_s12 + $0xa8c] ss:$48 sps:$4 sm:$0xff]   ;;  %v10820_v59 = vld [vmem:[%s11894_s12 + $0xa80] ss:$48 sps:$4 sm:$0xff]  }
 0x4ac   : > { %8435 = vmatmul.mubr.bf16.vlgmr.msra.gmra.mrb[8].mxu0 %v12902_v36  ;;  %8517 = vmatmul.mubr.bf16.vlgmr.msra.gmra.mrb[8].mxu1 %v12902_v36  ;;  %v10823_v26 = vld [vmem:[%s11894_s12 + $0xa88] ss:$48 sps:$4 sm:$0xff]   ;;  %v10828_v27 = vld [vmem:[%s11894_s12 + $0xae4] ss:$48 sps:$4 sm:$0xff]  }
 0x4ad   : > { %8444 = vmatpush1.bf16.msra.mxu0 %v10748_v29  ;;  %8526 = vmatpush1.bf16.msra.mxu1 %v10751_v32  ;;  %v10831_v29 = vld [vmem:[%s11894_s12 + $0xaec] ss:$48 sps:$4 sm:$0xff]   ;;  %v10826_v32 = vld [vmem:[%s11894_s12 + $0xae0] ss:$48 sps:$4 sm:$0xff]  }
 0x4ae   : > { %8475 = vmatprep.mubr.bf16.mxu0 %v12908_v41  ;;  %8557 = vmatprep.mubr.bf16.mxu1 %v12908_v41 }
 0x4af   : > { %8445 = vmatprep.subr.bf16.mxu0 %v10756_v37  ;;  %8527 = vmatprep.subr.bf16.mxu1 %v10759_v23  ;;  %v10829_v37 = vld [vmem:[%s11894_s12 + $0xae8] ss:$48 sps:$4 sm:$0xff]   ;;  %v10834_v23 = vld [vmem:[%s11894_s12 + $0xb44] ss:$48 sps:$4 sm:$0xff]  }
 0x4b1   : > { %8446 = vmatpush1.bf16.msra.mxu0 %v10754_v16  ;;  %8528 = vmatpush1.bf16.msra.mxu1 %v10757_v42  ;;  %v10837_v16 = vld [vmem:[%s11894_s12 + $0xb4c] ss:$48 sps:$4 sm:$0xff]   ;;  %v10832_v42 = vld [vmem:[%s11894_s12 + $0xb40] ss:$48 sps:$4 sm:$0xff]  }
 0x4b2   : > { %8447 = vmatprep.subr.bf16.mxu0 %v10762_v43  ;;  %8529 = vmatprep.subr.bf16.mxu1 %v10765_v44  ;;  %v10835_v43 = vld [vmem:[%s11894_s12 + $0xb48] ss:$48 sps:$4 sm:$0xff]   ;;  %v10840_v44 = vld [vmem:[%s11894_s12 + $0xba4] ss:$48 sps:$4 sm:$0xff]  }
 0x4b5   : > { %8448 = vmatpush1.bf16.msra.mxu0 %v10760_v45  ;;  %8530 = vmatpush1.bf16.msra.mxu1 %v10763_v47  ;;  %v10843_v45 = vld [vmem:[%s11894_s12 + $0xbac] ss:$48 sps:$4 sm:$0xff]   ;;  %v10838_v47 = vld [vmem:[%s11894_s12 + $0xba0] ss:$48 sps:$4 sm:$0xff]  }
 0x4b6   : > { %8449 = vmatprep.subr.bf16.mxu0 %v10768_v48  ;;  %8531 = vmatprep.subr.bf16.mxu1 %v10771_v49  ;;  %v10841_v48 = vld [vmem:[%s11894_s12 + $0xba8] ss:$48 sps:$4 sm:$0xff]   ;;  %v10846_v49 = vld [vmem:[%s11894_s12 + $0x14] ss:$48 sps:$4 sm:$0xff]  }
 0x4b9   : > { %8450 = vmatpush1.bf16.msra.mxu0 %v10766_v25  ;;  %8532 = vmatpush1.bf16.msra.mxu1 %v10769_v58  ;;  %v10849_v25 = vld [vmem:[%s11894_s12 + $0x1c] ss:$48 sps:$4 sm:$0xff]   ;;  %v10844_v58 = vld [vmem:[%s11894_s12 + $0x10] ss:$48 sps:$4 sm:$0xff]  }
 0x4ba   : > { %8451 = vmatprep.subr.bf16.mxu0 %v10774_v50  ;;  %8533 = vmatprep.subr.bf16.mxu1 %v10777_v51  ;;  %v12977_v50 = vpack.c.bf16 %v12896_v53, %v12896_v53  ;;  %v10847_v51 = vld [vmem:[%s11894_s12 + $0x18] ss:$48 sps:$4 sm:$0xff]  }
 0x4bb   : > { %v10853_v53 = vld [vmem:[%s11894_s12 + $0x78] ss:$48 sps:$4 sm:$0xff]  }
 0x4bd   : > { %8452 = vmatpush1.bf16.msra.mxu0 %v10772_v52  ;;  %8534 = vmatpush1.bf16.msra.mxu1 %v10775_v12  ;;  %v10852_v52 = vld [vmem:[%s11894_s12 + $0x74] ss:$48 sps:$4 sm:$0xff]   ;;  %v10855_v12 = vld [vmem:[%s11894_s12 + $0x7c] ss:$48 sps:$4 sm:$0xff]  }
 0x4be   : > { %8453 = vmatprep.subr.bf16.mxu0 %v10780_v54  ;;  %8535 = vmatprep.subr.bf16.mxu1 %v10783_v34  ;;  %v10850_v54 = vld [vmem:[%s11894_s12 + $0x70] ss:$48 sps:$4 sm:$0xff]   ;;  %v10858_v34 = vld [vmem:[%s11894_s12 + $0xd4] ss:$48 sps:$4 sm:$0xff]  }
 0x4c1   : > { %8454 = vmatpush1.bf16.msra.mxu0 %v10778_v55  ;;  %8536 = vmatpush1.bf16.msra.mxu1 %v10781_v35  ;;  %v10861_v55 = vld [vmem:[%s11894_s12 + $0xdc] ss:$48 sps:$4 sm:$0xff]   ;;  %v10856_v35 = vld [vmem:[%s11894_s12 + $0xd0] ss:$48 sps:$4 sm:$0xff]  }
 0x4c2   : > { %8455 = vmatprep.subr.bf16.mxu0 %v10786_v19  ;;  %8537 = vmatprep.subr.bf16.mxu1 %v10789_v40  ;;  %v10859_v19 = vld [vmem:[%s11894_s12 + $0xd8] ss:$48 sps:$4 sm:$0xff]   ;;  %v10864_v40 = vld [vmem:[%s11894_s12 + $0x134] ss:$48 sps:$4 sm:$0xff]  }
 0x4c5   : > { %8456 = vmatpush1.bf16.msra.mxu0 %v10784_v62  ;;  %8538 = vmatpush1.bf16.msra.mxu1 %v10787_v63  ;;  %v10867_v62 = vld [vmem:[%s11894_s12 + $0x13c] ss:$48 sps:$4 sm:$0xff]   ;;  %v10862_v63 = vld [vmem:[%s11894_s12 + $0x130] ss:$48 sps:$4 sm:$0xff]  }
 0x4c6   : > { %8457 = vmatprep.subr.bf16.mxu0 %v10792_v0  ;;  %8539 = vmatprep.subr.bf16.mxu1 %v10795_v39  ;;  %v10865_v0 = vld [vmem:[%s11894_s12 + $0x138] ss:$48 sps:$4 sm:$0xff]   ;;  %v10870_v39 = vld [vmem:[%s11894_s12 + $0x194] ss:$48 sps:$4 sm:$0xff]  }
 0x4c9   : > { %8458 = vmatpush1.bf16.msra.mxu0 %v10790_v1  ;;  %8540 = vmatpush1.bf16.msra.mxu1 %v10793_v38  ;;  %v10873_v1 = vld [vmem:[%s11894_s12 + $0x19c] ss:$48 sps:$4 sm:$0xff]   ;;  %v10868_v38 = vld [vmem:[%s11894_s12 + $0x190] ss:$48 sps:$4 sm:$0xff]  }
 0x4ca   : > { %8459 = vmatprep.subr.bf16.mxu0 %v10798_v3  ;;  %8541 = vmatprep.subr.bf16.mxu1 %v10801_v4  ;;  %v10871_v3 = vld [vmem:[%s11894_s12 + $0x198] ss:$48 sps:$4 sm:$0xff]   ;;  %v10876_v4 = vld [vmem:[%s11894_s12 + $0x1f4] ss:$48 sps:$4 sm:$0xff]  }
 0x4cd   : > { %8460 = vmatpush1.bf16.msra.mxu0 %v10796_v5  ;;  %8542 = vmatpush1.bf16.msra.mxu1 %v10799_v6  ;;  %v10879_v5 = vld [vmem:[%s11894_s12 + $0x1fc] ss:$48 sps:$4 sm:$0xff]   ;;  %v10874_v6 = vld [vmem:[%s11894_s12 + $0x1f0] ss:$48 sps:$4 sm:$0xff]  }
 0x4ce   : > { %8461 = vmatprep.subr.bf16.mxu0 %v10804_v7  ;;  %8543 = vmatprep.subr.bf16.mxu1 %v10807_v8  ;;  %v10877_v7 = vld [vmem:[%s11894_s12 + $0x1f8] ss:$48 sps:$4 sm:$0xff]   ;;  %v10882_v8 = vld [vmem:[%s11894_s12 + $0x254] ss:$48 sps:$4 sm:$0xff]  }
 0x4d1   : > { %8462 = vmatpush1.bf16.msra.mxu0 %v10802_v24  ;;  %8544 = vmatpush1.bf16.msra.mxu1 %v10805_v9  ;;  %v10885_v24 = vld [vmem:[%s11894_s12 + $0x25c] ss:$48 sps:$4 sm:$0xff]   ;;  %v10880_v9 = vld [vmem:[%s11894_s12 + $0x250] ss:$48 sps:$4 sm:$0xff]  }
 0x4d2   : > { %8463 = vmatprep.subr.bf16.mxu0 %v10810_v10  ;;  %8545 = vmatprep.subr.bf16.mxu1 %v10813_v11  ;;  %v10883_v10 = vld [vmem:[%s11894_s12 + $0x258] ss:$48 sps:$4 sm:$0xff]   ;;  %v10888_v11 = vld [vmem:[%s11894_s12 + $0x2b4] ss:$48 sps:$4 sm:$0xff]  }
 0x4d5   : > { %8464 = vmatpush1.bf16.msra.mxu0 %v10808_v13  ;;  %8546 = vmatpush1.bf16.msra.mxu1 %v10811_v57  ;;  %v10891_v13 = vld [vmem:[%s11894_s12 + $0x2bc] ss:$48 sps:$4 sm:$0xff]   ;;  %v10886_v57 = vld [vmem:[%s11894_s12 + $0x2b0] ss:$48 sps:$4 sm:$0xff]  }
 0x4d6   : > { %8465 = vmatprep.subr.bf16.mxu0 %v10816_v14  ;;  %8547 = vmatprep.subr.bf16.mxu1 %v10819_v17  ;;  %v10889_v14 = vld [vmem:[%s11894_s12 + $0x2b8] ss:$48 sps:$4 sm:$0xff]   ;;  %v10894_v17 = vld [vmem:[%s11894_s12 + $0x314] ss:$48 sps:$4 sm:$0xff]  }
 0x4d9   : > { %8466 = vmatpush1.bf16.msra.mxu0 %v10814_v18  ;;  %8548 = vmatpush1.bf16.msra.mxu1 %v10817_v20  ;;  %v10897_v18 = vld [vmem:[%s11894_s12 + $0x31c] ss:$48 sps:$4 sm:$0xff]   ;;  %v10892_v20 = vld [vmem:[%s11894_s12 + $0x310] ss:$48 sps:$4 sm:$0xff]  }
 0x4da   : > { %8467 = vmatprep.subr.bf16.mxu0 %v10822_v21  ;;  %8549 = vmatprep.subr.bf16.mxu1 %v10825_v22  ;;  %v10895_v21 = vld [vmem:[%s11894_s12 + $0x318] ss:$48 sps:$4 sm:$0xff]   ;;  %v10900_v22 = vld [vmem:[%s11894_s12 + $0x374] ss:$48 sps:$4 sm:$0xff]  }
 0x4dd   : > { %8468 = vmatpush1.bf16.msra.mxu0 %v10820_v59  ;;  %8550 = vmatpush1.bf16.msra.mxu1 %v10823_v26  ;;  %v10903_v59 = vld [vmem:[%s11894_s12 + $0x37c] ss:$48 sps:$4 sm:$0xff]   ;;  %v10898_v26 = vld [vmem:[%s11894_s12 + $0x370] ss:$48 sps:$4 sm:$0xff]  }
 0x4de   : > { %8469 = vmatprep.subr.bf16.mxu0 %v10828_v27  ;;  %8551 = vmatprep.subr.bf16.mxu1 %v10831_v29  ;;  %v10901_v27 = vld [vmem:[%s11894_s12 + $0x378] ss:$48 sps:$4 sm:$0xff]   ;;  %v10906_v29 = vld [vmem:[%s11894_s12 + $0x3d4] ss:$48 sps:$4 sm:$0xff]  }
 0x4e1   : > { %8470 = vmatpush1.bf16.msra.mxu0 %v10826_v32  ;;  %8552 = vmatpush1.bf16.msra.mxu1 %v10829_v37  ;;  %v10909_v32 = vld [vmem:[%s11894_s12 + $0x3dc] ss:$48 sps:$4 sm:$0xff]   ;;  %v10904_v37 = vld [vmem:[%s11894_s12 + $0x3d0] ss:$48 sps:$4 sm:$0xff]  }
 0x4e2   : > { %8471 = vmatprep.subr.bf16.mxu0 %v10834_v23  ;;  %8553 = vmatprep.subr.bf16.mxu1 %v10837_v16  ;;  %v10907_v23 = vld [vmem:[%s11894_s12 + $0x3d8] ss:$48 sps:$4 sm:$0xff]   ;;  %v10912_v16 = vld [vmem:[%s11894_s12 + $0x434] ss:$48 sps:$4 sm:$0xff]  }
 0x4e5   : > { %8472 = vmatpush1.bf16.msra.mxu0 %v10832_v42  ;;  %8554 = vmatpush1.bf16.msra.mxu1 %v10835_v43  ;;  %v10915_v42 = vld [vmem:[%s11894_s12 + $0x43c] ss:$48 sps:$4 sm:$0xff]   ;;  %v10910_v43 = vld [vmem:[%s11894_s12 + $0x430] ss:$48 sps:$4 sm:$0xff]  }
 0x4e6   : > { %8473 = vmatprep.subr.bf16.mxu0 %v10840_v44  ;;  %8555 = vmatprep.subr.bf16.mxu1 %v10843_v45  ;;  %v10913_v44 = vld [vmem:[%s11894_s12 + $0x438] ss:$48 sps:$4 sm:$0xff]   ;;  %v10918_v45 = vld [vmem:[%s11894_s12 + $0x494] ss:$48 sps:$4 sm:$0xff]  }
 0x4e9   : > { %8474 = vmatpush1.bf16.msra.mxu0 %v10838_v47  ;;  %8556 = vmatpush1.bf16.msra.mxu1 %v10841_v48  ;;  %v10921_v47 = vld [vmem:[%s11894_s12 + $0x49c] ss:$48 sps:$4 sm:$0xff]   ;;  %v10916_v48 = vld [vmem:[%s11894_s12 + $0x490] ss:$48 sps:$4 sm:$0xff]  }
 0x4ea   : > { %8566 = vmatprep.subr.bf16.mxu0 %v10846_v49  ;;  %8648 = vmatprep.subr.bf16.mxu1 %v10849_v25  ;;  %v10919_v49 = vld [vmem:[%s11894_s12 + $0x498] ss:$48 sps:$4 sm:$0xff]   ;;  %v10924_v25 = vld [vmem:[%s11894_s12 + $0x4f4] ss:$48 sps:$4 sm:$0xff]  }
 0x4ec   : > { %8476 = vmatmul.mubr.bf16.vlgmr.msra.gmra.mrb[8].mxu0 %v12977_v50  ;;  %8558 = vmatmul.mubr.bf16.vlgmr.msra.gmra.mrb[8].mxu1 %v12977_v50 }
 0x4ed   : > { %8567 = vmatpush1.bf16.msra.mxu0 %v10844_v58  ;;  %8598 = vmatprep.mubr.bf16.mxu0 %v12898_v28  ;;  %v10927_v58 = vld [vmem:[%s11894_s12 + $0x4fc] ss:$48 sps:$4 sm:$0xff]  }
 0x4ee   : > { %8649 = vmatpush1.bf16.msra.mxu1 %v10847_v51  ;;  %8680 = vmatprep.mubr.bf16.mxu1 %v12898_v28  ;;  %v10922_v51 = vld [vmem:[%s11894_s12 + $0x4f0] ss:$48 sps:$4 sm:$0xff]  }
 0x4ef   : > { %8568 = vmatprep.subr.bf16.mxu0 %v10852_v52  ;;  %8650 = vmatprep.subr.bf16.mxu1 %v10855_v12  ;;  %v10925_v52 = vld [vmem:[%s11894_s12 + $0x4f8] ss:$48 sps:$4 sm:$0xff]   ;;  %v10930_v12 = vld [vmem:[%s11894_s12 + $0x554] ss:$48 sps:$4 sm:$0xff]  }
 0x4f1   : > { %8569 = vmatpush1.bf16.msra.mxu0 %v10850_v54  ;;  %v10933_v54 = vld [vmem:[%s11894_s12 + $0x55c] ss:$48 sps:$4 sm:$0xff]  }
 0x4f2   : > { %8651 = vmatpush1.bf16.msra.mxu1 %v10853_v53  ;;  %8570 = vmatprep.subr.bf16.mxu0 %v10858_v34  ;;  %v10928_v53 = vld [vmem:[%s11894_s12 + $0x550] ss:$48 sps:$4 sm:$0xff]   ;;  %v10931_v34 = vld [vmem:[%s11894_s12 + $0x558] ss:$48 sps:$4 sm:$0xff]  }
 0x4f3   : > { %8652 = vmatprep.subr.bf16.mxu1 %v10861_v55  ;;  %v10936_v55 = vld [vmem:[%s11894_s12 + $0x5b4] ss:$48 sps:$4 sm:$0xff]  }
 0x4f5   : > { %8571 = vmatpush1.bf16.msra.mxu0 %v10856_v35  ;;  %v10939_v35 = vld [vmem:[%s11894_s12 + $0x5bc] ss:$48 sps:$4 sm:$0xff]  }
 0x4f6   : > { %8653 = vmatpush1.bf16.msra.mxu1 %v10859_v19  ;;  %8572 = vmatprep.subr.bf16.mxu0 %v10864_v40  ;;  %v10934_v19 = vld [vmem:[%s11894_s12 + $0x5b0] ss:$48 sps:$4 sm:$0xff]   ;;  %v10937_v40 = vld [vmem:[%s11894_s12 + $0x5b8] ss:$48 sps:$4 sm:$0xff]  }
 0x4f7   : > { %8654 = vmatprep.subr.bf16.mxu1 %v10867_v62  ;;  %v10942_v62 = vld [vmem:[%s11894_s12 + $0x614] ss:$48 sps:$4 sm:$0xff]  }
 0x4f9   : > { %8573 = vmatpush1.bf16.msra.mxu0 %v10862_v63  ;;  %v10945_v63 = vld [vmem:[%s11894_s12 + $0x61c] ss:$48 sps:$4 sm:$0xff]  }
 0x4fa   : > { %8655 = vmatpush1.bf16.msra.mxu1 %v10865_v0  ;;  %8574 = vmatprep.subr.bf16.mxu0 %v10870_v39  ;;  %v10940_v0 = vld [vmem:[%s11894_s12 + $0x610] ss:$48 sps:$4 sm:$0xff]   ;;  %v10943_v39 = vld [vmem:[%s11894_s12 + $0x618] ss:$48 sps:$4 sm:$0xff]  }
 0x4fb   : > { %8656 = vmatprep.subr.bf16.mxu1 %v10873_v1  ;;  %v10948_v1 = vld [vmem:[%s11894_s12 + $0x674] ss:$48 sps:$4 sm:$0xff]  }
 0x4fd   : > { %8575 = vmatpush1.bf16.msra.mxu0 %v10868_v38  ;;  %v10951_v38 = vld [vmem:[%s11894_s12 + $0x67c] ss:$48 sps:$4 sm:$0xff]  }
 0x4fe   : > { %8657 = vmatpush1.bf16.msra.mxu1 %v10871_v3  ;;  %8576 = vmatprep.subr.bf16.mxu0 %v10876_v4  ;;  %v10946_v3 = vld [vmem:[%s11894_s12 + $0x670] ss:$48 sps:$4 sm:$0xff]   ;;  %v10949_v4 = vld [vmem:[%s11894_s12 + $0x678] ss:$48 sps:$4 sm:$0xff]  }
 0x4ff   : > { %8658 = vmatprep.subr.bf16.mxu1 %v10879_v5  ;;  %v10954_v5 = vld [vmem:[%s11894_s12 + $0x6d4] ss:$48 sps:$4 sm:$0xff]  }
 0x501   : > { %8577 = vmatpush1.bf16.msra.mxu0 %v10874_v6  ;;  %v10957_v6 = vld [vmem:[%s11894_s12 + $0x6dc] ss:$48 sps:$4 sm:$0xff]  }
 0x502   : > { %8659 = vmatpush1.bf16.msra.mxu1 %v10877_v7  ;;  %8578 = vmatprep.subr.bf16.mxu0 %v10882_v8  ;;  %v10952_v7 = vld [vmem:[%s11894_s12 + $0x6d0] ss:$48 sps:$4 sm:$0xff]   ;;  %v10955_v8 = vld [vmem:[%s11894_s12 + $0x6d8] ss:$48 sps:$4 sm:$0xff]  }
 0x503   : > { %8660 = vmatprep.subr.bf16.mxu1 %v10885_v24  ;;  %v10960_v24 = vld [vmem:[%s11894_s12 + $0x734] ss:$48 sps:$4 sm:$0xff]  }
 0x505   : > { %8579 = vmatpush1.bf16.msra.mxu0 %v10880_v9  ;;  %v10963_v9 = vld [vmem:[%s11894_s12 + $0x73c] ss:$48 sps:$4 sm:$0xff]  }
 0x506   : > { %8661 = vmatpush1.bf16.msra.mxu1 %v10883_v10  ;;  %8580 = vmatprep.subr.bf16.mxu0 %v10888_v11  ;;  %v10958_v10 = vld [vmem:[%s11894_s12 + $0x730] ss:$48 sps:$4 sm:$0xff]   ;;  %v10961_v11 = vld [vmem:[%s11894_s12 + $0x738] ss:$48 sps:$4 sm:$0xff]  }
 0x507   : > { %8662 = vmatprep.subr.bf16.mxu1 %v10891_v13  ;;  %v10966_v13 = vld [vmem:[%s11894_s12 + $0x794] ss:$48 sps:$4 sm:$0xff]  }
 0x509   : > { %8581 = vmatpush1.bf16.msra.mxu0 %v10886_v57  ;;  %v10969_v57 = vld [vmem:[%s11894_s12 + $0x79c] ss:$48 sps:$4 sm:$0xff]  }
 0x50a   : > { %8663 = vmatpush1.bf16.msra.mxu1 %v10889_v14  ;;  %8582 = vmatprep.subr.bf16.mxu0 %v10894_v17  ;;  %v10964_v14 = vld [vmem:[%s11894_s12 + $0x790] ss:$48 sps:$4 sm:$0xff]   ;;  %v10967_v17 = vld [vmem:[%s11894_s12 + $0x798] ss:$48 sps:$4 sm:$0xff]  }
 0x50b   : > { %8664 = vmatprep.subr.bf16.mxu1 %v10897_v18  ;;  %v10972_v18 = vld [vmem:[%s11894_s12 + $0x7f4] ss:$48 sps:$4 sm:$0xff]  }
 0x50d   : > { %8583 = vmatpush1.bf16.msra.mxu0 %v10892_v20  ;;  %v10975_v20 = vld [vmem:[%s11894_s12 + $0x7fc] ss:$48 sps:$4 sm:$0xff]  }
 0x50e   : > { %8665 = vmatpush1.bf16.msra.mxu1 %v10895_v21  ;;  %8584 = vmatprep.subr.bf16.mxu0 %v10900_v22  ;;  %v10970_v21 = vld [vmem:[%s11894_s12 + $0x7f0] ss:$48 sps:$4 sm:$0xff]   ;;  %v10973_v22 = vld [vmem:[%s11894_s12 + $0x7f8] ss:$48 sps:$4 sm:$0xff]  }
 0x50f   : > { %8666 = vmatprep.subr.bf16.mxu1 %v10903_v59  ;;  %v10978_v59 = vld [vmem:[%s11894_s12 + $0x854] ss:$48 sps:$4 sm:$0xff]  }
 0x511   : > { %8585 = vmatpush1.bf16.msra.mxu0 %v10898_v26  ;;  %v10981_v26 = vld [vmem:[%s11894_s12 + $0x85c] ss:$48 sps:$4 sm:$0xff]  }
 0x512   : > { %8667 = vmatpush1.bf16.msra.mxu1 %v10901_v27  ;;  %8586 = vmatprep.subr.bf16.mxu0 %v10906_v29  ;;  %v10976_v27 = vld [vmem:[%s11894_s12 + $0x850] ss:$48 sps:$4 sm:$0xff]   ;;  %v10979_v29 = vld [vmem:[%s11894_s12 + $0x858] ss:$48 sps:$4 sm:$0xff]  }
 0x513   : > { %8668 = vmatprep.subr.bf16.mxu1 %v10909_v32  ;;  %v10984_v32 = vld [vmem:[%s11894_s12 + $0x8b4] ss:$48 sps:$4 sm:$0xff]  }
 0x515   : > { %8587 = vmatpush1.bf16.msra.mxu0 %v10904_v37  ;;  %v10987_v37 = vld [vmem:[%s11894_s12 + $0x8bc] ss:$48 sps:$4 sm:$0xff]  }
 0x516   : > { %8669 = vmatpush1.bf16.msra.mxu1 %v10907_v23  ;;  %8588 = vmatprep.subr.bf16.mxu0 %v10912_v16  ;;  %v10982_v23 = vld [vmem:[%s11894_s12 + $0x8b0] ss:$48 sps:$4 sm:$0xff]   ;;  %v10985_v16 = vld [vmem:[%s11894_s12 + $0x8b8] ss:$48 sps:$4 sm:$0xff]  }
 0x517   : > { %8670 = vmatprep.subr.bf16.mxu1 %v10915_v42  ;;  %v10990_v42 = vld [vmem:[%s11894_s12 + $0x914] ss:$48 sps:$4 sm:$0xff]  }
 0x519   : > { %8589 = vmatpush1.bf16.msra.mxu0 %v10910_v43  ;;  %v10993_v43 = vld [vmem:[%s11894_s12 + $0x91c] ss:$48 sps:$4 sm:$0xff]  }
 0x51a   : > { %8671 = vmatpush1.bf16.msra.mxu1 %v10913_v44  ;;  %8590 = vmatprep.subr.bf16.mxu0 %v10918_v45  ;;  %v10988_v44 = vld [vmem:[%s11894_s12 + $0x910] ss:$48 sps:$4 sm:$0xff]   ;;  %v10991_v45 = vld [vmem:[%s11894_s12 + $0x918] ss:$48 sps:$4 sm:$0xff]  }
 0x51b   : > { %8672 = vmatprep.subr.bf16.mxu1 %v10921_v47  ;;  %v10996_v47 = vld [vmem:[%s11894_s12 + $0x974] ss:$48 sps:$4 sm:$0xff]  }
 0x51d   : > { %8591 = vmatpush1.bf16.msra.mxu0 %v10916_v48  ;;  %v10999_v48 = vld [vmem:[%s11894_s12 + $0x97c] ss:$48 sps:$4 sm:$0xff]  }
 0x51e   : > { %8673 = vmatpush1.bf16.msra.mxu1 %v10919_v49  ;;  %8592 = vmatprep.subr.bf16.mxu0 %v10924_v25  ;;  %v10994_v49 = vld [vmem:[%s11894_s12 + $0x970] ss:$48 sps:$4 sm:$0xff]   ;;  %v10997_v25 = vld [vmem:[%s11894_s12 + $0x978] ss:$48 sps:$4 sm:$0xff]  }
 0x51f   : > { %8674 = vmatprep.subr.bf16.mxu1 %v10927_v58  ;;  %v11002_v58 = vld [vmem:[%s11894_s12 + $0x9d4] ss:$48 sps:$4 sm:$0xff]  }
 0x521   : > { %8593 = vmatpush1.bf16.msra.mxu0 %v10922_v51  ;;  %v11005_v51 = vld [vmem:[%s11894_s12 + $0x9dc] ss:$48 sps:$4 sm:$0xff]  }
 0x522   : > { %8675 = vmatpush1.bf16.msra.mxu1 %v10925_v52  ;;  %8594 = vmatprep.subr.bf16.mxu0 %v10930_v12  ;;  %v11000_v52 = vld [vmem:[%s11894_s12 + $0x9d0] ss:$48 sps:$4 sm:$0xff]   ;;  %v11003_v12 = vld [vmem:[%s11894_s12 + $0x9d8] ss:$48 sps:$4 sm:$0xff]  }
 0x523   : > { %8676 = vmatprep.subr.bf16.mxu1 %v10933_v54  ;;  %v11008_v54 = vld [vmem:[%s11894_s12 + $0xa34] ss:$48 sps:$4 sm:$0xff]  }
 0x525   : > { %8595 = vmatpush1.bf16.msra.mxu0 %v10928_v53  ;;  %v11011_v53 = vld [vmem:[%s11894_s12 + $0xa3c] ss:$48 sps:$4 sm:$0xff]  }
 0x526   : > { %8677 = vmatpush1.bf16.msra.mxu1 %v10931_v34  ;;  %8596 = vmatprep.subr.bf16.mxu0 %v10936_v55  ;;  %v11006_v34 = vld [vmem:[%s11894_s12 + $0xa30] ss:$48 sps:$4 sm:$0xff]   ;;  %v11009_v55 = vld [vmem:[%s11894_s12 + $0xa38] ss:$48 sps:$4 sm:$0xff]  }
 0x527   : > { %8678 = vmatprep.subr.bf16.mxu1 %v10939_v35  ;;  %v11014_v35 = vld [vmem:[%s11894_s12 + $0xa94] ss:$48 sps:$4 sm:$0xff]  }
 0x529   : > { %8597 = vmatpush1.bf16.msra.mxu0 %v10934_v19  ;;  %v11017_v19 = vld [vmem:[%s11894_s12 + $0xa9c] ss:$48 sps:$4 sm:$0xff]  }
 0x52a   : > { %8679 = vmatpush1.bf16.msra.mxu1 %v10937_v40  ;;  %8607 = vmatprep.subr.bf16.mxu0 %v10942_v62  ;;  %v11012_v40 = vld [vmem:[%s11894_s12 + $0xa90] ss:$48 sps:$4 sm:$0xff]   ;;  %v11015_v62 = vld [vmem:[%s11894_s12 + $0xa98] ss:$48 sps:$4 sm:$0xff]  }
 0x52b   : > { %8689 = vmatprep.subr.bf16.mxu1 %v10945_v63  ;;  %v11020_v63 = vld [vmem:[%s11894_s12 + $0xaf4] ss:$48 sps:$4 sm:$0xff]  }
 0x52c   : > { %8599 = vmatmul.mubr.bf16.vlgmr.msra.gmra.mrb[12].mxu0 %v12902_v36 }
 0x52d   : > { %8681 = vmatmul.mubr.bf16.vlgmr.msra.gmra.mrb[12].mxu1 %v12902_v36  ;;  %8608 = vmatpush1.bf16.msra.mxu0 %v10940_v0  ;;  %v11023_v0 = vld [vmem:[%s11894_s12 + $0xafc] ss:$48 sps:$4 sm:$0xff]  }
 0x52e   : > { %8639 = vmatprep.mubr.bf16.mxu0 %v12908_v41  ;;  %8690 = vmatpush1.bf16.msra.mxu1 %v10943_v39  ;;  %v11018_v39 = vld [vmem:[%s11894_s12 + $0xaf0] ss:$48 sps:$4 sm:$0xff]  }
 0x52f   : > { %8721 = vmatprep.mubr.bf16.mxu1 %v12908_v41  ;;  %8609 = vmatprep.subr.bf16.mxu0 %v10948_v1  ;;  %v11021_v1 = vld [vmem:[%s11894_s12 + $0xaf8] ss:$48 sps:$4 sm:$0xff]  }
 0x530   : > { %8691 = vmatprep.subr.bf16.mxu1 %v10951_v38  ;;  %v11026_v38 = vld [vmem:[%s11894_s12 + $0xb54] ss:$48 sps:$4 sm:$0xff]  }
 0x531   : > { %8610 = vmatpush1.bf16.msra.mxu0 %v10946_v3  ;;  %v11029_v3 = vld [vmem:[%s11894_s12 + $0xb5c] ss:$48 sps:$4 sm:$0xff]  }
 0x532   : > { %8692 = vmatpush1.bf16.msra.mxu1 %v10949_v4  ;;  %8611 = vmatprep.subr.bf16.mxu0 %v10954_v5  ;;  %v11024_v4 = vld [vmem:[%s11894_s12 + $0xb50] ss:$48 sps:$4 sm:$0xff]   ;;  %v11027_v5 = vld [vmem:[%s11894_s12 + $0xb58] ss:$48 sps:$4 sm:$0xff]  }
 0x533   : > { %8693 = vmatprep.subr.bf16.mxu1 %v10957_v6  ;;  %v11032_v6 = vld [vmem:[%s11894_s12 + $0xbb4] ss:$48 sps:$4 sm:$0xff]  }
 0x535   : > { %8612 = vmatpush1.bf16.msra.mxu0 %v10952_v7  ;;  %v11035_v7 = vld [vmem:[%s11894_s12 + $0xbbc] ss:$48 sps:$4 sm:$0xff]  }
 0x536   : > { %8694 = vmatpush1.bf16.msra.mxu1 %v10955_v8  ;;  %8613 = vmatprep.subr.bf16.mxu0 %v10960_v24  ;;  %v11030_v8 = vld [vmem:[%s11894_s12 + $0xbb0] ss:$48 sps:$4 sm:$0xff]   ;;  %v11033_v24 = vld [vmem:[%s11894_s12 + $0xbb8] ss:$48 sps:$4 sm:$0xff]  }
 0x537   : > { %8695 = vmatprep.subr.bf16.mxu1 %v10963_v9  ;;  %v11038_v9 = vld [vmem:[%s11894_s12 + $0x24] ss:$48 sps:$4 sm:$0xff]  }
 0x539   : > { %8614 = vmatpush1.bf16.msra.mxu0 %v10958_v10  ;;  %v11041_v10 = vld [vmem:[%s11894_s12 + $0x2c] ss:$48 sps:$4 sm:$0xff]  }
 0x53a   : > { %8696 = vmatpush1.bf16.msra.mxu1 %v10961_v11  ;;  %8615 = vmatprep.subr.bf16.mxu0 %v10966_v13  ;;  %v11036_v11 = vld [vmem:[%s11894_s12 + $0x20] ss:$48 sps:$4 sm:$0xff]   ;;  %v11039_v13 = vld [vmem:[%s11894_s12 + $0x28] ss:$48 sps:$4 sm:$0xff]  }
 0x53b   : > { %8697 = vmatprep.subr.bf16.mxu1 %v10969_v57  ;;  %v11044_v57 = vld [vmem:[%s11894_s12 + $0x84] ss:$48 sps:$4 sm:$0xff]  }
 0x53d   : > { %8616 = vmatpush1.bf16.msra.mxu0 %v10964_v14  ;;  %v11047_v14 = vld [vmem:[%s11894_s12 + $0x8c] ss:$48 sps:$4 sm:$0xff]  }
 0x53e   : > { %8698 = vmatpush1.bf16.msra.mxu1 %v10967_v17  ;;  %8617 = vmatprep.subr.bf16.mxu0 %v10972_v18  ;;  %v11042_v17 = vld [vmem:[%s11894_s12 + $0x80] ss:$48 sps:$4 sm:$0xff]   ;;  %v11045_v18 = vld [vmem:[%s11894_s12 + $0x88] ss:$48 sps:$4 sm:$0xff]  }
 0x53f   : > { %8699 = vmatprep.subr.bf16.mxu1 %v10975_v20  ;;  %v11050_v20 = vld [vmem:[%s11894_s12 + $0xe4] ss:$48 sps:$4 sm:$0xff]  }
 0x541   : > { %8618 = vmatpush1.bf16.msra.mxu0 %v10970_v21  ;;  %v11053_v21 = vld [vmem:[%s11894_s12 + $0xec] ss:$48 sps:$4 sm:$0xff]  }
 0x542   : > { %8700 = vmatpush1.bf16.msra.mxu1 %v10973_v22  ;;  %8619 = vmatprep.subr.bf16.mxu0 %v10978_v59  ;;  %v11048_v22 = vld [vmem:[%s11894_s12 + $0xe0] ss:$48 sps:$4 sm:$0xff]   ;;  %v11051_v59 = vld [vmem:[%s11894_s12 + $0xe8] ss:$48 sps:$4 sm:$0xff]  }
 0x543   : > { %8701 = vmatprep.subr.bf16.mxu1 %v10981_v26  ;;  %v11056_v26 = vld [vmem:[%s11894_s12 + $0x144] ss:$48 sps:$4 sm:$0xff]  }
 0x545   : > { %8620 = vmatpush1.bf16.msra.mxu0 %v10976_v27  ;;  %v11059_v27 = vld [vmem:[%s11894_s12 + $0x14c] ss:$48 sps:$4 sm:$0xff]  }
 0x546   : > { %8702 = vmatpush1.bf16.msra.mxu1 %v10979_v29  ;;  %8621 = vmatprep.subr.bf16.mxu0 %v10984_v32  ;;  %v11057_v29 = vld [vmem:[%s11894_s12 + $0x148] ss:$48 sps:$4 sm:$0xff]   ;;  %v11062_v32 = vld [vmem:[%s11894_s12 + $0x1a4] ss:$48 sps:$4 sm:$0xff]  }
 0x547   : > { %8703 = vmatprep.subr.bf16.mxu1 %v10987_v37  ;;  %v11065_v37 = vld [vmem:[%s11894_s12 + $0x1ac] ss:$48 sps:$4 sm:$0xff]  }
 0x549   : > { %8622 = vmatpush1.bf16.msra.mxu0 %v10982_v23  ;;  %v11060_v23 = vld [vmem:[%s11894_s12 + $0x1a0] ss:$48 sps:$4 sm:$0xff]  }
 0x54a   : > { %8704 = vmatpush1.bf16.msra.mxu1 %v10985_v16  ;;  %8623 = vmatprep.subr.bf16.mxu0 %v10990_v42  ;;  %v11063_v16 = vld [vmem:[%s11894_s12 + $0x1a8] ss:$48 sps:$4 sm:$0xff]   ;;  %v11068_v42 = vld [vmem:[%s11894_s12 + $0x204] ss:$48 sps:$4 sm:$0xff]  }
 0x54b   : > { %8705 = vmatprep.subr.bf16.mxu1 %v10993_v43  ;;  %v11071_v43 = vld [vmem:[%s11894_s12 + $0x20c] ss:$48 sps:$4 sm:$0xff]  }
 0x54d   : > { %8624 = vmatpush1.bf16.msra.mxu0 %v10988_v44  ;;  %v11066_v44 = vld [vmem:[%s11894_s12 + $0x200] ss:$48 sps:$4 sm:$0xff]  }
 0x54e   : > { %8706 = vmatpush1.bf16.msra.mxu1 %v10991_v45  ;;  %8625 = vmatprep.subr.bf16.mxu0 %v10996_v47  ;;  %v11069_v45 = vld [vmem:[%s11894_s12 + $0x208] ss:$48 sps:$4 sm:$0xff]   ;;  %v11074_v47 = vld [vmem:[%s11894_s12 + $0x264] ss:$48 sps:$4 sm:$0xff]  }
 0x54f   : > { %8707 = vmatprep.subr.bf16.mxu1 %v10999_v48  ;;  %v11077_v48 = vld [vmem:[%s11894_s12 + $0x26c] ss:$48 sps:$4 sm:$0xff]  }
 0x551   : > { %8626 = vmatpush1.bf16.msra.mxu0 %v10994_v49  ;;  %v11072_v49 = vld [vmem:[%s11894_s12 + $0x260] ss:$48 sps:$4 sm:$0xff]  }
 0x552   : > { %8708 = vmatpush1.bf16.msra.mxu1 %v10997_v25  ;;  %8627 = vmatprep.subr.bf16.mxu0 %v11002_v58  ;;  %v11075_v25 = vld [vmem:[%s11894_s12 + $0x268] ss:$48 sps:$4 sm:$0xff]   ;;  %v11080_v58 = vld [vmem:[%s11894_s12 + $0x2c4] ss:$48 sps:$4 sm:$0xff]  }
 0x553   : > { %8709 = vmatprep.subr.bf16.mxu1 %v11005_v51  ;;  %v11083_v51 = vld [vmem:[%s11894_s12 + $0x2cc] ss:$48 sps:$4 sm:$0xff]  }
 0x555   : > { %8628 = vmatpush1.bf16.msra.mxu0 %v11000_v52  ;;  %v11078_v52 = vld [vmem:[%s11894_s12 + $0x2c0] ss:$48 sps:$4 sm:$0xff]  }
 0x556   : > { %8710 = vmatpush1.bf16.msra.mxu1 %v11003_v12  ;;  %8629 = vmatprep.subr.bf16.mxu0 %v11008_v54  ;;  %v11081_v12 = vld [vmem:[%s11894_s12 + $0x2c8] ss:$48 sps:$4 sm:$0xff]   ;;  %v11086_v54 = vld [vmem:[%s11894_s12 + $0x324] ss:$48 sps:$4 sm:$0xff]  }
 0x557   : > { %8711 = vmatprep.subr.bf16.mxu1 %v11011_v53  ;;  %v11089_v53 = vld [vmem:[%s11894_s12 + $0x32c] ss:$48 sps:$4 sm:$0xff]  }
 0x559   : > { %8630 = vmatpush1.bf16.msra.mxu0 %v11006_v34  ;;  %v11084_v34 = vld [vmem:[%s11894_s12 + $0x320] ss:$48 sps:$4 sm:$0xff]  }
 0x55a   : > { %8712 = vmatpush1.bf16.msra.mxu1 %v11009_v55  ;;  %8631 = vmatprep.subr.bf16.mxu0 %v11014_v35  ;;  %v11087_v55 = vld [vmem:[%s11894_s12 + $0x328] ss:$48 sps:$4 sm:$0xff]   ;;  %v11092_v35 = vld [vmem:[%s11894_s12 + $0x384] ss:$48 sps:$4 sm:$0xff]  }
 0x55b   : > { %8713 = vmatprep.subr.bf16.mxu1 %v11017_v19  ;;  %v11095_v19 = vld [vmem:[%s11894_s12 + $0x38c] ss:$48 sps:$4 sm:$0xff]  }
 0x55d   : > { %8632 = vmatpush1.bf16.msra.mxu0 %v11012_v40  ;;  %v11090_v40 = vld [vmem:[%s11894_s12 + $0x380] ss:$48 sps:$4 sm:$0xff]  }
 0x55e   : > { %8714 = vmatpush1.bf16.msra.mxu1 %v11015_v62  ;;  %8633 = vmatprep.subr.bf16.mxu0 %v11020_v63  ;;  %v11093_v62 = vld [vmem:[%s11894_s12 + $0x388] ss:$48 sps:$4 sm:$0xff]   ;;  %v11098_v63 = vld [vmem:[%s11894_s12 + $0x3e4] ss:$48 sps:$4 sm:$0xff]  }
 0x55f   : > { %8715 = vmatprep.subr.bf16.mxu1 %v11023_v0  ;;  %v11101_v0 = vld [vmem:[%s11894_s12 + $0x3ec] ss:$48 sps:$4 sm:$0xff]  }
 0x561   : > { %8634 = vmatpush1.bf16.msra.mxu0 %v11018_v39  ;;  %v11096_v39 = vld [vmem:[%s11894_s12 + $0x3e0] ss:$48 sps:$4 sm:$0xff]  }
 0x562   : > { %8716 = vmatpush1.bf16.msra.mxu1 %v11021_v1  ;;  %8635 = vmatprep.subr.bf16.mxu0 %v11026_v38  ;;  %v11099_v1 = vld [vmem:[%s11894_s12 + $0x3e8] ss:$48 sps:$4 sm:$0xff]   ;;  %v11104_v38 = vld [vmem:[%s11894_s12 + $0x444] ss:$48 sps:$4 sm:$0xff]  }
 0x563   : > { %8717 = vmatprep.subr.bf16.mxu1 %v11029_v3  ;;  %v11107_v3 = vld [vmem:[%s11894_s12 + $0x44c] ss:$48 sps:$4 sm:$0xff]  }
 0x565   : > { %8636 = vmatpush1.bf16.msra.mxu0 %v11024_v4  ;;  %v11102_v4 = vld [vmem:[%s11894_s12 + $0x440] ss:$48 sps:$4 sm:$0xff]  }
 0x566   : > { %8718 = vmatpush1.bf16.msra.mxu1 %v11027_v5  ;;  %8637 = vmatprep.subr.bf16.mxu0 %v11032_v6  ;;  %v11105_v5 = vld [vmem:[%s11894_s12 + $0x448] ss:$48 sps:$4 sm:$0xff]   ;;  %v11110_v6 = vld [vmem:[%s11894_s12 + $0x4a4] ss:$48 sps:$4 sm:$0xff]  }
 0x567   : > { %8719 = vmatprep.subr.bf16.mxu1 %v11035_v7  ;;  %v11113_v7 = vld [vmem:[%s11894_s12 + $0x4ac] ss:$48 sps:$4 sm:$0xff]  }
 0x569   : > { %8638 = vmatpush1.bf16.msra.mxu0 %v11030_v8  ;;  %v11108_v8 = vld [vmem:[%s11894_s12 + $0x4a0] ss:$48 sps:$4 sm:$0xff]  }
 0x56a   : > { %8720 = vmatpush1.bf16.msra.mxu1 %v11033_v24  ;;  %8730 = vmatprep.subr.bf16.mxu0 %v11038_v9  ;;  %v11111_v24 = vld [vmem:[%s11894_s12 + $0x4a8] ss:$48 sps:$4 sm:$0xff]   ;;  %v11116_v9 = vld [vmem:[%s11894_s12 + $0x504] ss:$48 sps:$4 sm:$0xff]  }
 0x56b   : > { %8812 = vmatprep.subr.bf16.mxu1 %v11041_v10  ;;  %v11119_v10 = vld [vmem:[%s11894_s12 + $0x50c] ss:$48 sps:$4 sm:$0xff]  }
 0x56c   : > { %8640 = vmatmul.mubr.bf16.vlgmr.msra.gmra.mrb[12].mxu0 %v12977_v50 }
 0x56d   : > { %8722 = vmatmul.mubr.bf16.vlgmr.msra.gmra.mrb[12].mxu1 %v12977_v50  ;;  %8731 = vmatpush1.bf16.msra.mxu0 %v11036_v11  ;;  %v11114_v11 = vld [vmem:[%s11894_s12 + $0x500] ss:$48 sps:$4 sm:$0xff]  }
 0x56e   : > { %8762 = vmatprep.mubr.bf16.mxu0 %v12898_v28  ;;  %8813 = vmatpush1.bf16.msra.mxu1 %v11039_v13  ;;  %v11117_v13 = vld [vmem:[%s11894_s12 + $0x508] ss:$48 sps:$4 sm:$0xff]  }
 0x56f   : > { %8844 = vmatprep.mubr.bf16.mxu1 %v12898_v28  ;;  %8732 = vmatprep.subr.bf16.mxu0 %v11044_v57  ;;  %v11054_v28 = vld [vmem:[%s11894_s12 + $0x140] ss:$48 sps:$4 sm:$0xff]   ;;  %v11122_v57 = vld [vmem:[%s11894_s12 + $0x564] ss:$48 sps:$4 sm:$0xff]  }
 0x570   : > { %8814 = vmatprep.subr.bf16.mxu1 %v11047_v14  ;;  %v11125_v14 = vld [vmem:[%s11894_s12 + $0x56c] ss:$48 sps:$4 sm:$0xff]  }
 0x571   : > { %8733 = vmatpush1.bf16.msra.mxu0 %v11042_v17  ;;  %v11120_v17 = vld [vmem:[%s11894_s12 + $0x560] ss:$48 sps:$4 sm:$0xff]  }
 0x572   : > { %8815 = vmatpush1.bf16.msra.mxu1 %v11045_v18  ;;  %8734 = vmatprep.subr.bf16.mxu0 %v11050_v20  ;;  %v11123_v18 = vld [vmem:[%s11894_s12 + $0x568] ss:$48 sps:$4 sm:$0xff]   ;;  %v11128_v20 = vld [vmem:[%s11894_s12 + $0x5c4] ss:$48 sps:$4 sm:$0xff]  }
 0x573   : > { %8816 = vmatprep.subr.bf16.mxu1 %v11053_v21  ;;  %v11131_v21 = vld [vmem:[%s11894_s12 + $0x5cc] ss:$48 sps:$4 sm:$0xff]  }
 0x575   : > { %8735 = vmatpush1.bf16.msra.mxu0 %v11048_v22  ;;  %v11126_v22 = vld [vmem:[%s11894_s12 + $0x5c0] ss:$48 sps:$4 sm:$0xff]  }
 0x576   : > { %8817 = vmatpush1.bf16.msra.mxu1 %v11051_v59  ;;  %8736 = vmatprep.subr.bf16.mxu0 %v11056_v26  ;;  %v11129_v59 = vld [vmem:[%s11894_s12 + $0x5c8] ss:$48 sps:$4 sm:$0xff]   ;;  %v11134_v26 = vld [vmem:[%s11894_s12 + $0x624] ss:$48 sps:$4 sm:$0xff]  }
 0x577   : > { %8818 = vmatprep.subr.bf16.mxu1 %v11059_v27  ;;  %v11137_v27 = vld [vmem:[%s11894_s12 + $0x62c] ss:$48 sps:$4 sm:$0xff]  }
 0x579   : > { %8737 = vmatpush1.bf16.msra.mxu0 %v11054_v28  ;;  %v11132_v28 = vld [vmem:[%s11894_s12 + $0x620] ss:$48 sps:$4 sm:$0xff]  }
 0x57a   : > { %8819 = vmatpush1.bf16.msra.mxu1 %v11057_v29  ;;  %8738 = vmatprep.subr.bf16.mxu0 %v11062_v32  ;;  %v11135_v29 = vld [vmem:[%s11894_s12 + $0x628] ss:$48 sps:$4 sm:$0xff]   ;;  %v11140_v32 = vld [vmem:[%s11894_s12 + $0x684] ss:$48 sps:$4 sm:$0xff]  }
 0x57b   : > { %8820 = vmatprep.subr.bf16.mxu1 %v11065_v37  ;;  %v11143_v37 = vld [vmem:[%s11894_s12 + $0x68c] ss:$48 sps:$4 sm:$0xff]  }
 0x57d   : > { %8739 = vmatpush1.bf16.msra.mxu0 %v11060_v23  ;;  %v11138_v23 = vld [vmem:[%s11894_s12 + $0x680] ss:$48 sps:$4 sm:$0xff]  }
 0x57e   : > { %8821 = vmatpush1.bf16.msra.mxu1 %v11063_v16  ;;  %8740 = vmatprep.subr.bf16.mxu0 %v11068_v42  ;;  %v11141_v16 = vld [vmem:[%s11894_s12 + $0x688] ss:$48 sps:$4 sm:$0xff]   ;;  %v11146_v42 = vld [vmem:[%s11894_s12 + $0x6e4] ss:$48 sps:$4 sm:$0xff]  }
 0x57f   : > { %8822 = vmatprep.subr.bf16.mxu1 %v11071_v43  ;;  %v11149_v43 = vld [vmem:[%s11894_s12 + $0x6ec] ss:$48 sps:$4 sm:$0xff]  }
 0x581   : > { %8741 = vmatpush1.bf16.msra.mxu0 %v11066_v44  ;;  %v11147_v44 = vld [vmem:[%s11894_s12 + $0x6e8] ss:$48 sps:$4 sm:$0xff]  }
 0x582   : > { %8823 = vmatpush1.bf16.msra.mxu1 %v11069_v45  ;;  %8742 = vmatprep.subr.bf16.mxu0 %v11074_v47  ;;  %v11152_v45 = vld [vmem:[%s11894_s12 + $0x744] ss:$48 sps:$4 sm:$0xff]   ;;  %v11155_v47 = vld [vmem:[%s11894_s12 + $0x74c] ss:$48 sps:$4 sm:$0xff]  }
 0x583   : > { %8824 = vmatprep.subr.bf16.mxu1 %v11077_v48  ;;  %v11153_v48 = vld [vmem:[%s11894_s12 + $0x748] ss:$48 sps:$4 sm:$0xff]  }
 0x585   : > { %8743 = vmatpush1.bf16.msra.mxu0 %v11072_v49  ;;  %v11158_v49 = vld [vmem:[%s11894_s12 + $0x7a4] ss:$48 sps:$4 sm:$0xff]  }
 0x586   : > { %8825 = vmatpush1.bf16.msra.mxu1 %v11075_v25  ;;  %8744 = vmatprep.subr.bf16.mxu0 %v11080_v58  ;;  %v11161_v25 = vld [vmem:[%s11894_s12 + $0x7ac] ss:$48 sps:$4 sm:$0xff]   ;;  %v11156_v58 = vld [vmem:[%s11894_s12 + $0x7a0] ss:$48 sps:$4 sm:$0xff]  }
 0x587   : > { %8826 = vmatprep.subr.bf16.mxu1 %v11083_v51  ;;  %v11159_v51 = vld [vmem:[%s11894_s12 + $0x7a8] ss:$48 sps:$4 sm:$0xff]  }
 0x589   : > { %8745 = vmatpush1.bf16.msra.mxu0 %v11078_v52  ;;  %v11164_v52 = vld [vmem:[%s11894_s12 + $0x804] ss:$48 sps:$4 sm:$0xff]  }
 0x58a   : > { %8827 = vmatpush1.bf16.msra.mxu1 %v11081_v12  ;;  %8746 = vmatprep.subr.bf16.mxu0 %v11086_v54  ;;  %v11167_v12 = vld [vmem:[%s11894_s12 + $0x80c] ss:$48 sps:$4 sm:$0xff]   ;;  %v11162_v54 = vld [vmem:[%s11894_s12 + $0x800] ss:$48 sps:$4 sm:$0xff]  }
 0x58b   : > { %8828 = vmatprep.subr.bf16.mxu1 %v11089_v53  ;;  %v11165_v53 = vld [vmem:[%s11894_s12 + $0x808] ss:$48 sps:$4 sm:$0xff]  }
 0x58d   : > { %8747 = vmatpush1.bf16.msra.mxu0 %v11084_v34  ;;  %v11170_v34 = vld [vmem:[%s11894_s12 + $0x864] ss:$48 sps:$4 sm:$0xff]  }
 0x58e   : > { %8829 = vmatpush1.bf16.msra.mxu1 %v11087_v55  ;;  %8748 = vmatprep.subr.bf16.mxu0 %v11092_v35 }
 0x58f   : > { %8830 = vmatprep.subr.bf16.mxu1 %v11095_v19  ;;  %v11173_v19 = vld [vmem:[%s11894_s12 + $0x86c] ss:$48 sps:$4 sm:$0xff]  }
 0x591   : > { %8749 = vmatpush1.bf16.msra.mxu0 %v11090_v40 }
 0x592   : > { %8831 = vmatpush1.bf16.msra.mxu1 %v11093_v62  ;;  %8750 = vmatprep.subr.bf16.mxu0 %v11098_v63 }
 0x593   : > { %8832 = vmatprep.subr.bf16.mxu1 %v11101_v0 }
 0x595   : > { %8751 = vmatpush1.bf16.msra.mxu0 %v11096_v39  ;;  %v11168_v39 = vld [vmem:[%s11894_s12 + $0x860] ss:$48 sps:$4 sm:$0xff]  }
 0x596   : > { %8833 = vmatpush1.bf16.msra.mxu1 %v11099_v1  ;;  %8752 = vmatprep.subr.bf16.mxu0 %v11104_v38 }
 0x597   : > { %8834 = vmatprep.subr.bf16.mxu1 %v11107_v3  ;;  %v11171_v3 = vld [vmem:[%s11894_s12 + $0x868] ss:$48 sps:$4 sm:$0xff]  }
 0x599   : > { %8753 = vmatpush1.bf16.msra.mxu0 %v11102_v4  ;;  %v11176_v4 = vld [vmem:[%s11894_s12 + $0x8c4] ss:$48 sps:$4 sm:$0xff]  }
 0x59a   : > { %8835 = vmatpush1.bf16.msra.mxu1 %v11105_v5  ;;  %8754 = vmatprep.subr.bf16.mxu0 %v11110_v6  ;;  %v11179_v5 = vld [vmem:[%s11894_s12 + $0x8cc] ss:$48 sps:$4 sm:$0xff]   ;;  %v11174_v6 = vld [vmem:[%s11894_s12 + $0x8c0] ss:$48 sps:$4 sm:$0xff]  }
 0x59b   : > { %8836 = vmatprep.subr.bf16.mxu1 %v11113_v7  ;;  %v11177_v7 = vld [vmem:[%s11894_s12 + $0x8c8] ss:$48 sps:$4 sm:$0xff]  }
 0x59d   : > { %8755 = vmatpush1.bf16.msra.mxu0 %v11108_v8  ;;  %v11182_v8 = vld [vmem:[%s11894_s12 + $0x924] ss:$48 sps:$4 sm:$0xff]  }
 0x59e   : > { %8837 = vmatpush1.bf16.msra.mxu1 %v11111_v24  ;;  %8756 = vmatprep.subr.bf16.mxu0 %v11116_v9  ;;  %v11185_v24 = vld [vmem:[%s11894_s12 + $0x92c] ss:$48 sps:$4 sm:$0xff]   ;;  %v11180_v9 = vld [vmem:[%s11894_s12 + $0x920] ss:$48 sps:$4 sm:$0xff]  }
 0x59f   : > { %8838 = vmatprep.subr.bf16.mxu1 %v11119_v10  ;;  %v11183_v10 = vld [vmem:[%s11894_s12 + $0x928] ss:$48 sps:$4 sm:$0xff]  }
 0x5a1   : > { %8757 = vmatpush1.bf16.msra.mxu0 %v11114_v11  ;;  %v11188_v11 = vld [vmem:[%s11894_s12 + $0x984] ss:$48 sps:$4 sm:$0xff]  }
 0x5a2   : > { %8839 = vmatpush1.bf16.msra.mxu1 %v11117_v13  ;;  %8758 = vmatprep.subr.bf16.mxu0 %v11122_v57  ;;  %v11191_v13 = vld [vmem:[%s11894_s12 + $0x98c] ss:$48 sps:$4 sm:$0xff]   ;;  %v11186_v57 = vld [vmem:[%s11894_s12 + $0x980] ss:$48 sps:$4 sm:$0xff]  }
 0x5a3   : > { %8840 = vmatprep.subr.bf16.mxu1 %v11125_v14  ;;  %v11189_v14 = vld [vmem:[%s11894_s12 + $0x988] ss:$48 sps:$4 sm:$0xff]  }
 0x5a5   : > { %8759 = vmatpush1.bf16.msra.mxu0 %v11120_v17  ;;  %v11194_v17 = vld [vmem:[%s11894_s12 + $0x9e4] ss:$48 sps:$4 sm:$0xff]  }
 0x5a6   : > { %8841 = vmatpush1.bf16.msra.mxu1 %v11123_v18  ;;  %8760 = vmatprep.subr.bf16.mxu0 %v11128_v20  ;;  %v11197_v18 = vld [vmem:[%s11894_s12 + $0x9ec] ss:$48 sps:$4 sm:$0xff]   ;;  %v11192_v20 = vld [vmem:[%s11894_s12 + $0x9e0] ss:$48 sps:$4 sm:$0xff]  }
 0x5a7   : > { %8842 = vmatprep.subr.bf16.mxu1 %v11131_v21  ;;  %v11195_v21 = vld [vmem:[%s11894_s12 + $0x9e8] ss:$48 sps:$4 sm:$0xff]  }
 0x5a9   : > { %8761 = vmatpush1.bf16.msra.mxu0 %v11126_v22  ;;  %v11200_v22 = vld [vmem:[%s11894_s12 + $0xa44] ss:$48 sps:$4 sm:$0xff]  }
 0x5aa   : > { %8843 = vmatpush1.bf16.msra.mxu1 %v11129_v59  ;;  %8771 = vmatprep.subr.bf16.mxu0 %v11134_v26  ;;  %v11203_v59 = vld [vmem:[%s11894_s12 + $0xa4c] ss:$48 sps:$4 sm:$0xff]   ;;  %v11198_v26 = vld [vmem:[%s11894_s12 + $0xa40] ss:$48 sps:$4 sm:$0xff]  }
 0x5ab   : > { %8853 = vmatprep.subr.bf16.mxu1 %v11137_v27  ;;  %v11201_v27 = vld [vmem:[%s11894_s12 + $0xa48] ss:$48 sps:$4 sm:$0xff]  }
 0x5ac   : > { %8763 = vmatmul.mubr.bf16.vlgmr.msra.gmra.mrb[16].mxu0 %v12902_v36 }
 0x5ad   : > { %8845 = vmatmul.mubr.bf16.vlgmr.msra.gmra.mrb[16].mxu1 %v12902_v36  ;;  %8772 = vmatpush1.bf16.msra.mxu0 %v11132_v28  ;;  %v11144_v36 = vld [vmem:[%s11894_s12 + $0x6e0] ss:$48 sps:$4 sm:$0xff]   ;;  %v11206_v28 = vld [vmem:[%s11894_s12 + $0xaa4] ss:$48 sps:$4 sm:$0xff]  }
 0x5ae   : > { %8803 = vmatprep.mubr.bf16.mxu0 %v12908_v41  ;;  %8854 = vmatpush1.bf16.msra.mxu1 %v11135_v29  ;;  %v11209_v29 = vld [vmem:[%s11894_s12 + $0xaac] ss:$48 sps:$4 sm:$0xff]  }
 0x5af   : > { %8885 = vmatprep.mubr.bf16.mxu1 %v12908_v41  ;;  %8773 = vmatprep.subr.bf16.mxu0 %v11140_v32  ;;  %v11150_v41 = vld [vmem:[%s11894_s12 + $0x740] ss:$48 sps:$4 sm:$0xff]  }
 0x5b0   : > { %8855 = vmatprep.subr.bf16.mxu1 %v11143_v37  ;;  %v11204_v32 = vld [vmem:[%s11894_s12 + $0xaa0] ss:$48 sps:$4 sm:$0xff]   ;;  %v11207_v37 = vld [vmem:[%s11894_s12 + $0xaa8] ss:$48 sps:$4 sm:$0xff]  }
 0x5b1   : > { %8774 = vmatpush1.bf16.msra.mxu0 %v11138_v23  ;;  %v11212_v23 = vld [vmem:[%s11894_s12 + $0xb04] ss:$48 sps:$4 sm:$0xff]  }
 0x5b2   : > { %8856 = vmatpush1.bf16.msra.mxu1 %v11141_v16  ;;  %8775 = vmatprep.subr.bf16.mxu0 %v11146_v42  ;;  %v11215_v16 = vld [vmem:[%s11894_s12 + $0xb0c] ss:$48 sps:$4 sm:$0xff]   ;;  %v11210_v42 = vld [vmem:[%s11894_s12 + $0xb00] ss:$48 sps:$4 sm:$0xff]  }
 0x5b3   : > { %8857 = vmatprep.subr.bf16.mxu1 %v11149_v43  ;;  %v11213_v43 = vld [vmem:[%s11894_s12 + $0xb08] ss:$48 sps:$4 sm:$0xff]  }
 0x5b5   : > { %8776 = vmatpush1.bf16.msra.mxu0 %v11144_v36  ;;  %v11218_v36 = vld [vmem:[%s11894_s12 + $0xb64] ss:$48 sps:$4 sm:$0xff]  }
 0x5b6   : > { %8858 = vmatpush1.bf16.msra.mxu1 %v11147_v44  ;;  %8777 = vmatprep.subr.bf16.mxu0 %v11152_v45  ;;  %v11221_v44 = vld [vmem:[%s11894_s12 + $0xb6c] ss:$48 sps:$4 sm:$0xff]   ;;  %v11216_v45 = vld [vmem:[%s11894_s12 + $0xb60] ss:$48 sps:$4 sm:$0xff]  }
 0x5b7   : > { %8859 = vmatprep.subr.bf16.mxu1 %v11155_v47  ;;  %v11219_v47 = vld [vmem:[%s11894_s12 + $0xb68] ss:$48 sps:$4 sm:$0xff]  }
 0x5b9   : > { %8778 = vmatpush1.bf16.msra.mxu0 %v11150_v41  ;;  %v11224_v41 = vld [vmem:[%s11894_s12 + $0xbc4] ss:$48 sps:$4 sm:$0xff]  }
 0x5ba   : > { %8860 = vmatpush1.bf16.msra.mxu1 %v11153_v48  ;;  %8779 = vmatprep.subr.bf16.mxu0 %v11158_v49  ;;  %v11227_v48 = vld [vmem:[%s11894_s12 + $0xbcc] ss:$48 sps:$4 sm:$0xff]   ;;  %v11222_v49 = vld [vmem:[%s11894_s12 + $0xbc0] ss:$48 sps:$4 sm:$0xff]  }
 0x5bb   : > { %8861 = vmatprep.subr.bf16.mxu1 %v11161_v25  ;;  %v11225_v25 = vld [vmem:[%s11894_s12 + $0xbc8] ss:$48 sps:$4 sm:$0xff]  }
 0x5bd   : > { %8780 = vmatpush1.bf16.msra.mxu0 %v11156_v58 }
 0x5be   : > { %8862 = vmatpush1.bf16.msra.mxu1 %v11159_v51  ;;  %8781 = vmatprep.subr.bf16.mxu0 %v11164_v52 }
 0x5bf   : > { %v13209_v55 = vpop.f32.mrb[8].mxu0  ;;  %v13211_v35 = vpop.f32.mrb[8].mxu1  ;;  %8863 = vmatprep.subr.bf16.mxu1 %v11167_v12 }
 0x5c0   : > { %v13214_v40 = vpop.f32.mrb[9].mxu0  ;;  %v13216_v62 = vpop.f32.mrb[9].mxu1 }
 0x5c1   : > { %v8481_v63 = vpop.f32.mrb[10].mxu0  ;;  %v8563_v0 = vpop.f32.mrb[10].mxu1  ;;  %8782 = vmatpush1.bf16.msra.mxu0 %v11162_v54 }
 0x5c2   : > { %8864 = vmatpush1.bf16.msra.mxu1 %v11165_v53  ;;  %v8482_v1 = vpop.f32.mrb[11].mxu0  ;;  %v8564_v38 = vpop.f32.mrb[11].mxu1  ;;  %8783 = vmatprep.subr.bf16.mxu0 %v11170_v34 }
 0x5c3   : > { %8865 = vmatprep.subr.bf16.mxu1 %v11173_v19 }
 0x5c5   : > { %8784 = vmatpush1.bf16.msra.mxu0 %v11168_v39 }
 0x5c6   : > { %8866 = vmatpush1.bf16.msra.mxu1 %v11171_v3  ;;  %8785 = vmatprep.subr.bf16.mxu0 %v11176_v4 }
 0x5c7   : > { %8867 = vmatprep.subr.bf16.mxu1 %v11179_v5  ;;  %v8898_v5 = vld [vmem:[#allocation10] sm:$0xff] (!%p10378_p10) }
 0x5c9   : > { %8786 = vmatpush1.bf16.msra.mxu0 %v11174_v6  ;;  %v8905_v6 = vrot.slane (!%p10378_p10), %v8898_v5, %v12864_v31 }
 0x5ca   : > { %8868 = vmatpush1.bf16.msra.mxu1 %v11177_v7  ;;  %8787 = vmatprep.subr.bf16.mxu0 %v11182_v8  ;;  %v8909_v7 = vrot.slane (!%p10378_p10), %v8898_v5, %v12871_v2  ;;  %v8913_v8 = vrot.slane (!%p10378_p10), %v8898_v5, %v12868_v33 }
 0x5cb   : > { %8869 = vmatprep.subr.bf16.mxu1 %v11185_v24  ;;  %v8917_v24 = vrot.slane (!%p10378_p10), %v8898_v5, %v12874_v46 }
 0x5cd   : > { %8788 = vmatpush1.bf16.msra.mxu0 %v11180_v9  ;;  %v8921_v9 = vrot.slane (!%p10378_p10), %v8898_v5, %v1178_v56  ;;  %v8965_v56 = vadd.f32 (!%p10378_p10), %v8917_v24, %v13216_v62 }
 0x5ce   : > { %8870 = vmatpush1.bf16.msra.mxu1 %v11183_v10  ;;  %8789 = vmatprep.subr.bf16.mxu0 %v11188_v11  ;;  %v8925_v10 = vrot.slane (!%p10378_p10), %v8898_v5, %v1182_v15  ;;  %v8929_v11 = vrot.slane (!%p10378_p10), %v8898_v5, %v1186_v60 }
 0x5cf   : > { %8871 = vmatprep.subr.bf16.mxu1 %v11191_v13  ;;  %v8933_v13 = vrot.slane (!%p10378_p10), %v8898_v5, %v1190_v61  ;;  %8977 = vst [vmem:[%s13276_s29 + $0x18] sm:$0xff] (!%p10378_p10), %v8965_v56 }
 0x5d1   : > { %8790 = vmatpush1.bf16.msra.mxu0 %v11186_v57  ;;  %v8899_v57 = vld [vmem:[#allocation10 + $0x8] sm:$0xf] (!%p10378_p10) }
 0x5d2   : > { %8872 = vmatpush1.bf16.msra.mxu1 %v11189_v14  ;;  %8791 = vmatprep.subr.bf16.mxu0 %v11194_v17  ;;  %v8962_v14 = vadd.f32 (!%p10378_p10), %v8905_v6, %v13209_v55  ;;  %v8963_v17 = vadd.f32 (!%p10378_p10), %v8909_v7, %v13214_v40 }
 0x5d3   : > { %8873 = vmatprep.subr.bf16.mxu1 %v11197_v18  ;;  %v8964_v18 = vadd.f32 (!%p10378_p10), %v8913_v8, %v13211_v35 }
 0x5d4   : > { %8974 = vst [vmem:[%s13276_s29] sm:$0xff] (!%p10378_p10), %v8962_v14  ;;  %8975 = vst [vmem:[%s13276_s29 + $0x8] sm:$0xff] (!%p10378_p10), %v8963_v17 }
 0x5d5   : > { %8792 = vmatpush1.bf16.msra.mxu0 %v11192_v20  ;;  %8976 = vst [vmem:[%s13276_s29 + $0x10] sm:$0xff] (!%p10378_p10), %v8964_v18  ;;  %v8937_v20 = vrot.slane (!%p10378_p10), %v8899_v57, %v12864_v31 }
 0x5d6   : > { %8874 = vmatpush1.bf16.msra.mxu1 %v11195_v21  ;;  %8793 = vmatprep.subr.bf16.mxu0 %v11200_v22  ;;  %v8941_v21 = vrot.slane (!%p10378_p10), %v8899_v57, %v12871_v2  ;;  %v8945_v22 = vrot.slane (!%p10378_p10), %v8899_v57, %v12868_v33 }
 0x5d7   : > { %8875 = vmatprep.subr.bf16.mxu1 %v11203_v59  ;;  %v8949_v59 = vrot.slane (!%p10378_p10), %v8899_v57, %v12874_v46 }
 0x5d9   : > { %8794 = vmatpush1.bf16.msra.mxu0 %v11198_v26 }
 0x5da   : > { %8876 = vmatpush1.bf16.msra.mxu1 %v11201_v27  ;;  %8795 = vmatprep.subr.bf16.mxu0 %v11206_v28 }
 0x5db   : > { %8877 = vmatprep.subr.bf16.mxu1 %v11209_v29 }
 0x5dd   : > { %8796 = vmatpush1.bf16.msra.mxu0 %v11204_v32 }
 0x5de   : > { %8878 = vmatpush1.bf16.msra.mxu1 %v11207_v37  ;;  %8797 = vmatprep.subr.bf16.mxu0 %v11212_v23 }
 0x5df   : > { %8879 = vmatprep.subr.bf16.mxu1 %v11215_v16 }
 0x5e1   : > { %8798 = vmatpush1.bf16.msra.mxu0 %v11210_v42 }
 0x5e2   : > { %8880 = vmatpush1.bf16.msra.mxu1 %v11213_v43  ;;  %8799 = vmatprep.subr.bf16.mxu0 %v11218_v36 }
 0x5e3   : > { %8881 = vmatprep.subr.bf16.mxu1 %v11221_v44 }
 0x5e5   : > { %8800 = vmatpush1.bf16.msra.mxu0 %v11216_v45 }
 0x5e6   : > { %8882 = vmatpush1.bf16.msra.mxu1 %v11219_v47  ;;  %8801 = vmatprep.subr.bf16.mxu0 %v11224_v41 }
 0x5e7   : > { %8883 = vmatprep.subr.bf16.mxu1 %v11227_v48 }
 0x5e9   : > { %8802 = vmatpush1.bf16.msra.mxu0 %v11222_v49 }
 0x5ea   : > { %8884 = vmatpush1.bf16.msra.mxu1 %v11225_v25 }
 0x5ec   : > { %8804 = vmatmul.mubr.bf16.vlgmr.msra.gmra.mrb[16].mxu0 %v12977_v50 }
 0x5ed   : > { %8886 = vmatmul.mubr.bf16.vlgmr.msra.gmra.mrb[16].mxu1 %v12977_v50 }
 0x63f   : > { %v13258_v58 = vpop.f32.mrb[12].mxu0 }
 0x640   : > { %v13260_v51 = vpop.f32.mrb[12].mxu1  ;;  %v13262_v52 = vpop.f32.mrb[13].mxu0  ;;  %v8966_v15 = vadd.f32 (!%p10378_p10), %v8921_v9, %v13258_v58 }
 0x641   : > { %v13264_v12 = vpop.f32.mrb[13].mxu1  ;;  %v8645_v54 = vpop.f32.mrb[14].mxu0  ;;  %v8967_v60 = vadd.f32 (!%p10378_p10), %v8925_v10, %v13262_v52  ;;  %v8968_v30 = vadd.f32 (!%p10378_p10), %v8929_v11, %v13260_v51 }
 0x642   : > { %v8727_v53 = vpop.f32.mrb[14].mxu1  ;;  %v8646_v34 = vpop.f32.mrb[15].mxu0  ;;  %v8969_v61 = vadd.f32 (!%p10378_p10), %v8933_v13, %v13264_v12  ;;  %8978 = vst [vmem:[%s13276_s29 + $0x20] sm:$0xff] (!%p10378_p10), %v8966_v15 }
 0x643   : > { %v8728_v19 = vpop.f32.mrb[15].mxu1  ;;  %8979 = vst [vmem:[%s13276_s29 + $0x28] sm:$0xff] (!%p10378_p10), %v8967_v60  ;;  %8980 = vst [vmem:[%s13276_s29 + $0x30] sm:$0xff] (!%p10378_p10), %v8968_v30 }
 0x644   : > { %8981 = vst [vmem:[%s13276_s29 + $0x38] sm:$0xff] (!%p10378_p10), %v8969_v61 }
 0x6bd   : > { %8897 = sbr.rel (%p10378_p10) target bundleno = 1733 (0x6c5), region = 64 }
 0x6bf   : > { %v13266_v63 = vpop.f32.mrb[16].mxu0 }
 0x6c0   : > { %v13268_v0 = vpop.f32.mrb[16].mxu1  ;;  %v13270_v39 = vpop.f32.mrb[17].mxu0  ;;  %v8970_v26 = vadd.f32 (!%p10378_p10), %v8937_v20, %v13266_v63 }
 0x6c1   : > { %v13272_v50 = vpop.f32.mrb[17].mxu1  ;;  %v8809_v1 = vpop.f32.mrb[18].mxu0  ;;  %v8971_v27 = vadd.f32 (!%p10378_p10), %v8941_v21, %v13270_v39  ;;  %v8972_v28 = vadd.f32 (!%p10378_p10), %v8945_v22, %v13268_v0 }
 0x6c2   : > { %v8891_v38 = vpop.f32.mrb[18].mxu1  ;;  %v8810_v3 = vpop.f32.mrb[19].mxu0  ;;  %v8973_v29 = vadd.f32 (!%p10378_p10), %v8949_v59, %v13272_v50  ;;  %8982 = vst [vmem:[%s13276_s29 + $0x40] sm:$0xff] (!%p10378_p10), %v8970_v26 }
 0x6c3   : > { %v8892_v4 = vpop.f32.mrb[19].mxu1  ;;  %8983 = vst [vmem:[%s13276_s29 + $0x48] sm:$0xff] (!%p10378_p10), %v8971_v27  ;;  %8984 = vst [vmem:[%s13276_s29 + $0x50] sm:$0xff] (!%p10378_p10), %v8972_v28 }
 0x6c4   : > { %8985 = vst [vmem:[%s13276_s29 + $0x58] sm:$0xff] %v8973_v29 }
 0x6c5 PF: > { %s13479_s6 = sld [smem:[#allocation18_spill]] }
 0x6cb   : > { %p10379_p11 = scmp.le.s32.totalorder %s13479_s6, 0 }
 0x6cc   : > { %v8990_v31 = vld [vmem:[%s13276_s29] sm:$0xff] (!%p10379_p11)  ;;  %v8991_v33 = vld [vmem:[%s13276_s29 + $0x8] sm:$0xff] (!%p10379_p11)  ;;  %v8992_v2 = vld [vmem:[%s13276_s29 + $0x10] sm:$0xff] (!%p10379_p11) }
 0x6cd   : > { %8989 = sbr.rel (%p10379_p11) target bundleno = 1749 (0x6d5), region = 68  ;;  %v9002_v46 = vadd.f32 (!%p10379_p11), %v8990_v31, %v13209_v55  ;;  %v9003_v32 = vadd.f32 (!%p10379_p11), %v8991_v33, %v13214_v40  ;;  %v9004_v37 = vadd.f32 (!%p10379_p11), %v8992_v2, %v13211_v35  ;;  %v8993_v23 = vld [vmem:[%s13276_s29 + $0x18] sm:$0xff] (!%p10379_p11)  ;;  %v8994_v16 = vld [vmem:[%s13276_s29 + $0x20] sm:$0xff] (!%p10379_p11)  ;;  %v8995_v42 = vld [vmem:[%s13276_s29 + $0x28] sm:$0xff] (!%p10379_p11) }
 0x6ce   : > { %v9005_v43 = vadd.f32 (!%p10379_p11), %v8993_v23, %v13216_v62  ;;  %v9006_v36 = vadd.f32 (!%p10379_p11), %v8994_v16, %v13258_v58  ;;  %v9007_v44 = vadd.f32 (!%p10379_p11), %v8995_v42, %v13262_v52  ;;  %v8996_v55 = vld [vmem:[%s13276_s29 + $0x30] sm:$0xff] (!%p10379_p11)  ;;  %v8997_v45 = vld [vmem:[%s13276_s29 + $0x38] sm:$0xff] (!%p10379_p11)  ;;  %v8998_v40 = vld [vmem:[%s13276_s29 + $0x40] sm:$0xff] (!%p10379_p11) }
 0x6cf   : > { %9014 = vst [vmem:[%s13276_s29] sm:$0xff] (!%p10379_p11), %v9002_v46  ;;  %9015 = vst [vmem:[%s13276_s29 + $0x8] sm:$0xff] (!%p10379_p11), %v9003_v32  ;;  %v9008_v35 = vadd.f32 (!%p10379_p11), %v8996_v55, %v13260_v51  ;;  %v9009_v62 = vadd.f32 (!%p10379_p11), %v8997_v45, %v13264_v12  ;;  %v9010_v47 = vadd.f32 (!%p10379_p11), %v8998_v40, %v13266_v63  ;;  %v8999_v41 = vld [vmem:[%s13276_s29 + $0x48] sm:$0xff] (!%p10379_p11)  ;;  %v9000_v48 = vld [vmem:[%s13276_s29 + $0x50] sm:$0xff] (!%p10379_p11) }
 0x6d0   : > { %9016 = vst [vmem:[%s13276_s29 + $0x10] sm:$0xff] (!%p10379_p11), %v9004_v37  ;;  %v9001_v49 = vld [vmem:[%s13276_s29 + $0x58] sm:$0xff] (!%p10379_p11)  ;;  %9017 = vst [vmem:[%s13276_s29 + $0x18] sm:$0xff] (!%p10379_p11), %v9005_v43  ;;  %v9011_v25 = vadd.f32 (!%p10379_p11), %v8999_v41, %v13270_v39  ;;  %v9012_v58 = vadd.f32 (!%p10379_p11), %v9000_v48, %v13268_v0 }
 0x6d1   : > { %9018 = vst [vmem:[%s13276_s29 + $0x20] sm:$0xff] (!%p10379_p11), %v9006_v36  ;;  %9019 = vst [vmem:[%s13276_s29 + $0x28] sm:$0xff] (!%p10379_p11), %v9007_v44  ;;  %v9013_v52 = vadd.f32 (!%p10379_p11), %v9001_v49, %v13272_v50 }
 0x6d2   : > { %9020 = vst [vmem:[%s13276_s29 + $0x30] sm:$0xff] (!%p10379_p11), %v9008_v35  ;;  %9021 = vst [vmem:[%s13276_s29 + $0x38] sm:$0xff] (!%p10379_p11), %v9009_v62 }
 0x6d3   : > { %9022 = vst [vmem:[%s13276_s29 + $0x40] sm:$0xff] (!%p10379_p11), %v9010_v47  ;;  %9023 = vst [vmem:[%s13276_s29 + $0x48] sm:$0xff] (!%p10379_p11), %v9011_v25 }
 0x6d4   : > { %9024 = vst [vmem:[%s13276_s29 + $0x50] sm:$0xff] %v9012_v58  ;;  %9025 = vst [vmem:[%s13276_s29 + $0x58] sm:$0xff] %v9013_v52 }
 0x6d5 PF: > { %s13480_s18 = sld [smem:[#allocation19_spill]]  ;;  %s13481_s30 = sld [smem:[#allocation23_spill]] }
 0x6d6   : > { %s9041_s27 = sshll.u32 %s13276_s29, 4  ;;  %s13482_s11 = sld [smem:[#allocation28_spill]]  ;;  %s9042_s27 = int_to_ptr.vmem [resolvable:$true] %s9041_s27 }
 0x6d7   : > { %s9027_s24 = scalar_lea.sflag [#allocation4], %s11874_s21  ;;  %s11392_s1 = scalar_lea.vmem %s9042_s27, 1536 }
 0x6d8   : > { %p11393_p2 = scmp.ne.s32.totalorder %s9042_s27, %s11392_s1  ;;  %s11538_s14 = smov [#allocation11]  }
 0x6d9   : > { %s11396_s17 = sshll.u32 %s11538_s14, 4  ;;  %s11397_s17 = int_to_ptr.vmem [resolvable:$false] %s11396_s17 }
 0x6da   : > { %s11398_s15 = scalar_lea.vmem %s11397_s17, 3072  ;;  %p11399_p3 = scmp.lt.s32.totalorder %s9042_s27, %s11397_s17 }
 0x6db   : > { %s10506_s25 = smul.u32 1536, %s13480_s18  ;;  %p13483_p7 = scmp.ne.s32.totalorder %s13481_s30, 0 }
 0x6dc   : > { %p11400_p6 = scmp.lt.s32.totalorder %s11398_s15, %s11392_s1 }
 0x6dd   : > { %s13361_s16 = scalar_lea.hbm %s13482_s11, %s10506_s25  ;;  %p11394_p1 = pnand %p11393_p2, %p13483_p7 }
 0x6de   : > { %p11401_p13 = por %p11400_p6, %p11399_p3 }
 0x6df   : > { %p11395_p12 = pneg %p11394_p1 }
 0x6e1   : > { %p11402_p5 = pnand %p11401_p13, %p11395_p12 }
 0x6e3   : > { %11405 = shalt.err (!%p11402_p5)
}
 0x6e4   : > { %s11406_s21 = scalar_lea.hbm %s13361_s16, 1536  ;;  %s11410_s12 = scalar_lea.hbm %s13482_s11, 3072 }
 0x6e5   : > { %p11407_p0 = scmp.ne.s32.totalorder %s13361_s16, %s11406_s21  ;;  %p11411_p9 = scmp.lt.u32.totalorder %s13361_s16, %s13482_s11 }
 0x6e6   : > { %p11412_p10 = scmp.lt.u32.totalorder %s11410_s12, %s11406_s21  ;;  %p11414_p2 = scmp.lt.u32.totalorder %s11406_s21, %s13361_s16 }
 0x6e7   : > { %p11408_p8 = pnand %p11407_p0, %p13483_p7 }
 0x6e8   : > { %p11413_p11 = por %p11412_p10, %p11411_p9 }
 0x6e9   : > { %p11409_p4 = pneg %p11408_p8 }
 0x6ea   : > { %p11415_p1 = por %p11414_p2, %p11413_p11 }
 0x6ec   : > { %p11416_p12 = pnand %p11415_p1, %p11409_p4 }
 0x6ee   : > { %11419 = shalt.err (!%p11416_p12)
}
 0x6ef   : > { %10519 = dma.vmem_to_hbm [thread:$0]  (%p13483_p7), %s9042_s27, 1536, %s13361_s16, %s9027_s24  }
 0x6f0 PF: > { %s13484_s9 = sld [smem:[#allocation17_spill]]  ;;  %s13485_s6 = sld [smem:[#allocation21_spill]] }
 0x6f1   : > { %p10545_p3 = scmp.ge.s32.totalorder %s11526_s28, 2 }
 0x6f6   : > { %s9053_s18 = sand.u32 1, %s13484_s9   ;;  %p13486_p6 = scmp.ne.s32.totalorder %s13485_s6, 0 }
 0x6f7   : > { %s9054_s25 = scalar_lea.sflag [#allocation4], %s9053_s18 }
 0x6f8   : > { %p10539_p13 = pnand %p10545_p3, %p13486_p6 }
 0x6fa   : > { %11481 = dma.done.wait (!%p10539_p13), %s9054_s25, 1536  }
 0x6fb   : > { %11483 = vsyncadd (!%p10539_p13), %s9054_s25, 4294965760  ;;  %s27_s28 = sadd.s32 1, %s11526_s28   ;;  %s13487_s30 = sld [smem:[#allocation25_spill]] }
 0x6fc   : > { %p24_p5 = scmp.ge.s32.totalorder %s27_s28, 18   ;;  %s13488_s25 = sld [smem:[#allocation20_spill]] }
 0x6fd   : > { %s13489_s27 = sld [smem:[#allocation22_spill]]  ;;  %s13490_s13 = sld [smem:[#allocation24_spill]] }
 0x6fe   : > { %s13491_s18 = smov %s11490_s19  ;;  %s13492_s19 = smov %s11494_s20 }
 0x6ff   : > { %s13493_s20 = smov %s11765_s4  ;;  %s13494_s21 = smov %s11502_s22 }
 0x700   : > { %s13495_s22 = smov %s11506_s23  ;;  %s13497_s24 = smov %s11518_s26 }
 0x701   : > { %s13496_s23 = smov %s13487_s30  ;;  %26 = sbr.rel (!%p24_p5) target bundleno = 17 (0x11), region = 134 }
 0x703   : > { %s13498_s26 = smov %s13489_s27  ;;  %s13499_s27 = smov %s13490_s13 }
 0x708   :  { %9059 = vsyncpa [#allocation3], 1 }
 0x709   :  { %9061 = vsyncpa [#allocation3 + $0x1], 1 }
 0x70a   :  { %9062 = vsyncpa [#allocation6], 1 }
 0x70b   :  { %9064 = vsyncpa [#allocation6 + $0x1], 1 }
 0x70c   :  { %9065 = vsyncpa [#allocation9], 1 }
 0x70d   :  { %9067 = vsyncpa [#allocation9 + $0x1], 1 }
 0x70e   :  { %9068 = vsyncpa [#allocation4], 1 }
 0x70f   :  { %9070 = vsyncpa [#allocation4 + $0x1], 1 }

</bundles_post_ra>
